<compile_context>
chip_gen: v7x
topology: tpu7x:2x2x1
jax: 0.10.0
libtpu: 0.0.40
codegen_flags: <defaults>
</compile_context>

<pallas_src>
import functools

import jax
import jax.numpy as jnp
from jax.experimental import pallas as pl
from jax.experimental.pallas import tpu as pltpu


# -----------------------------------------------------------------------------
# VMEM budgeting (v7x: 64 MiB physical; v5e/v6e: 128 MiB).
# -----------------------------------------------------------------------------
def _vmem_caps():
    cap = 64 * 1024 * 1024                     # conservative default (v7x)
    try:
        cap = int(pltpu.get_tpu_info().vmem_capacity_bytes)
    except Exception:
        pass
    block_budget = cap // 4                    # room for double buffers/spills
    vmem_limit = min((3 * cap) // 4, 100 * 1024 * 1024)
    return block_budget, vmem_limit


def _largest_divisor_not_above(n, cap):
    best = 1
    for d in range(1, n + 1):
        if n % d == 0 and d <= cap:
            best = d
    return best


def _pick_row_block(rows, cap=1024):
    if rows <= cap:
        return rows
    for d in range(cap, 7, -8):                # multiples of 8 only
        if rows % d == 0:
            return d
    return rows


# -----------------------------------------------------------------------------
# Kernel 1: AdaBin binarize -> halo-padded 3x3 binary conv (9 per-tap bf16 MXU
#           matmuls, f32 accumulation) -> per-block BN statistics.
#           One program per block of B batch images.
# -----------------------------------------------------------------------------
def _make_conv_kernel(stride, H, W, Cin, Cout, Hout, Wout, B):
    n_phase = 1 if stride == 1 else 4
    M = B * Hout * Wout

    def kernel(*refs):
        phase_refs = refs[:n_phase]
        w_ref = refs[n_phase]                  # (9, Cin, Cout) bf16 (resident)
        ab_ref = refs[n_phase + 1]             # (3,) f32 SMEM: beta, beta+a, beta-a
        conv_ref = refs[n_phase + 2]           # (M, Cout) bf16
        stats_ref = refs[n_phase + 3]          # (2, Cout) f32
        scr_refs = refs[n_phase + 4:]

        beta_a = ab_ref[0]
        hi = ab_ref[1]                         # +alpha_a + beta_a
        lo = ab_ref[2]                         # -alpha_a + beta_a

        def binarize(ref):
            # torch.sign semantics (value exactly at beta_a -> 0 -> stays beta_a)
            v = ref[...].astype(jnp.float32)
            return jnp.where(v > beta_a, hi, jnp.where(v < beta_a, lo, beta_a))

        if stride == 1:
            scr = scr_refs[0]                               # (B, H+2, W+2, Cin) f32
            # halo-only zeroing: interior is written exactly once below.
            zr = jnp.zeros((B, 1, W + 2, Cin), jnp.float32)
            zc = jnp.zeros((B, H + 2, 1, Cin), jnp.float32)
            scr[:, 0:1, :, :] = zr
            scr[:, H + 1:H + 2, :, :] = zr
            scr[:, :, 0:1, :] = zc
            scr[:, :, W + 1:W + 2, :] = zc
            scr[:, 1:H + 1, 1:W + 1, :] = binarize(phase_refs[0])

            def tap(kh, kw):
                return scr[:, kh:kh + Hout, kw:kw + Wout, :]
        else:
            # stride == 2: parity (space-to-depth) decomposition; scratch
            # idx a*2+b holds padded rows/cols with parity (a, b).
            H2, W2 = H // 2, W // 2
            for idx in range(4):
                a, b = idx // 2, idx % 2
                scr = scr_refs[idx]                         # (B, H2+1, W2+1, Cin)
                ro, co = 1 - a, 1 - b
                hr, hc = (1 - ro) * H2, (1 - co) * W2       # halo row / col
                scr[:, hr:hr + 1, :, :] = jnp.zeros((B, 1, W2 + 1, Cin), jnp.float32)
                scr[:, :, hc:hc + 1, :] = jnp.zeros((B, H2 + 1, 1, Cin), jnp.float32)
                scr[:, ro:ro + H2, co:co + W2, :] = binarize(phase_refs[idx])

            def tap(kh, kw):
                scr = scr_refs[(kh % 2) * 2 + (kw % 2)]
                r0, c0 = kh // 2, kw // 2
                return scr[:, r0:r0 + Hout, c0:c0 + Wout, :]

        # 9 per-tap K=Cin bf16 matmuls accumulated in f32.  MXU fill is poor
        # either way (Cout=32), and the MXU has large headroom at these shapes,
        # so this avoids materializing the (M, 9*Cin) im2col patch entirely.
        conv = jnp.zeros((M, Cout), jnp.float32)
        for kh in range(3):
            for kw in range(3):
                t = kh * 3 + kw
                lhs = tap(kh, kw).astype(jnp.bfloat16).reshape(M, Cin)
                conv = conv + jnp.dot(lhs, w_ref[t],
                                      preferred_element_type=jnp.float32)

        conv_ref[...] = conv.astype(conv_ref.dtype)
        # exact per-block channel statistics for the two-pass (grid-safe) BN
        stats_ref[0:1, :] = jnp.sum(conv, axis=0, keepdims=True)
        stats_ref[1:2, :] = jnp.sum(conv * conv, axis=0, keepdims=True)

    return kernel


def _conv_forward(phases, w_bin, ab, *, stride, H, W, Cin, Cout, Hout, Wout):
    N = phases[0].shape[0]
    R = Hout * Wout
    block_budget, vmem_limit = _vmem_caps()

    # rough per-image VMEM footprint: double-buffered bf16 inputs + f32 halo
    # scratch + binarized value + f32 conv accumulator + bf16 output buffers.
    per_img = (2 * 2 * H * W * Cin
               + 4 * (H + 2) * (W + 2) * Cin
               + 4 * H * W * Cin
               + (4 + 2 * 2) * R * Cout
               + 2 * 6 * R * Cin)
    B = _largest_divisor_not_above(N, max(1, block_budget // max(per_img, 1)))
    G = N // B
    kernel = _make_conv_kernel(stride, H, W, Cin, Cout, Hout, Wout, B)

    if stride == 1:
        phase_specs = [pl.BlockSpec((B, H, W, Cin), lambda n: (n, 0, 0, 0))]
        scratch = [pltpu.VMEM((B, H + 2, W + 2, Cin), jnp.float32)]
    else:
        H2, W2 = H // 2, W // 2
        phase_specs = [pl.BlockSpec((B, H2, W2, Cin), lambda n: (n, 0, 0, 0))
                       for _ in range(4)]
        scratch = [pltpu.VMEM((B, H2 + 1, W2 + 1, Cin), jnp.float32)
                   for _ in range(4)]

    return pl.pallas_call(
        kernel,
        out_shape=(jax.ShapeDtypeStruct((N * R, Cout), jnp.bfloat16),
                   jax.ShapeDtypeStruct((G, 2, Cout), jnp.float32)),
        grid=(G,),
        in_specs=phase_specs + [
            pl.BlockSpec((9, Cin, Cout), lambda n: (0, 0, 0)),
            pl.BlockSpec(memory_space=pltpu.MemorySpace.SMEM),
        ],
        out_specs=(pl.BlockSpec((B * R, Cout), lambda n: (n, 0)),
                   pl.BlockSpec((None, 2, Cout), lambda n: (n, 0, 0))),
        scratch_shapes=scratch,
        compiler_params=pltpu.CompilerParams(
            dimension_semantics=("parallel",),
            vmem_limit_bytes=vmem_limit),
    )(*phases, w_bin, ab)


# -----------------------------------------------------------------------------
# Kernel 2: fused folded-BatchNorm affine + residual add + Maxout on a
#           lane-dense (N*Hout, Wout*Cout) slab, large row tiles per step.
# -----------------------------------------------------------------------------
def _epilogue_kernel(y_ref, res_ref, p_ref, out_ref):
    y = (y_ref[...].astype(jnp.float32) * p_ref[0:1, :] + p_ref[1:2, :]
         + res_ref[...].astype(jnp.float32))
    out_ref[...] = (p_ref[2:3, :] * jnp.maximum(y, 0.0)
                    - p_ref[3:4, :] * jnp.maximum(-y, 0.0)).astype(out_ref.dtype)


def _epilogue(y_slab, res_slab, packed, out_dtype, vmem_limit):
    rows, L = y_slab.shape
    rb = _pick_row_block(rows)
    row_spec = pl.BlockSpec((rb, L), lambda r: (r, 0))
    return pl.pallas_call(
        _epilogue_kernel,
        out_shape=jax.ShapeDtypeStruct((rows, L), out_dtype),
        grid=(rows // rb,),
        in_specs=[row_spec, row_spec,
                  pl.BlockSpec((4, L), lambda r: (0, 0))],
        out_specs=row_spec,
        compiler_params=pltpu.CompilerParams(
            dimension_semantics=("parallel",),
            vmem_limit_bytes=vmem_limit),
    )(y_slab, res_slab, packed)


# -----------------------------------------------------------------------------
# Per-stage glue: conv kernel -> exact batch BN stats -> fused epilogue.
# -----------------------------------------------------------------------------
def _run_stage(x_nhwc, w_bin, alpha_a, beta_a, gamma, beta, residual_slab,
               pos_scale, neg_scale, *, stride, out_dtype):
    N, H, W, Cin = x_nhwc.shape
    Cout = w_bin.shape[-1]
    Hout = (H + 2 - 3) // stride + 1
    Wout = (W + 2 - 3) // stride + 1
    R = Hout * Wout
    L = Wout * Cout

    if stride == 1:
        phases = [x_nhwc]
    else:
        phases = [x_nhwc[:, (1 - a)::2, (1 - b)::2, :]
                  for a in (0, 1) for b in (0, 1)]

    alpha = jnp.asarray(alpha_a, jnp.float32)
    bact = jnp.asarray(beta_a, jnp.float32)
    ab = jnp.stack([bact, bact + alpha, bact - alpha])

    conv_out, stats = _conv_forward(phases, w_bin, ab, stride=stride, H=H, W=W,
                                    Cin=Cin, Cout=Cout, Hout=Hout, Wout=Wout)

    # BatchNorm2d (module default: training-mode batch stats, biased variance,
    # eps=1e-5), folded into a per-channel affine scale/shift.
    cnt = jnp.float32(N * R)
    mean = jnp.sum(stats[:, 0, :], axis=0) / cnt
    var = jnp.maximum(jnp.sum(stats[:, 1, :], axis=0) / cnt - mean * mean, 0.0)
    scale = gamma * jax.lax.rsqrt(var + 1e-5)
    shift = beta - mean * scale

    # pack the four per-channel vectors into a single (4, L) lane-broadcast input
    packed = jnp.tile(
        jnp.stack([scale, shift,
                   jnp.asarray(pos_scale, jnp.float32),
                   jnp.asarray(neg_scale, jnp.float32)]), (1, Wout))

    _, vmem_limit = _vmem_caps()
    y_slab = conv_out.reshape(N * Hout, L)          # free (contiguous) reshape
    out_slab = _epilogue(y_slab, residual_slab, packed, out_dtype, vmem_limit)
    return out_slab, (N, Hout, Wout, Cout)


# -----------------------------------------------------------------------------
# AdaBin weight binarization (parameter setup) and the block forward.
# -----------------------------------------------------------------------------
def _adabin_weight(w):
    # Per output filter: beta_w = mean(w), alpha_w = sqrt(mean((w-beta_w)^2)),
    # w_b = alpha_w * sign(w - beta_w) + beta_w.  bf16, (9, Cin, Cout) tap-major.
    cout, cin = w.shape[0], w.shape[1]
    filt = cin * w.shape[2] * w.shape[3]
    beta_w = jnp.mean(w, axis=(1, 2, 3), keepdims=True)
    alpha_w = jnp.sqrt(jnp.sum((w - beta_w) ** 2, axis=(1, 2, 3),
                               keepdims=True) / filt)
    wb = jnp.sign(w - beta_w) * alpha_w + beta_w
    # (Cout,Cin,3,3) -> (3,3,Cin,Cout) -> (9, Cin, Cout); tap index = kh*3+kw
    return jnp.transpose(wb, (2, 3, 1, 0)).reshape(9, cin, cout).astype(
        jnp.bfloat16)


def basic_block_1w1a_forward(x_nchw, params, *, stride=1, option='A'):
    in_planes = x_nchw.shape[1]
    planes = params['conv1_w'].shape[0]

    # NCHW -> NHWC; activations in bf16 from here on (halved HBM traffic, bf16
    # MXU).  BN statistics and the BN/Maxout epilogue math remain f32.
    x = jnp.transpose(x_nchw, (0, 2, 3, 1)).astype(jnp.bfloat16)
    N, H, W, _ = x.shape
    Hout = (H + 2 - 3) // stride + 1
    Wout = (W + 2 - 3) // stride + 1

    # Shortcut: identity, or the CIFAR option-'A' LambdaLayer
    #   F.pad(x[:, :, ::2, ::2], (0,0,0,0, planes//4, planes//4)).
    if stride != 1 or in_planes != planes:
        # TODO(synk): option 'B' shortcut (1x1 AdaBin conv + BN) not implemented.
        assert option == 'A'
        sc = x_nchw[:, :, ::2, ::2]
        p = planes // 4
        sc = jnp.pad(sc, ((0, 0), (p, p), (0, 0), (0, 0)))
        sc = jnp.transpose(sc, (0, 2, 3, 1)).astype(jnp.bfloat16)
    else:
        sc = x
    sc_slab = sc.reshape(N * Hout, Wout * planes)

    # NOTE: binary_act_noise == 0.0 -> AdaBin noise injection is a no-op.

    # Stage 1: bn1(conv1(x)) + shortcut(x) -> Maxout1  (kept bf16: it feeds both
    # stage 2's conv input and stage 2's residual path).
    w1b = _adabin_weight(params['conv1_w'])
    out1_slab, shp1 = _run_stage(
        x, w1b, params['alpha_a1'], params['beta_a1'],
        params['bn1_gamma'], params['bn1_beta'], sc_slab,
        params['mx1_pos'], params['mx1_neg'],
        stride=stride, out_dtype=jnp.bfloat16)
    out1_nhwc = out1_slab.reshape(shp1)

    # Stage 2: bn2(conv2(out1)) + out1 -> Maxout2  (final block output f32).
    w2b = _adabin_weight(params['conv2_w'])
    out2_slab, shp2 = _run_stage(
        out1_nhwc, w2b, params['alpha_a2'], params['beta_a2'],
        params['bn2_gamma'], params['bn2_beta'], out1_slab,
        params['mx2_pos'], params['mx2_neg'],
        stride=1, out_dtype=jnp.float32)
    out2 = out2_slab.reshape(shp2)

    return jnp.transpose(out2, (0, 3, 1, 2))                   # NHWC -> NCHW


def init_params(key, in_planes, planes):
    k1, k2 = jax.random.split(key)
    return dict(
        conv1_w=jax.random.normal(k1, (planes, in_planes, 3, 3), jnp.float32)
        * (2.0 / (in_planes * 9)) ** 0.5,
        conv2_w=jax.random.normal(k2, (planes, planes, 3, 3), jnp.float32)
        * (2.0 / (planes * 9)) ** 0.5,
        # AdaBin_Conv2d activation params (init: alpha=1 > 0, beta=0)
        alpha_a1=1.0, beta_a1=0.0,
        alpha_a2=1.0, beta_a2=0.0,
        # BatchNorm2d affine params (init: gamma=1, beta=0)
        bn1_gamma=jnp.ones((planes,), jnp.float32),
        bn1_beta=jnp.zeros((planes,), jnp.float32),
        bn2_gamma=jnp.ones((planes,), jnp.float32),
        bn2_beta=jnp.zeros((planes,), jnp.float32),
        # Maxout params (init: pos=1.0, neg=0.25)
        mx1_pos=jnp.ones((planes,), jnp.float32),
        mx1_neg=0.25 * jnp.ones((planes,), jnp.float32),
        mx2_pos=jnp.ones((planes,), jnp.float32),
        mx2_neg=0.25 * jnp.ones((planes,), jnp.float32),
    )


if __name__ == "__main__":
    key = jax.random.PRNGKey(0)
    kx, kp = jax.random.split(key)

    in_planes, planes, stride = 16, 32, 2     # exercises the option-'A' shortcut
    x = jax.random.normal(kx, (2, in_planes, 16, 16), jnp.float32)   # NCHW
    params = init_params(kp, in_planes, planes)

    fwd = jax.jit(functools.partial(basic_block_1w1a_forward,
                                    stride=stride, option='A'))
    out = jax.block_until_ready(fwd(x, params))

    assert out.shape == (2, planes, 8, 8), out.shape
    assert bool(jnp.all(jnp.isfinite(out)))
    print("KERNEL_OK")
</pallas_src>

<mosaic_0001>
module attributes {stable_mosaic.version = 11 : i64} {
  func.func @kernel(%arg0: i32, %arg1: memref<2x8x8x16xbf16, #tpu.memory_space<vmem>>, %arg2: memref<2x8x8x16xbf16, #tpu.memory_space<vmem>>, %arg3: memref<2x8x8x16xbf16, #tpu.memory_space<vmem>>, %arg4: memref<2x8x8x16xbf16, #tpu.memory_space<vmem>>, %arg5: memref<9x16x32xbf16, #tpu.memory_space<vmem>>, %arg6: memref<3xf32, #tpu.memory_space<smem>>, %arg7: memref<128x32xbf16, #tpu.memory_space<vmem>>, %arg8: memref<1x2x32xf32, #tpu.memory_space<vmem>>, %arg9: memref<2x9x9x16xf32, #tpu.memory_space<vmem>>, %arg10: memref<2x9x9x16xf32, #tpu.memory_space<vmem>>, %arg11: memref<2x9x9x16xf32, #tpu.memory_space<vmem>>, %arg12: memref<2x9x9x16xf32, #tpu.memory_space<vmem>>) attributes {dimension_semantics = [#tpu.dimension_semantics<parallel>], iteration_bounds = array<i64: 1>, scalar_prefetch = 0 : i64, scratch_operands = 4 : i64, tpu.core_type = #tpu.core_type<tc>, window_params = [{transform_indices = @transform_0, window_bounds = array<i64: 2, 8, 8, 16>}, {transform_indices = @transform_1, window_bounds = array<i64: 2, 8, 8, 16>}, {transform_indices = @transform_2, window_bounds = array<i64: 2, 8, 8, 16>}, {transform_indices = @transform_3, window_bounds = array<i64: 2, 8, 8, 16>}, {pipeline_mode = #tpu.pipeline_mode<synchronous>, transform_indices = @transform_4, window_bounds = array<i64: 9, 16, 32>}, {transform_indices = @transform_5, window_bounds = array<i64: 3>}, {transform_indices = @transform_6, window_bounds = array<i64: 128, 32>}, {transform_indices = @transform_7, window_bounds = array<i64: 1, 2, 32>}]} {
    %c0 = arith.constant 0 : index
    %0 = memref.load %arg6[%c0] : memref<3xf32, #tpu.memory_space<smem>>
    %c1 = arith.constant 1 : index
    %1 = memref.load %arg6[%c1] : memref<3xf32, #tpu.memory_space<smem>>
    %c2 = arith.constant 2 : index
    %2 = memref.load %arg6[%c2] : memref<3xf32, #tpu.memory_space<smem>>
    %cst = arith.constant 0.000000e+00 : f32
    %3 = vector.broadcast %cst : f32 to vector<2x1x9x16xf32>
    %c0_0 = arith.constant 0 : index
    %c0_1 = arith.constant 0 : index
    %c0_2 = arith.constant 0 : index
    %c0_3 = arith.constant 0 : index
    %4 = vector.load %arg9[%c0_0, %c0_1, %c0_2, %c0_3] : memref<2x9x9x16xf32, #tpu.memory_space<vmem>>, vector<2x1x9x16xf32>
    tpu.vector_store %arg9[%c0_0, %c0_1, %c0_2, %c0_3], %3 {strides = array<i32>} : memref<2x9x9x16xf32, #tpu.memory_space<vmem>>, vector<2x1x9x16xf32>,
    %cst_4 = arith.constant 0.000000e+00 : f32
    %5 = vector.broadcast %cst_4 : f32 to vector<2x9x1x16xf32>
    %c0_5 = arith.constant 0 : index
    %c0_6 = arith.constant 0 : index
    %c0_7 = arith.constant 0 : index
    %c0_8 = arith.constant 0 : index
    %6 = vector.load %arg9[%c0_5, %c0_6, %c0_7, %c0_8] : memref<2x9x9x16xf32, #tpu.memory_space<vmem>>, vector<2x9x1x16xf32>
    tpu.vector_store %arg9[%c0_5, %c0_6, %c0_7, %c0_8], %5 {strides = array<i32>} : memref<2x9x9x16xf32, #tpu.memory_space<vmem>>, vector<2x9x1x16xf32>,
    %c0_9 = arith.constant 0 : index
    %c0_10 = arith.constant 0 : index
    %c0_11 = arith.constant 0 : index
    %c0_12 = arith.constant 0 : index
    %7 = vector.load %arg1[%c0_9, %c0_10, %c0_11, %c0_12] : memref<2x8x8x16xbf16, #tpu.memory_space<vmem>>, vector<2x8x8x16xbf16>
    %8 = arith.extf %7 : vector<2x8x8x16xbf16> to vector<2x8x8x16xf32>
    %9 = vector.broadcast %0 : f32 to vector<2x8x8x16xf32>
    %10 = arith.cmpf ogt, %8, %9 : vector<2x8x8x16xf32>
    %11 = vector.broadcast %0 : f32 to vector<2x8x8x16xf32>
    %12 = arith.cmpf olt, %8, %11 : vector<2x8x8x16xf32>
    %13 = vector.broadcast %2 : f32 to vector<2x8x8x16xf32>
    %14 = vector.broadcast %0 : f32 to vector<2x8x8x16xf32>
    %15 = arith.select %12, %13, %14 : vector<2x8x8x16xi1>, vector<2x8x8x16xf32>
    %16 = vector.broadcast %1 : f32 to vector<2x8x8x16xf32>
    %17 = arith.select %10, %16, %15 : vector<2x8x8x16xi1>, vector<2x8x8x16xf32>
    %c0_13 = arith.constant 0 : index
    %c1_14 = arith.constant 1 : index
    %c1_15 = arith.constant 1 : index
    %c0_16 = arith.constant 0 : index
    %18 = vector.load %arg9[%c0_13, %c1_14, %c1_15, %c0_16] : memref<2x9x9x16xf32, #tpu.memory_space<vmem>>, vector<2x8x8x16xf32>
    tpu.vector_store %arg9[%c0_13, %c1_14, %c1_15, %c0_16], %17 {strides = array<i32>} : memref<2x9x9x16xf32, #tpu.memory_space<vmem>>, vector<2x8x8x16xf32>,
    %cst_17 = arith.constant 0.000000e+00 : f32
    %19 = vector.broadcast %cst_17 : f32 to vector<2x1x9x16xf32>
    %c0_18 = arith.constant 0 : index
    %c0_19 = arith.constant 0 : index
    %c0_20 = arith.constant 0 : index
    %c0_21 = arith.constant 0 : index
    %20 = vector.load %arg10[%c0_18, %c0_19, %c0_20, %c0_21] : memref<2x9x9x16xf32, #tpu.memory_space<vmem>>, vector<2x1x9x16xf32>
    tpu.vector_store %arg10[%c0_18, %c0_19, %c0_20, %c0_21], %19 {strides = array<i32>} : memref<2x9x9x16xf32, #tpu.memory_space<vmem>>, vector<2x1x9x16xf32>,
    %cst_22 = arith.constant 0.000000e+00 : f32
    %21 = vector.broadcast %cst_22 : f32 to vector<2x9x1x16xf32>
    %c0_23 = arith.constant 0 : index
    %c0_24 = arith.constant 0 : index
    %c8 = arith.constant 8 : index
    %c0_25 = arith.constant 0 : index
    %22 = vector.load %arg10[%c0_23, %c0_24, %c8, %c0_25] : memref<2x9x9x16xf32, #tpu.memory_space<vmem>>, vector<2x9x1x16xf32>
    tpu.vector_store %arg10[%c0_23, %c0_24, %c8, %c0_25], %21 {strides = array<i32>} : memref<2x9x9x16xf32, #tpu.memory_space<vmem>>, vector<2x9x1x16xf32>,
    %c0_26 = arith.constant 0 : index
    %c0_27 = arith.constant 0 : index
    %c0_28 = arith.constant 0 : index
    %c0_29 = arith.constant 0 : index
    %23 = vector.load %arg2[%c0_26, %c0_27, %c0_28, %c0_29] : memref<2x8x8x16xbf16, #tpu.memory_space<vmem>>, vector<2x8x8x16xbf16>
    %24 = arith.extf %23 : vector<2x8x8x16xbf16> to vector<2x8x8x16xf32>
    %25 = vector.broadcast %0 : f32 to vector<2x8x8x16xf32>
    %26 = arith.cmpf ogt, %24, %25 : vector<2x8x8x16xf32>
    %27 = vector.broadcast %0 : f32 to vector<2x8x8x16xf32>
    %28 = arith.cmpf olt, %24, %27 : vector<2x8x8x16xf32>
    %29 = vector.broadcast %2 : f32 to vector<2x8x8x16xf32>
    %30 = vector.broadcast %0 : f32 to vector<2x8x8x16xf32>
    %31 = arith.select %28, %29, %30 : vector<2x8x8x16xi1>, vector<2x8x8x16xf32>
    %32 = vector.broadcast %1 : f32 to vector<2x8x8x16xf32>
    %33 = arith.select %26, %32, %31 : vector<2x8x8x16xi1>, vector<2x8x8x16xf32>
    %c0_30 = arith.constant 0 : index
    %c1_31 = arith.constant 1 : index
    %c0_32 = arith.constant 0 : index
    %c0_33 = arith.constant 0 : index
    %34 = vector.load %arg10[%c0_30, %c1_31, %c0_32, %c0_33] : memref<2x9x9x16xf32, #tpu.memory_space<vmem>>, vector<2x8x8x16xf32>
    tpu.vector_store %arg10[%c0_30, %c1_31, %c0_32, %c0_33], %33 {strides = array<i32>} : memref<2x9x9x16xf32, #tpu.memory_space<vmem>>, vector<2x8x8x16xf32>,
    %cst_34 = arith.constant 0.000000e+00 : f32
    %35 = vector.broadcast %cst_34 : f32 to vector<2x1x9x16xf32>
    %c0_35 = arith.constant 0 : index
    %c8_36 = arith.constant 8 : index
    %c0_37 = arith.constant 0 : index
    %c0_38 = arith.constant 0 : index
    %36 = vector.load %arg11[%c0_35, %c8_36, %c0_37, %c0_38] : memref<2x9x9x16xf32, #tpu.memory_space<vmem>>, vector<2x1x9x16xf32>
    tpu.vector_store %arg11[%c0_35, %c8_36, %c0_37, %c0_38], %35 {strides = array<i32>} : memref<2x9x9x16xf32, #tpu.memory_space<vmem>>, vector<2x1x9x16xf32>,
    %cst_39 = arith.constant 0.000000e+00 : f32
    %37 = vector.broadcast %cst_39 : f32 to vector<2x9x1x16xf32>
    %c0_40 = arith.constant 0 : index
    %c0_41 = arith.constant 0 : index
    %c0_42 = arith.constant 0 : index
    %c0_43 = arith.constant 0 : index
    %38 = vector.load %arg11[%c0_40, %c0_41, %c0_42, %c0_43] : memref<2x9x9x16xf32, #tpu.memory_space<vmem>>, vector<2x9x1x16xf32>
    tpu.vector_store %arg11[%c0_40, %c0_41, %c0_42, %c0_43], %37 {strides = array<i32>} : memref<2x9x9x16xf32, #tpu.memory_space<vmem>>, vector<2x9x1x16xf32>,
    %c0_44 = arith.constant 0 : index
    %c0_45 = arith.constant 0 : index
    %c0_46 = arith.constant 0 : index
    %c0_47 = arith.constant 0 : index
    %39 = vector.load %arg3[%c0_44, %c0_45, %c0_46, %c0_47] : memref<2x8x8x16xbf16, #tpu.memory_space<vmem>>, vector<2x8x8x16xbf16>
    %40 = arith.extf %39 : vector<2x8x8x16xbf16> to vector<2x8x8x16xf32>
    %41 = vector.broadcast %0 : f32 to vector<2x8x8x16xf32>
    %42 = arith.cmpf ogt, %40, %41 : vector<2x8x8x16xf32>
    %43 = vector.broadcast %0 : f32 to vector<2x8x8x16xf32>
    %44 = arith.cmpf olt, %40, %43 : vector<2x8x8x16xf32>
    %45 = vector.broadcast %2 : f32 to vector<2x8x8x16xf32>
    %46 = vector.broadcast %0 : f32 to vector<2x8x8x16xf32>
    %47 = arith.select %44, %45, %46 : vector<2x8x8x16xi1>, vector<2x8x8x16xf32>
    %48 = vector.broadcast %1 : f32 to vector<2x8x8x16xf32>
    %49 = arith.select %42, %48, %47 : vector<2x8x8x16xi1>, vector<2x8x8x16xf32>
    %c0_48 = arith.constant 0 : index
    %c0_49 = arith.constant 0 : index
    %c1_50 = arith.constant 1 : index
    %c0_51 = arith.constant 0 : index
    %50 = vector.load %arg11[%c0_48, %c0_49, %c1_50, %c0_51] : memref<2x9x9x16xf32, #tpu.memory_space<vmem>>, vector<2x8x8x16xf32>
    tpu.vector_store %arg11[%c0_48, %c0_49, %c1_50, %c0_51], %49 {strides = array<i32>} : memref<2x9x9x16xf32, #tpu.memory_space<vmem>>, vector<2x8x8x16xf32>,
    %cst_52 = arith.constant 0.000000e+00 : f32
    %51 = vector.broadcast %cst_52 : f32 to vector<2x1x9x16xf32>
    %c0_53 = arith.constant 0 : index
    %c8_54 = arith.constant 8 : index
    %c0_55 = arith.constant 0 : index
    %c0_56 = arith.constant 0 : index
    %52 = vector.load %arg12[%c0_53, %c8_54, %c0_55, %c0_56] : memref<2x9x9x16xf32, #tpu.memory_space<vmem>>, vector<2x1x9x16xf32>
    tpu.vector_store %arg12[%c0_53, %c8_54, %c0_55, %c0_56], %51 {strides = array<i32>} : memref<2x9x9x16xf32, #tpu.memory_space<vmem>>, vector<2x1x9x16xf32>,
    %cst_57 = arith.constant 0.000000e+00 : f32
    %53 = vector.broadcast %cst_57 : f32 to vector<2x9x1x16xf32>
    %c0_58 = arith.constant 0 : index
    %c0_59 = arith.constant 0 : index
    %c8_60 = arith.constant 8 : index
    %c0_61 = arith.constant 0 : index
    %54 = vector.load %arg12[%c0_58, %c0_59, %c8_60, %c0_61] : memref<2x9x9x16xf32, #tpu.memory_space<vmem>>, vector<2x9x1x16xf32>
    tpu.vector_store %arg12[%c0_58, %c0_59, %c8_60, %c0_61], %53 {strides = array<i32>} : memref<2x9x9x16xf32, #tpu.memory_space<vmem>>, vector<2x9x1x16xf32>,
    %c0_62 = arith.constant 0 : index
    %c0_63 = arith.constant 0 : index
    %c0_64 = arith.constant 0 : index
    %c0_65 = arith.constant 0 : index
    %55 = vector.load %arg4[%c0_62, %c0_63, %c0_64, %c0_65] : memref<2x8x8x16xbf16, #tpu.memory_space<vmem>>, vector<2x8x8x16xbf16>
    %56 = arith.extf %55 : vector<2x8x8x16xbf16> to vector<2x8x8x16xf32>
    %57 = vector.broadcast %0 : f32 to vector<2x8x8x16xf32>
    %58 = arith.cmpf ogt, %56, %57 : vector<2x8x8x16xf32>
    %59 = vector.broadcast %0 : f32 to vector<2x8x8x16xf32>
    %60 = arith.cmpf olt, %56, %59 : vector<2x8x8x16xf32>
    %61 = vector.broadcast %2 : f32 to vector<2x8x8x16xf32>
    %62 = vector.broadcast %0 : f32 to vector<2x8x8x16xf32>
    %63 = arith.select %60, %61, %62 : vector<2x8x8x16xi1>, vector<2x8x8x16xf32>
    %64 = vector.broadcast %1 : f32 to vector<2x8x8x16xf32>
    %65 = arith.select %58, %64, %63 : vector<2x8x8x16xi1>, vector<2x8x8x16xf32>
    %c0_66 = arith.constant 0 : index
    %c0_67 = arith.constant 0 : index
    %c0_68 = arith.constant 0 : index
    %c0_69 = arith.constant 0 : index
    %66 = vector.load %arg12[%c0_66, %c0_67, %c0_68, %c0_69] : memref<2x9x9x16xf32, #tpu.memory_space<vmem>>, vector<2x8x8x16xf32>
    tpu.vector_store %arg12[%c0_66, %c0_67, %c0_68, %c0_69], %65 {strides = array<i32>} : memref<2x9x9x16xf32, #tpu.memory_space<vmem>>, vector<2x8x8x16xf32>,
    %cst_70 = arith.constant 0.000000e+00 : f32
    %67 = vector.broadcast %cst_70 : f32 to vector<128x32xf32>
    %c0_71 = arith.constant 0 : index
    %c0_72 = arith.constant 0 : index
    %c0_73 = arith.constant 0 : index
    %c0_74 = arith.constant 0 : index
    %68 = vector.load %arg9[%c0_71, %c0_72, %c0_73, %c0_74] : memref<2x9x9x16xf32, #tpu.memory_space<vmem>>, vector<2x8x8x16xf32>
    %69 = arith.truncf %68 : vector<2x8x8x16xf32> to vector<2x8x8x16xbf16>
    %70 = vector.shape_cast %69 : vector<2x8x8x16xbf16> to vector<128x16xbf16>
    %c0_75 = arith.constant 0 : index
    %c0_76 = arith.constant 0 : index
    %c0_77 = arith.constant 0 : index
    %71 = vector.load %arg5[%c0_75, %c0_76, %c0_77] : memref<9x16x32xbf16, #tpu.memory_space<vmem>>, vector<1x16x32xbf16>
    %72 = vector.shape_cast %71 : vector<1x16x32xbf16> to vector<16x32xbf16>
    %cst_78 = arith.constant dense<0.000000e+00> : vector<128x32xf32>
    %73 = tpu.matmul %70, %72, %cst_78 {dimension_numbers = #tpu.dot_dimension_numbers<[1], [0], [0], [1], [0, 0, 1, 1], [], []>} : vector<128x16xbf16>, vector<16x32xbf16>, vector<128x32xf32> -> vector<128x32xf32>
    %74 = arith.addf %67, %73 : vector<128x32xf32>
    %c0_79 = arith.constant 0 : index
    %c0_80 = arith.constant 0 : index
    %c0_81 = arith.constant 0 : index
    %c0_82 = arith.constant 0 : index
    %75 = vector.load %arg10[%c0_79, %c0_80, %c0_81, %c0_82] : memref<2x9x9x16xf32, #tpu.memory_space<vmem>>, vector<2x8x8x16xf32>
    %76 = arith.truncf %75 : vector<2x8x8x16xf32> to vector<2x8x8x16xbf16>
    %77 = vector.shape_cast %76 : vector<2x8x8x16xbf16> to vector<128x16xbf16>
    %c1_83 = arith.constant 1 : index
    %c0_84 = arith.constant 0 : index
    %c0_85 = arith.constant 0 : index
    %78 = vector.load %arg5[%c1_83, %c0_84, %c0_85] : memref<9x16x32xbf16, #tpu.memory_space<vmem>>, vector<1x16x32xbf16>
    %79 = vector.shape_cast %78 : vector<1x16x32xbf16> to vector<16x32xbf16>
    %cst_86 = arith.constant dense<0.000000e+00> : vector<128x32xf32>
    %80 = tpu.matmul %77, %79, %cst_86 {dimension_numbers = #tpu.dot_dimension_numbers<[1], [0], [0], [1], [0, 0, 1, 1], [], []>} : vector<128x16xbf16>, vector<16x32xbf16>, vector<128x32xf32> -> vector<128x32xf32>
    %81 = arith.addf %74, %80 : vector<128x32xf32>
    %c0_87 = arith.constant 0 : index
    %c0_88 = arith.constant 0 : index
    %c1_89 = arith.constant 1 : index
    %c0_90 = arith.constant 0 : index
    %82 = vector.load %arg9[%c0_87, %c0_88, %c1_89, %c0_90] : memref<2x9x9x16xf32, #tpu.memory_space<vmem>>, vector<2x8x8x16xf32>
    %83 = arith.truncf %82 : vector<2x8x8x16xf32> to vector<2x8x8x16xbf16>
    %84 = vector.shape_cast %83 : vector<2x8x8x16xbf16> to vector<128x16xbf16>
    %c2_91 = arith.constant 2 : index
    %c0_92 = arith.constant 0 : index
    %c0_93 = arith.constant 0 : index
    %85 = vector.load %arg5[%c2_91, %c0_92, %c0_93] : memref<9x16x32xbf16, #tpu.memory_space<vmem>>, vector<1x16x32xbf16>
    %86 = vector.shape_cast %85 : vector<1x16x32xbf16> to vector<16x32xbf16>
    %cst_94 = arith.constant dense<0.000000e+00> : vector<128x32xf32>
    %87 = tpu.matmul %84, %86, %cst_94 {dimension_numbers = #tpu.dot_dimension_numbers<[1], [0], [0], [1], [0, 0, 1, 1], [], []>} : vector<128x16xbf16>, vector<16x32xbf16>, vector<128x32xf32> -> vector<128x32xf32>
    %88 = arith.addf %81, %87 : vector<128x32xf32>
    %c0_95 = arith.constant 0 : index
    %c0_96 = arith.constant 0 : index
    %c0_97 = arith.constant 0 : index
    %c0_98 = arith.constant 0 : index
    %89 = vector.load %arg11[%c0_95, %c0_96, %c0_97, %c0_98] : memref<2x9x9x16xf32, #tpu.memory_space<vmem>>, vector<2x8x8x16xf32>
    %90 = arith.truncf %89 : vector<2x8x8x16xf32> to vector<2x8x8x16xbf16>
    %91 = vector.shape_cast %90 : vector<2x8x8x16xbf16> to vector<128x16xbf16>
    %c3 = arith.constant 3 : index
    %c0_99 = arith.constant 0 : index
    %c0_100 = arith.constant 0 : index
    %92 = vector.load %arg5[%c3, %c0_99, %c0_100] : memref<9x16x32xbf16, #tpu.memory_space<vmem>>, vector<1x16x32xbf16>
    %93 = vector.shape_cast %92 : vector<1x16x32xbf16> to vector<16x32xbf16>
    %cst_101 = arith.constant dense<0.000000e+00> : vector<128x32xf32>
    %94 = tpu.matmul %91, %93, %cst_101 {dimension_numbers = #tpu.dot_dimension_numbers<[1], [0], [0], [1], [0, 0, 1, 1], [], []>} : vector<128x16xbf16>, vector<16x32xbf16>, vector<128x32xf32> -> vector<128x32xf32>
    %95 = arith.addf %88, %94 : vector<128x32xf32>
    %c0_102 = arith.constant 0 : index
    %c0_103 = arith.constant 0 : index
    %c0_104 = arith.constant 0 : index
    %c0_105 = arith.constant 0 : index
    %96 = vector.load %arg12[%c0_102, %c0_103, %c0_104, %c0_105] : memref<2x9x9x16xf32, #tpu.memory_space<vmem>>, vector<2x8x8x16xf32>
    %97 = arith.truncf %96 : vector<2x8x8x16xf32> to vector<2x8x8x16xbf16>
    %98 = vector.shape_cast %97 : vector<2x8x8x16xbf16> to vector<128x16xbf16>
    %c4 = arith.constant 4 : index
    %c0_106 = arith.constant 0 : index
    %c0_107 = arith.constant 0 : index
    %99 = vector.load %arg5[%c4, %c0_106, %c0_107] : memref<9x16x32xbf16, #tpu.memory_space<vmem>>, vector<1x16x32xbf16>
    %100 = vector.shape_cast %99 : vector<1x16x32xbf16> to vector<16x32xbf16>
    %cst_108 = arith.constant dense<0.000000e+00> : vector<128x32xf32>
    %101 = tpu.matmul %98, %100, %cst_108 {dimension_numbers = #tpu.dot_dimension_numbers<[1], [0], [0], [1], [0, 0, 1, 1], [], []>} : vector<128x16xbf16>, vector<16x32xbf16>, vector<128x32xf32> -> vector<128x32xf32>
    %102 = arith.addf %95, %101 : vector<128x32xf32>
    %c0_109 = arith.constant 0 : index
    %c0_110 = arith.constant 0 : index
    %c1_111 = arith.constant 1 : index
    %c0_112 = arith.constant 0 : index
    %103 = vector.load %arg11[%c0_109, %c0_110, %c1_111, %c0_112] : memref<2x9x9x16xf32, #tpu.memory_space<vmem>>, vector<2x8x8x16xf32>
    %104 = arith.truncf %103 : vector<2x8x8x16xf32> to vector<2x8x8x16xbf16>
    %105 = vector.shape_cast %104 : vector<2x8x8x16xbf16> to vector<128x16xbf16>
    %c5 = arith.constant 5 : index
    %c0_113 = arith.constant 0 : index
    %c0_114 = arith.constant 0 : index
    %106 = vector.load %arg5[%c5, %c0_113, %c0_114] : memref<9x16x32xbf16, #tpu.memory_space<vmem>>, vector<1x16x32xbf16>
    %107 = vector.shape_cast %106 : vector<1x16x32xbf16> to vector<16x32xbf16>
    %cst_115 = arith.constant dense<0.000000e+00> : vector<128x32xf32>
    %108 = tpu.matmul %105, %107, %cst_115 {dimension_numbers = #tpu.dot_dimension_numbers<[1], [0], [0], [1], [0, 0, 1, 1], [], []>} : vector<128x16xbf16>, vector<16x32xbf16>, vector<128x32xf32> -> vector<128x32xf32>
    %109 = arith.addf %102, %108 : vector<128x32xf32>
    %c0_116 = arith.constant 0 : index
    %c1_117 = arith.constant 1 : index
    %c0_118 = arith.constant 0 : index
    %c0_119 = arith.constant 0 : index
    %110 = vector.load %arg9[%c0_116, %c1_117, %c0_118, %c0_119] : memref<2x9x9x16xf32, #tpu.memory_space<vmem>>, vector<2x8x8x16xf32>
    %111 = arith.truncf %110 : vector<2x8x8x16xf32> to vector<2x8x8x16xbf16>
    %112 = vector.shape_cast %111 : vector<2x8x8x16xbf16> to vector<128x16xbf16>
    %c6 = arith.constant 6 : index
    %c0_120 = arith.constant 0 : index
    %c0_121 = arith.constant 0 : index
    %113 = vector.load %arg5[%c6, %c0_120, %c0_121] : memref<9x16x32xbf16, #tpu.memory_space<vmem>>, vector<1x16x32xbf16>
    %114 = vector.shape_cast %113 : vector<1x16x32xbf16> to vector<16x32xbf16>
    %cst_122 = arith.constant dense<0.000000e+00> : vector<128x32xf32>
    %115 = tpu.matmul %112, %114, %cst_122 {dimension_numbers = #tpu.dot_dimension_numbers<[1], [0], [0], [1], [0, 0, 1, 1], [], []>} : vector<128x16xbf16>, vector<16x32xbf16>, vector<128x32xf32> -> vector<128x32xf32>
    %116 = arith.addf %109, %115 : vector<128x32xf32>
    %c0_123 = arith.constant 0 : index
    %c1_124 = arith.constant 1 : index
    %c0_125 = arith.constant 0 : index
    %c0_126 = arith.constant 0 : index
    %117 = vector.load %arg10[%c0_123, %c1_124, %c0_125, %c0_126] : memref<2x9x9x16xf32, #tpu.memory_space<vmem>>, vector<2x8x8x16xf32>
    %118 = arith.truncf %117 : vector<2x8x8x16xf32> to vector<2x8x8x16xbf16>
    %119 = vector.shape_cast %118 : vector<2x8x8x16xbf16> to vector<128x16xbf16>
    %c7 = arith.constant 7 : index
    %c0_127 = arith.constant 0 : index
    %c0_128 = arith.constant 0 : index
    %120 = vector.load %arg5[%c7, %c0_127, %c0_128] : memref<9x16x32xbf16, #tpu.memory_space<vmem>>, vector<1x16x32xbf16>
    %121 = vector.shape_cast %120 : vector<1x16x32xbf16> to vector<16x32xbf16>
    %cst_129 = arith.constant dense<0.000000e+00> : vector<128x32xf32>
    %122 = tpu.matmul %119, %121, %cst_129 {dimension_numbers = #tpu.dot_dimension_numbers<[1], [0], [0], [1], [0, 0, 1, 1], [], []>} : vector<128x16xbf16>, vector<16x32xbf16>, vector<128x32xf32> -> vector<128x32xf32>
    %123 = arith.addf %116, %122 : vector<128x32xf32>
    %c0_130 = arith.constant 0 : index
    %c1_131 = arith.constant 1 : index
    %c1_132 = arith.constant 1 : index
    %c0_133 = arith.constant 0 : index
    %124 = vector.load %arg9[%c0_130, %c1_131, %c1_132, %c0_133] : memref<2x9x9x16xf32, #tpu.memory_space<vmem>>, vector<2x8x8x16xf32>
    %125 = arith.truncf %124 : vector<2x8x8x16xf32> to vector<2x8x8x16xbf16>
    %126 = vector.shape_cast %125 : vector<2x8x8x16xbf16> to vector<128x16xbf16>
    %c8_134 = arith.constant 8 : index
    %c0_135 = arith.constant 0 : index
    %c0_136 = arith.constant 0 : index
    %127 = vector.load %arg5[%c8_134, %c0_135, %c0_136] : memref<9x16x32xbf16, #tpu.memory_space<vmem>>, vector<1x16x32xbf16>
    %128 = vector.shape_cast %127 : vector<1x16x32xbf16> to vector<16x32xbf16>
    %cst_137 = arith.constant dense<0.000000e+00> : vector<128x32xf32>
    %129 = tpu.matmul %126, %128, %cst_137 {dimension_numbers = #tpu.dot_dimension_numbers<[1], [0], [0], [1], [0, 0, 1, 1], [], []>} : vector<128x16xbf16>, vector<16x32xbf16>, vector<128x32xf32> -> vector<128x32xf32>
    %130 = arith.addf %123, %129 : vector<128x32xf32>
    %131 = arith.truncf %130 : vector<128x32xf32> to vector<128x32xbf16>
    %c0_138 = arith.constant 0 : index
    %c0_139 = arith.constant 0 : index
    %132 = vector.load %arg7[%c0_138, %c0_139] : memref<128x32xbf16, #tpu.memory_space<vmem>>, vector<128x32xbf16>
    tpu.vector_store %arg7[%c0_138, %c0_139], %131 {strides = array<i32>} : memref<128x32xbf16, #tpu.memory_space<vmem>>, vector<128x32xbf16>,
    %cst_140 = arith.constant dense<0.000000e+00> : vector<32xf32>
    %133 = vector.multi_reduction <add>, %130, %cst_140 [0] : vector<128x32xf32> to vector<32xf32>
    %134 = vector.shape_cast %133 : vector<32xf32> to vector<1x32xf32>
    %c0_141 = arith.constant 0 : index
    %c0_142 = arith.constant 0 : index
    %c0_143 = arith.constant 0 : index
    %135 = vector.load %arg8[%c0_141, %c0_142, %c0_143] : memref<1x2x32xf32, #tpu.memory_space<vmem>>, vector<1x1x32xf32>
    %136 = vector.shape_cast %135 : vector<1x1x32xf32> to vector<1x32xf32>
    %137 = vector.shape_cast %134 : vector<1x32xf32> to vector<1x1x32xf32>
    tpu.vector_store %arg8[%c0_141, %c0_142, %c0_143], %137 {strides = array<i32>} : memref<1x2x32xf32, #tpu.memory_space<vmem>>, vector<1x1x32xf32>,
    %138 = arith.mulf %130, %130 : vector<128x32xf32>
    %cst_144 = arith.constant dense<0.000000e+00> : vector<32xf32>
    %139 = vector.multi_reduction <add>, %138, %cst_144 [0] : vector<128x32xf32> to vector<32xf32>
    %140 = vector.shape_cast %139 : vector<32xf32> to vector<1x32xf32>
    %c0_145 = arith.constant 0 : index
    %c1_146 = arith.constant 1 : index
    %c0_147 = arith.constant 0 : index
    %141 = vector.load %arg8[%c0_145, %c1_146, %c0_147] : memref<1x2x32xf32, #tpu.memory_space<vmem>>, vector<1x1x32xf32>
    %142 = vector.shape_cast %141 : vector<1x1x32xf32> to vector<1x32xf32>
    %143 = vector.shape_cast %140 : vector<1x32xf32> to vector<1x1x32xf32>
    tpu.vector_store %arg8[%c0_145, %c1_146, %c0_147], %143 {strides = array<i32>} : memref<1x2x32xf32, #tpu.memory_space<vmem>>, vector<1x1x32xf32>,
    return
  }
  func.func @transform_0(%arg0: i32) -> (i32, i32, i32, i32) {
    %c0_i32 = arith.constant 0 : i32
    %c0_i32_0 = arith.constant 0 : i32
    %c0_i32_1 = arith.constant 0 : i32
    %c0_i32_2 = arith.constant 0 : i32
    return %arg0, %c0_i32, %c0_i32_0, %c0_i32_1 : i32, i32, i32, i32
  }
  func.func @transform_1(%arg0: i32) -> (i32, i32, i32, i32) {
    %c0_i32 = arith.constant 0 : i32
    %c0_i32_0 = arith.constant 0 : i32
    %c0_i32_1 = arith.constant 0 : i32
    %c0_i32_2 = arith.constant 0 : i32
    return %arg0, %c0_i32, %c0_i32_0, %c0_i32_1 : i32, i32, i32, i32
  }
  func.func @transform_2(%arg0: i32) -> (i32, i32, i32, i32) {
    %c0_i32 = arith.constant 0 : i32
    %c0_i32_0 = arith.constant 0 : i32
    %c0_i32_1 = arith.constant 0 : i32
    %c0_i32_2 = arith.constant 0 : i32
    return %arg0, %c0_i32, %c0_i32_0, %c0_i32_1 : i32, i32, i32, i32
  }
  func.func @transform_3(%arg0: i32) -> (i32, i32, i32, i32) {
    %c0_i32 = arith.constant 0 : i32
    %c0_i32_0 = arith.constant 0 : i32
    %c0_i32_1 = arith.constant 0 : i32
    %c0_i32_2 = arith.constant 0 : i32
    return %arg0, %c0_i32, %c0_i32_0, %c0_i32_1 : i32, i32, i32, i32
  }
  func.func @transform_4(%arg0: i32) -> (i32, i32, i32) {
    %c0_i32 = arith.constant 0 : i32
    %c0_i32_0 = arith.constant 0 : i32
    %c0_i32_1 = arith.constant 0 : i32
    %c0_i32_2 = arith.constant 0 : i32
    return %c0_i32, %c0_i32_0, %c0_i32_1 : i32, i32, i32
  }
  func.func @transform_5(%arg0: i32) -> i32 {
    %c0_i32 = arith.constant 0 : i32
    %c0_i32_0 = arith.constant 0 : i32
    return %c0_i32 : i32
  }
  func.func @transform_6(%arg0: i32) -> (i32, i32) {
    %c0_i32 = arith.constant 0 : i32
    %c0_i32_0 = arith.constant 0 : i32
    return %arg0, %c0_i32 : i32, i32
  }
  func.func @transform_7(%arg0: i32) -> (i32, i32, i32) {
    %c0_i32 = arith.constant 0 : i32
    %c0_i32_0 = arith.constant 0 : i32
    %c0_i32_1 = arith.constant 0 : i32
    return %arg0, %c0_i32, %c0_i32_0 : i32, i32, i32
  }
}

module attributes {stable_mosaic.version = 11 : i64} {
  func.func @_epilogue_kernel(%arg0: i32, %arg1: memref<16x256xbf16, #tpu.memory_space<vmem>>, %arg2: memref<16x256xbf16, #tpu.memory_space<vmem>>, %arg3: memref<4x256xf32, #tpu.memory_space<vmem>>, %arg4: memref<16x256xbf16, #tpu.memory_space<vmem>>) attributes {dimension_semantics = [#tpu.dimension_semantics<parallel>], iteration_bounds = array<i64: 1>, scalar_prefetch = 0 : i64, scratch_operands = 0 : i64, tpu.core_type = #tpu.core_type<tc>, window_params = [{transform_indices = @transform_0, window_bounds = array<i64: 16, 256>}, {transform_indices = @transform_1, window_bounds = array<i64: 16, 256>}, {pipeline_mode = #tpu.pipeline_mode<synchronous>, transform_indices = @transform_2, window_bounds = array<i64: 4, 256>}, {transform_indices = @transform_3, window_bounds = array<i64: 16, 256>}]} {
    %c0 = arith.constant 0 : index
    %c0_0 = arith.constant 0 : index
    %0 = vector.load %arg1[%c0, %c0_0] : memref<16x256xbf16, #tpu.memory_space<vmem>>, vector<16x256xbf16>
    %1 = arith.extf %0 : vector<16x256xbf16> to vector<16x256xf32>
    %c0_1 = arith.constant 0 : index
    %c0_2 = arith.constant 0 : index
    %2 = vector.load %arg3[%c0_1, %c0_2] : memref<4x256xf32, #tpu.memory_space<vmem>>, vector<1x256xf32>
    %3 = vector.broadcast %2 : vector<1x256xf32> to vector<16x256xf32>
    %4 = arith.mulf %1, %3 : vector<16x256xf32>
    %c1 = arith.constant 1 : index
    %c0_3 = arith.constant 0 : index
    %5 = vector.load %arg3[%c1, %c0_3] : memref<4x256xf32, #tpu.memory_space<vmem>>, vector<1x256xf32>
    %6 = vector.broadcast %5 : vector<1x256xf32> to vector<16x256xf32>
    %7 = arith.addf %4, %6 : vector<16x256xf32>
    %c0_4 = arith.constant 0 : index
    %c0_5 = arith.constant 0 : index
    %8 = vector.load %arg2[%c0_4, %c0_5] : memref<16x256xbf16, #tpu.memory_space<vmem>>, vector<16x256xbf16>
    %9 = arith.extf %8 : vector<16x256xbf16> to vector<16x256xf32>
    %10 = arith.addf %7, %9 : vector<16x256xf32>
    %c2 = arith.constant 2 : index
    %c0_6 = arith.constant 0 : index
    %11 = vector.load %arg3[%c2, %c0_6] : memref<4x256xf32, #tpu.memory_space<vmem>>, vector<1x256xf32>
    %cst = arith.constant 0.000000e+00 : f32
    %12 = vector.broadcast %cst : f32 to vector<16x256xf32>
    %13 = arith.maximumf %10, %12 : vector<16x256xf32>
    %14 = vector.broadcast %11 : vector<1x256xf32> to vector<16x256xf32>
    %15 = arith.mulf %14, %13 : vector<16x256xf32>
    %c3 = arith.constant 3 : index
    %c0_7 = arith.constant 0 : index
    %16 = vector.load %arg3[%c3, %c0_7] : memref<4x256xf32, #tpu.memory_space<vmem>>, vector<1x256xf32>
    %cst_8 = arith.constant 0.000000e+00 : f32
    %17 = vector.broadcast %cst_8 : f32 to vector<16x256xf32>
    %18 = arith.subf %17, %10 : vector<16x256xf32>
    %cst_9 = arith.constant 0.000000e+00 : f32
    %19 = vector.broadcast %cst_9 : f32 to vector<16x256xf32>
    %20 = arith.maximumf %18, %19 : vector<16x256xf32>
    %21 = vector.broadcast %16 : vector<1x256xf32> to vector<16x256xf32>
    %22 = arith.mulf %21, %20 : vector<16x256xf32>
    %23 = arith.subf %15, %22 : vector<16x256xf32>
    %24 = arith.truncf %23 : vector<16x256xf32> to vector<16x256xbf16>
    %c0_10 = arith.constant 0 : index
    %c0_11 = arith.constant 0 : index
    %25 = vector.load %arg4[%c0_10, %c0_11] : memref<16x256xbf16, #tpu.memory_space<vmem>>, vector<16x256xbf16>
    tpu.vector_store %arg4[%c0_10, %c0_11], %24 {strides = array<i32>} : memref<16x256xbf16, #tpu.memory_space<vmem>>, vector<16x256xbf16>,
    return
  }
  func.func @transform_0(%arg0: i32) -> (i32, i32) {
    %c0_i32 = arith.constant 0 : i32
    %c0_i32_0 = arith.constant 0 : i32
    return %arg0, %c0_i32 : i32, i32
  }
  func.func @transform_1(%arg0: i32) -> (i32, i32) {
    %c0_i32 = arith.constant 0 : i32
    %c0_i32_0 = arith.constant 0 : i32
    return %arg0, %c0_i32 : i32, i32
  }
  func.func @transform_2(%arg0: i32) -> (i32, i32) {
    %c0_i32 = arith.constant 0 : i32
    %c0_i32_0 = arith.constant 0 : i32
    %c0_i32_1 = arith.constant 0 : i32
    return %c0_i32, %c0_i32_0 : i32, i32
  }
  func.func @transform_3(%arg0: i32) -> (i32, i32) {
    %c0_i32 = arith.constant 0 : i32
    %c0_i32_0 = arith.constant 0 : i32
    return %arg0, %c0_i32 : i32, i32
  }
}

module attributes {stable_mosaic.version = 11 : i64} {
  func.func @_epilogue_kernel(%arg0: i32, %arg1: memref<16x256xbf16, #tpu.memory_space<vmem>>, %arg2: memref<16x256xbf16, #tpu.memory_space<vmem>>, %arg3: memref<4x256xf32, #tpu.memory_space<vmem>>, %arg4: memref<16x256xf32, #tpu.memory_space<vmem>>) attributes {dimension_semantics = [#tpu.dimension_semantics<parallel>], iteration_bounds = array<i64: 1>, scalar_prefetch = 0 : i64, scratch_operands = 0 : i64, tpu.core_type = #tpu.core_type<tc>, window_params = [{transform_indices = @transform_0, window_bounds = array<i64: 16, 256>}, {transform_indices = @transform_1, window_bounds = array<i64: 16, 256>}, {pipeline_mode = #tpu.pipeline_mode<synchronous>, transform_indices = @transform_2, window_bounds = array<i64: 4, 256>}, {transform_indices = @transform_3, window_bounds = array<i64: 16, 256>}]} {
    %c0 = arith.constant 0 : index
    %c0_0 = arith.constant 0 : index
    %0 = vector.load %arg1[%c0, %c0_0] : memref<16x256xbf16, #tpu.memory_space<vmem>>, vector<16x256xbf16>
    %1 = arith.extf %0 : vector<16x256xbf16> to vector<16x256xf32>
    %c0_1 = arith.constant 0 : index
    %c0_2 = arith.constant 0 : index
    %2 = vector.load %arg3[%c0_1, %c0_2] : memref<4x256xf32, #tpu.memory_space<vmem>>, vector<1x256xf32>
    %3 = vector.broadcast %2 : vector<1x256xf32> to vector<16x256xf32>
    %4 = arith.mulf %1, %3 : vector<16x256xf32>
    %c1 = arith.constant 1 : index
    %c0_3 = arith.constant 0 : index
    %5 = vector.load %arg3[%c1, %c0_3] : memref<4x256xf32, #tpu.memory_space<vmem>>, vector<1x256xf32>
    %6 = vector.broadcast %5 : vector<1x256xf32> to vector<16x256xf32>
    %7 = arith.addf %4, %6 : vector<16x256xf32>
    %c0_4 = arith.constant 0 : index
    %c0_5 = arith.constant 0 : index
    %8 = vector.load %arg2[%c0_4, %c0_5] : memref<16x256xbf16, #tpu.memory_space<vmem>>, vector<16x256xbf16>
    %9 = arith.extf %8 : vector<16x256xbf16> to vector<16x256xf32>
    %10 = arith.addf %7, %9 : vector<16x256xf32>
    %c2 = arith.constant 2 : index
    %c0_6 = arith.constant 0 : index
    %11 = vector.load %arg3[%c2, %c0_6] : memref<4x256xf32, #tpu.memory_space<vmem>>, vector<1x256xf32>
    %cst = arith.constant 0.000000e+00 : f32
    %12 = vector.broadcast %cst : f32 to vector<16x256xf32>
    %13 = arith.maximumf %10, %12 : vector<16x256xf32>
    %14 = vector.broadcast %11 : vector<1x256xf32> to vector<16x256xf32>
    %15 = arith.mulf %14, %13 : vector<16x256xf32>
    %c3 = arith.constant 3 : index
    %c0_7 = arith.constant 0 : index
    %16 = vector.load %arg3[%c3, %c0_7] : memref<4x256xf32, #tpu.memory_space<vmem>>, vector<1x256xf32>
    %cst_8 = arith.constant 0.000000e+00 : f32
    %17 = vector.broadcast %cst_8 : f32 to vector<16x256xf32>
    %18 = arith.subf %17, %10 : vector<16x256xf32>
    %cst_9 = arith.constant 0.000000e+00 : f32
    %19 = vector.broadcast %cst_9 : f32 to vector<16x256xf32>
    %20 = arith.maximumf %18, %19 : vector<16x256xf32>
    %21 = vector.broadcast %16 : vector<1x256xf32> to vector<16x256xf32>
    %22 = arith.mulf %21, %20 : vector<16x256xf32>
    %23 = arith.subf %15, %22 : vector<16x256xf32>
    %c0_10 = arith.constant 0 : index
    %c0_11 = arith.constant 0 : index
    %24 = vector.load %arg4[%c0_10, %c0_11] : memref<16x256xf32, #tpu.memory_space<vmem>>, vector<16x256xf32>
    tpu.vector_store %arg4[%c0_10, %c0_11], %23 {strides = array<i32>} : memref<16x256xf32, #tpu.memory_space<vmem>>, vector<16x256xf32>,
    return
  }
  func.func @transform_0(%arg0: i32) -> (i32, i32) {
    %c0_i32 = arith.constant 0 : i32
    %c0_i32_0 = arith.constant 0 : i32
    return %arg0, %c0_i32 : i32, i32
  }
  func.func @transform_1(%arg0: i32) -> (i32, i32) {
    %c0_i32 = arith.constant 0 : i32
    %c0_i32_0 = arith.constant 0 : i32
    return %arg0, %c0_i32 : i32, i32
  }
  func.func @transform_2(%arg0: i32) -> (i32, i32) {
    %c0_i32 = arith.constant 0 : i32
    %c0_i32_0 = arith.constant 0 : i32
    %c0_i32_1 = arith.constant 0 : i32
    return %c0_i32, %c0_i32_0 : i32, i32
  }
  func.func @transform_3(%arg0: i32) -> (i32, i32) {
    %c0_i32 = arith.constant 0 : i32
    %c0_i32_0 = arith.constant 0 : i32
    return %arg0, %c0_i32 : i32, i32
  }
}

module attributes {stable_mosaic.version = 11 : i64} {
  func.func @kernel(%arg0: i32, %arg1: memref<2x8x8x32xbf16, #tpu.memory_space<vmem>>, %arg2: memref<9x32x32xbf16, #tpu.memory_space<vmem>>, %arg3: memref<3xf32, #tpu.memory_space<smem>>, %arg4: memref<128x32xbf16, #tpu.memory_space<vmem>>, %arg5: memref<1x2x32xf32, #tpu.memory_space<vmem>>, %arg6: memref<2x10x10x32xf32, #tpu.memory_space<vmem>>) attributes {dimension_semantics = [#tpu.dimension_semantics<parallel>], iteration_bounds = array<i64: 1>, scalar_prefetch = 0 : i64, scratch_operands = 1 : i64, tpu.core_type = #tpu.core_type<tc>, window_params = [{transform_indices = @transform_0, window_bounds = array<i64: 2, 8, 8, 32>}, {pipeline_mode = #tpu.pipeline_mode<synchronous>, transform_indices = @transform_1, window_bounds = array<i64: 9, 32, 32>}, {transform_indices = @transform_2, window_bounds = array<i64: 3>}, {transform_indices = @transform_3, window_bounds = array<i64: 128, 32>}, {transform_indices = @transform_4, window_bounds = array<i64: 1, 2, 32>}]} {
    %c0 = arith.constant 0 : index
    %0 = memref.load %arg3[%c0] : memref<3xf32, #tpu.memory_space<smem>>
    %c1 = arith.constant 1 : index
    %1 = memref.load %arg3[%c1] : memref<3xf32, #tpu.memory_space<smem>>
    %c2 = arith.constant 2 : index
    %2 = memref.load %arg3[%c2] : memref<3xf32, #tpu.memory_space<smem>>
    %cst = arith.constant 0.000000e+00 : f32
    %3 = vector.broadcast %cst : f32 to vector<2x1x10x32xf32>
    %cst_0 = arith.constant 0.000000e+00 : f32
    %4 = vector.broadcast %cst_0 : f32 to vector<2x10x1x32xf32>
    %c0_1 = arith.constant 0 : index
    %c0_2 = arith.constant 0 : index
    %c0_3 = arith.constant 0 : index
    %c0_4 = arith.constant 0 : index
    %5 = vector.load %arg6[%c0_1, %c0_2, %c0_3, %c0_4] : memref<2x10x10x32xf32, #tpu.memory_space<vmem>>, vector<2x1x10x32xf32>
    tpu.vector_store %arg6[%c0_1, %c0_2, %c0_3, %c0_4], %3 {strides = array<i32>} : memref<2x10x10x32xf32, #tpu.memory_space<vmem>>, vector<2x1x10x32xf32>,
    %c0_5 = arith.constant 0 : index
    %c9 = arith.constant 9 : index
    %c0_6 = arith.constant 0 : index
    %c0_7 = arith.constant 0 : index
    %6 = vector.load %arg6[%c0_5, %c9, %c0_6, %c0_7] : memref<2x10x10x32xf32, #tpu.memory_space<vmem>>, vector<2x1x10x32xf32>
    tpu.vector_store %arg6[%c0_5, %c9, %c0_6, %c0_7], %3 {strides = array<i32>} : memref<2x10x10x32xf32, #tpu.memory_space<vmem>>, vector<2x1x10x32xf32>,
    %c0_8 = arith.constant 0 : index
    %c0_9 = arith.constant 0 : index
    %c0_10 = arith.constant 0 : index
    %c0_11 = arith.constant 0 : index
    %7 = vector.load %arg6[%c0_8, %c0_9, %c0_10, %c0_11] : memref<2x10x10x32xf32, #tpu.memory_space<vmem>>, vector<2x10x1x32xf32>
    tpu.vector_store %arg6[%c0_8, %c0_9, %c0_10, %c0_11], %4 {strides = array<i32>} : memref<2x10x10x32xf32, #tpu.memory_space<vmem>>, vector<2x10x1x32xf32>,
    %c0_12 = arith.constant 0 : index
    %c0_13 = arith.constant 0 : index
    %c9_14 = arith.constant 9 : index
    %c0_15 = arith.constant 0 : index
    %8 = vector.load %arg6[%c0_12, %c0_13, %c9_14, %c0_15] : memref<2x10x10x32xf32, #tpu.memory_space<vmem>>, vector<2x10x1x32xf32>
    tpu.vector_store %arg6[%c0_12, %c0_13, %c9_14, %c0_15], %4 {strides = array<i32>} : memref<2x10x10x32xf32, #tpu.memory_space<vmem>>, vector<2x10x1x32xf32>,
    %c0_16 = arith.constant 0 : index
    %c0_17 = arith.constant 0 : index
    %c0_18 = arith.constant 0 : index
    %c0_19 = arith.constant 0 : index
    %9 = vector.load %arg1[%c0_16, %c0_17, %c0_18, %c0_19] : memref<2x8x8x32xbf16, #tpu.memory_space<vmem>>, vector<2x8x8x32xbf16>
    %10 = arith.extf %9 : vector<2x8x8x32xbf16> to vector<2x8x8x32xf32>
    %11 = vector.broadcast %0 : f32 to vector<2x8x8x32xf32>
    %12 = arith.cmpf ogt, %10, %11 : vector<2x8x8x32xf32>
    %13 = vector.broadcast %0 : f32 to vector<2x8x8x32xf32>
    %14 = arith.cmpf olt, %10, %13 : vector<2x8x8x32xf32>
    %15 = vector.broadcast %2 : f32 to vector<2x8x8x32xf32>
    %16 = vector.broadcast %0 : f32 to vector<2x8x8x32xf32>
    %17 = arith.select %14, %15, %16 : vector<2x8x8x32xi1>, vector<2x8x8x32xf32>
    %18 = vector.broadcast %1 : f32 to vector<2x8x8x32xf32>
    %19 = arith.select %12, %18, %17 : vector<2x8x8x32xi1>, vector<2x8x8x32xf32>
    %c0_20 = arith.constant 0 : index
    %c1_21 = arith.constant 1 : index
    %c1_22 = arith.constant 1 : index
    %c0_23 = arith.constant 0 : index
    %20 = vector.load %arg6[%c0_20, %c1_21, %c1_22, %c0_23] : memref<2x10x10x32xf32, #tpu.memory_space<vmem>>, vector<2x8x8x32xf32>
    tpu.vector_store %arg6[%c0_20, %c1_21, %c1_22, %c0_23], %19 {strides = array<i32>} : memref<2x10x10x32xf32, #tpu.memory_space<vmem>>, vector<2x8x8x32xf32>,
    %cst_24 = arith.constant 0.000000e+00 : f32
    %21 = vector.broadcast %cst_24 : f32 to vector<128x32xf32>
    %c0_25 = arith.constant 0 : index
    %c0_26 = arith.constant 0 : index
    %c0_27 = arith.constant 0 : index
    %c0_28 = arith.constant 0 : index
    %22 = vector.load %arg6[%c0_25, %c0_26, %c0_27, %c0_28] : memref<2x10x10x32xf32, #tpu.memory_space<vmem>>, vector<2x8x8x32xf32>
    %23 = arith.truncf %22 : vector<2x8x8x32xf32> to vector<2x8x8x32xbf16>
    %24 = vector.shape_cast %23 : vector<2x8x8x32xbf16> to vector<128x32xbf16>
    %c0_29 = arith.constant 0 : index
    %c0_30 = arith.constant 0 : index
    %c0_31 = arith.constant 0 : index
    %25 = vector.load %arg2[%c0_29, %c0_30, %c0_31] : memref<9x32x32xbf16, #tpu.memory_space<vmem>>, vector<1x32x32xbf16>
    %26 = vector.shape_cast %25 : vector<1x32x32xbf16> to vector<32x32xbf16>
    %cst_32 = arith.constant dense<0.000000e+00> : vector<128x32xf32>
    %27 = tpu.matmul %24, %26, %cst_32 {dimension_numbers = #tpu.dot_dimension_numbers<[1], [0], [0], [1], [0, 0, 1, 1], [], []>} : vector<128x32xbf16>, vector<32x32xbf16>, vector<128x32xf32> -> vector<128x32xf32>
    %28 = arith.addf %21, %27 : vector<128x32xf32>
    %c0_33 = arith.constant 0 : index
    %c0_34 = arith.constant 0 : index
    %c1_35 = arith.constant 1 : index
    %c0_36 = arith.constant 0 : index
    %29 = vector.load %arg6[%c0_33, %c0_34, %c1_35, %c0_36] : memref<2x10x10x32xf32, #tpu.memory_space<vmem>>, vector<2x8x8x32xf32>
    %30 = arith.truncf %29 : vector<2x8x8x32xf32> to vector<2x8x8x32xbf16>
    %31 = vector.shape_cast %30 : vector<2x8x8x32xbf16> to vector<128x32xbf16>
    %c1_37 = arith.constant 1 : index
    %c0_38 = arith.constant 0 : index
    %c0_39 = arith.constant 0 : index
    %32 = vector.load %arg2[%c1_37, %c0_38, %c0_39] : memref<9x32x32xbf16, #tpu.memory_space<vmem>>, vector<1x32x32xbf16>
    %33 = vector.shape_cast %32 : vector<1x32x32xbf16> to vector<32x32xbf16>
    %cst_40 = arith.constant dense<0.000000e+00> : vector<128x32xf32>
    %34 = tpu.matmul %31, %33, %cst_40 {dimension_numbers = #tpu.dot_dimension_numbers<[1], [0], [0], [1], [0, 0, 1, 1], [], []>} : vector<128x32xbf16>, vector<32x32xbf16>, vector<128x32xf32> -> vector<128x32xf32>
    %35 = arith.addf %28, %34 : vector<128x32xf32>
    %c0_41 = arith.constant 0 : index
    %c0_42 = arith.constant 0 : index
    %c2_43 = arith.constant 2 : index
    %c0_44 = arith.constant 0 : index
    %36 = vector.load %arg6[%c0_41, %c0_42, %c2_43, %c0_44] : memref<2x10x10x32xf32, #tpu.memory_space<vmem>>, vector<2x8x8x32xf32>
    %37 = arith.truncf %36 : vector<2x8x8x32xf32> to vector<2x8x8x32xbf16>
    %38 = vector.shape_cast %37 : vector<2x8x8x32xbf16> to vector<128x32xbf16>
    %c2_45 = arith.constant 2 : index
    %c0_46 = arith.constant 0 : index
    %c0_47 = arith.constant 0 : index
    %39 = vector.load %arg2[%c2_45, %c0_46, %c0_47] : memref<9x32x32xbf16, #tpu.memory_space<vmem>>, vector<1x32x32xbf16>
    %40 = vector.shape_cast %39 : vector<1x32x32xbf16> to vector<32x32xbf16>
    %cst_48 = arith.constant dense<0.000000e+00> : vector<128x32xf32>
    %41 = tpu.matmul %38, %40, %cst_48 {dimension_numbers = #tpu.dot_dimension_numbers<[1], [0], [0], [1], [0, 0, 1, 1], [], []>} : vector<128x32xbf16>, vector<32x32xbf16>, vector<128x32xf32> -> vector<128x32xf32>
    %42 = arith.addf %35, %41 : vector<128x32xf32>
    %c0_49 = arith.constant 0 : index
    %c1_50 = arith.constant 1 : index
    %c0_51 = arith.constant 0 : index
    %c0_52 = arith.constant 0 : index
    %43 = vector.load %arg6[%c0_49, %c1_50, %c0_51, %c0_52] : memref<2x10x10x32xf32, #tpu.memory_space<vmem>>, vector<2x8x8x32xf32>
    %44 = arith.truncf %43 : vector<2x8x8x32xf32> to vector<2x8x8x32xbf16>
    %45 = vector.shape_cast %44 : vector<2x8x8x32xbf16> to vector<128x32xbf16>
    %c3 = arith.constant 3 : index
    %c0_53 = arith.constant 0 : index
    %c0_54 = arith.constant 0 : index
    %46 = vector.load %arg2[%c3, %c0_53, %c0_54] : memref<9x32x32xbf16, #tpu.memory_space<vmem>>, vector<1x32x32xbf16>
    %47 = vector.shape_cast %46 : vector<1x32x32xbf16> to vector<32x32xbf16>
    %cst_55 = arith.constant dense<0.000000e+00> : vector<128x32xf32>
    %48 = tpu.matmul %45, %47, %cst_55 {dimension_numbers = #tpu.dot_dimension_numbers<[1], [0], [0], [1], [0, 0, 1, 1], [], []>} : vector<128x32xbf16>, vector<32x32xbf16>, vector<128x32xf32> -> vector<128x32xf32>
    %49 = arith.addf %42, %48 : vector<128x32xf32>
    %c0_56 = arith.constant 0 : index
    %c1_57 = arith.constant 1 : index
    %c1_58 = arith.constant 1 : index
    %c0_59 = arith.constant 0 : index
    %50 = vector.load %arg6[%c0_56, %c1_57, %c1_58, %c0_59] : memref<2x10x10x32xf32, #tpu.memory_space<vmem>>, vector<2x8x8x32xf32>
    %51 = arith.truncf %50 : vector<2x8x8x32xf32> to vector<2x8x8x32xbf16>
    %52 = vector.shape_cast %51 : vector<2x8x8x32xbf16> to vector<128x32xbf16>
    %c4 = arith.constant 4 : index
    %c0_60 = arith.constant 0 : index
    %c0_61 = arith.constant 0 : index
    %53 = vector.load %arg2[%c4, %c0_60, %c0_61] : memref<9x32x32xbf16, #tpu.memory_space<vmem>>, vector<1x32x32xbf16>
    %54 = vector.shape_cast %53 : vector<1x32x32xbf16> to vector<32x32xbf16>
    %cst_62 = arith.constant dense<0.000000e+00> : vector<128x32xf32>
    %55 = tpu.matmul %52, %54, %cst_62 {dimension_numbers = #tpu.dot_dimension_numbers<[1], [0], [0], [1], [0, 0, 1, 1], [], []>} : vector<128x32xbf16>, vector<32x32xbf16>, vector<128x32xf32> -> vector<128x32xf32>
    %56 = arith.addf %49, %55 : vector<128x32xf32>
    %c0_63 = arith.constant 0 : index
    %c1_64 = arith.constant 1 : index
    %c2_65 = arith.constant 2 : index
    %c0_66 = arith.constant 0 : index
    %57 = vector.load %arg6[%c0_63, %c1_64, %c2_65, %c0_66] : memref<2x10x10x32xf32, #tpu.memory_space<vmem>>, vector<2x8x8x32xf32>
    %58 = arith.truncf %57 : vector<2x8x8x32xf32> to vector<2x8x8x32xbf16>
    %59 = vector.shape_cast %58 : vector<2x8x8x32xbf16> to vector<128x32xbf16>
    %c5 = arith.constant 5 : index
    %c0_67 = arith.constant 0 : index
    %c0_68 = arith.constant 0 : index
    %60 = vector.load %arg2[%c5, %c0_67, %c0_68] : memref<9x32x32xbf16, #tpu.memory_space<vmem>>, vector<1x32x32xbf16>
    %61 = vector.shape_cast %60 : vector<1x32x32xbf16> to vector<32x32xbf16>
    %cst_69 = arith.constant dense<0.000000e+00> : vector<128x32xf32>
    %62 = tpu.matmul %59, %61, %cst_69 {dimension_numbers = #tpu.dot_dimension_numbers<[1], [0], [0], [1], [0, 0, 1, 1], [], []>} : vector<128x32xbf16>, vector<32x32xbf16>, vector<128x32xf32> -> vector<128x32xf32>
    %63 = arith.addf %56, %62 : vector<128x32xf32>
    %c0_70 = arith.constant 0 : index
    %c2_71 = arith.constant 2 : index
    %c0_72 = arith.constant 0 : index
    %c0_73 = arith.constant 0 : index
    %64 = vector.load %arg6[%c0_70, %c2_71, %c0_72, %c0_73] : memref<2x10x10x32xf32, #tpu.memory_space<vmem>>, vector<2x8x8x32xf32>
    %65 = arith.truncf %64 : vector<2x8x8x32xf32> to vector<2x8x8x32xbf16>
    %66 = vector.shape_cast %65 : vector<2x8x8x32xbf16> to vector<128x32xbf16>
    %c6 = arith.constant 6 : index
    %c0_74 = arith.constant 0 : index
    %c0_75 = arith.constant 0 : index
    %67 = vector.load %arg2[%c6, %c0_74, %c0_75] : memref<9x32x32xbf16, #tpu.memory_space<vmem>>, vector<1x32x32xbf16>
    %68 = vector.shape_cast %67 : vector<1x32x32xbf16> to vector<32x32xbf16>
    %cst_76 = arith.constant dense<0.000000e+00> : vector<128x32xf32>
    %69 = tpu.matmul %66, %68, %cst_76 {dimension_numbers = #tpu.dot_dimension_numbers<[1], [0], [0], [1], [0, 0, 1, 1], [], []>} : vector<128x32xbf16>, vector<32x32xbf16>, vector<128x32xf32> -> vector<128x32xf32>
    %70 = arith.addf %63, %69 : vector<128x32xf32>
    %c0_77 = arith.constant 0 : index
    %c2_78 = arith.constant 2 : index
    %c1_79 = arith.constant 1 : index
    %c0_80 = arith.constant 0 : index
    %71 = vector.load %arg6[%c0_77, %c2_78, %c1_79, %c0_80] : memref<2x10x10x32xf32, #tpu.memory_space<vmem>>, vector<2x8x8x32xf32>
    %72 = arith.truncf %71 : vector<2x8x8x32xf32> to vector<2x8x8x32xbf16>
    %73 = vector.shape_cast %72 : vector<2x8x8x32xbf16> to vector<128x32xbf16>
    %c7 = arith.constant 7 : index
    %c0_81 = arith.constant 0 : index
    %c0_82 = arith.constant 0 : index
    %74 = vector.load %arg2[%c7, %c0_81, %c0_82] : memref<9x32x32xbf16, #tpu.memory_space<vmem>>, vector<1x32x32xbf16>
    %75 = vector.shape_cast %74 : vector<1x32x32xbf16> to vector<32x32xbf16>
    %cst_83 = arith.constant dense<0.000000e+00> : vector<128x32xf32>
    %76 = tpu.matmul %73, %75, %cst_83 {dimension_numbers = #tpu.dot_dimension_numbers<[1], [0], [0], [1], [0, 0, 1, 1], [], []>} : vector<128x32xbf16>, vector<32x32xbf16>, vector<128x32xf32> -> vector<128x32xf32>
    %77 = arith.addf %70, %76 : vector<128x32xf32>
    %c0_84 = arith.constant 0 : index
    %c2_85 = arith.constant 2 : index
    %c2_86 = arith.constant 2 : index
    %c0_87 = arith.constant 0 : index
    %78 = vector.load %arg6[%c0_84, %c2_85, %c2_86, %c0_87] : memref<2x10x10x32xf32, #tpu.memory_space<vmem>>, vector<2x8x8x32xf32>
    %79 = arith.truncf %78 : vector<2x8x8x32xf32> to vector<2x8x8x32xbf16>
    %80 = vector.shape_cast %79 : vector<2x8x8x32xbf16> to vector<128x32xbf16>
    %c8 = arith.constant 8 : index
    %c0_88 = arith.constant 0 : index
    %c0_89 = arith.constant 0 : index
    %81 = vector.load %arg2[%c8, %c0_88, %c0_89] : memref<9x32x32xbf16, #tpu.memory_space<vmem>>, vector<1x32x32xbf16>
    %82 = vector.shape_cast %81 : vector<1x32x32xbf16> to vector<32x32xbf16>
    %cst_90 = arith.constant dense<0.000000e+00> : vector<128x32xf32>
    %83 = tpu.matmul %80, %82, %cst_90 {dimension_numbers = #tpu.dot_dimension_numbers<[1], [0], [0], [1], [0, 0, 1, 1], [], []>} : vector<128x32xbf16>, vector<32x32xbf16>, vector<128x32xf32> -> vector<128x32xf32>
    %84 = arith.addf %77, %83 : vector<128x32xf32>
    %85 = arith.truncf %84 : vector<128x32xf32> to vector<128x32xbf16>
    %c0_91 = arith.constant 0 : index
    %c0_92 = arith.constant 0 : index
    %86 = vector.load %arg4[%c0_91, %c0_92] : memref<128x32xbf16, #tpu.memory_space<vmem>>, vector<128x32xbf16>
    tpu.vector_store %arg4[%c0_91, %c0_92], %85 {strides = array<i32>} : memref<128x32xbf16, #tpu.memory_space<vmem>>, vector<128x32xbf16>,
    %cst_93 = arith.constant dense<0.000000e+00> : vector<32xf32>
    %87 = vector.multi_reduction <add>, %84, %cst_93 [0] : vector<128x32xf32> to vector<32xf32>
    %88 = vector.shape_cast %87 : vector<32xf32> to vector<1x32xf32>
    %c0_94 = arith.constant 0 : index
    %c0_95 = arith.constant 0 : index
    %c0_96 = arith.constant 0 : index
    %89 = vector.load %arg5[%c0_94, %c0_95, %c0_96] : memref<1x2x32xf32, #tpu.memory_space<vmem>>, vector<1x1x32xf32>
    %90 = vector.shape_cast %89 : vector<1x1x32xf32> to vector<1x32xf32>
    %91 = vector.shape_cast %88 : vector<1x32xf32> to vector<1x1x32xf32>
    tpu.vector_store %arg5[%c0_94, %c0_95, %c0_96], %91 {strides = array<i32>} : memref<1x2x32xf32, #tpu.memory_space<vmem>>, vector<1x1x32xf32>,
    %92 = arith.mulf %84, %84 : vector<128x32xf32>
    %cst_97 = arith.constant dense<0.000000e+00> : vector<32xf32>
    %93 = vector.multi_reduction <add>, %92, %cst_97 [0] : vector<128x32xf32> to vector<32xf32>
    %94 = vector.shape_cast %93 : vector<32xf32> to vector<1x32xf32>
    %c0_98 = arith.constant 0 : index
    %c1_99 = arith.constant 1 : index
    %c0_100 = arith.constant 0 : index
    %95 = vector.load %arg5[%c0_98, %c1_99, %c0_100] : memref<1x2x32xf32, #tpu.memory_space<vmem>>, vector<1x1x32xf32>
    %96 = vector.shape_cast %95 : vector<1x1x32xf32> to vector<1x32xf32>
    %97 = vector.shape_cast %94 : vector<1x32xf32> to vector<1x1x32xf32>
    tpu.vector_store %arg5[%c0_98, %c1_99, %c0_100], %97 {strides = array<i32>} : memref<1x2x32xf32, #tpu.memory_space<vmem>>, vector<1x1x32xf32>,
    return
  }
  func.func @transform_0(%arg0: i32) -> (i32, i32, i32, i32) {
    %c0_i32 = arith.constant 0 : i32
    %c0_i32_0 = arith.constant 0 : i32
    %c0_i32_1 = arith.constant 0 : i32
    %c0_i32_2 = arith.constant 0 : i32
    return %arg0, %c0_i32, %c0_i32_0, %c0_i32_1 : i32, i32, i32, i32
  }
  func.func @transform_1(%arg0: i32) -> (i32, i32, i32) {
    %c0_i32 = arith.constant 0 : i32
    %c0_i32_0 = arith.constant 0 : i32
    %c0_i32_1 = arith.constant 0 : i32
    %c0_i32_2 = arith.constant 0 : i32
    return %c0_i32, %c0_i32_0, %c0_i32_1 : i32, i32, i32
  }
  func.func @transform_2(%arg0: i32) -> i32 {
    %c0_i32 = arith.constant 0 : i32
    %c0_i32_0 = arith.constant 0 : i32
    return %c0_i32 : i32
  }
  func.func @transform_3(%arg0: i32) -> (i32, i32) {
    %c0_i32 = arith.constant 0 : i32
    %c0_i32_0 = arith.constant 0 : i32
    return %arg0, %c0_i32 : i32, i32
  }
  func.func @transform_4(%arg0: i32) -> (i32, i32, i32) {
    %c0_i32 = arith.constant 0 : i32
    %c0_i32_0 = arith.constant 0 : i32
    %c0_i32_1 = arith.constant 0 : i32
    return %arg0, %c0_i32, %c0_i32_0 : i32, i32, i32
  }
}

</mosaic_0001>

<bundles_post_ra>
// kernel: tile.14
= control target key start
LH: loop header
LB: loop body
LE: loop exit
PB: predicated region body
PF: predicated region fallthrough
CT: control target
= control target key end

     0   :  { %vm15_vm0 = vcmask 1047556   ;;  %s68_s16 = smov 96   ;;  %vm3_vm1 = vcmask 261120   ;;  %s70_s21 = smov 64   ;;  %vm19_vm2 = vcmask 1048320   ;;  %vm31_vm3 = vcmask 785920   ;;  %s108_s0 = inlined_call_operand.vmem [shape: f32[4,8,32], index: 0, kind: input, shape index: {}]   ;;  %s109_s1 = inlined_call_operand.vmem [shape: f32[4,256], index: 1, kind: output, shape index: {}]  }
   0x1   :  { %v58_v0 = vld [vmem:[%s108_s0 + $0x3] ss:$8 sm:$0xf]   ;;  %v59_v1 = vld [vmem:[%s108_s0 - $0x19] ss:$8 sm:$0xf0]  }
   0x2   :  { %v60_v2 = vld [vmem:[%s108_s0 + $0x2] ss:$8 sm:$0xf]   ;;  %v16_v3 = vsel %vm15_vm0, %v59_v1, %v58_v0  ;;  %v61_v4 = vld [vmem:[%s108_s0 - $0x1a] ss:$8 sm:$0xf0]  }
   0x3   :  { %v62_v5 = vld [vmem:[%s108_s0 + $0x1] ss:$8 sm:$0xf]   ;;  %17 = vrot.lane.b32.xlu0 %v16_v3, %s68_s16  ;;  %v63_v6 = vld [vmem:[%s108_s0 - $0x1b] ss:$8 sm:$0xf0]   ;;  %v28_v7 = vsel %vm15_vm0, %v61_v4, %v60_v2 }
   0x4   :  { %v40_v8 = vsel %vm15_vm0, %v63_v6, %v62_v5  ;;  %v2_v9 = vld [vmem:[%s108_s0] ss:$4 sm:$0xff]   ;;  %s69_s0 = smov 32   ;;  %vm43_vm4 = vcmask 523520  }
   0x5   :  { %41 = vrot.lane.b32.xlu1 %v40_v8, %s69_s0  ;;  %4 = vst.msk [vmem:[#allocation0] ss:$8 sm:$0x3] %vm3_vm1, %v2_v9   ;;  %6 = vst.msk [vmem:[#allocation0 - $0xf] ss:$8 sm:$0xc] %vm3_vm1, %v2_v9  }
   0x6   :  { %8 = vst.msk [vmem:[#allocation0 - $0x1e] ss:$8 sm:$0x30] %vm3_vm1, %v2_v9   ;;  %10 = vst.msk [vmem:[#allocation0 - $0x2d] ss:$8 sm:$0xc0] %vm3_vm1, %v2_v9  }
   0x7   :  { %29 = vrot.lane.b32.xlu0 %v28_v7, %s70_s21 }
  0x75   :  { %v18_v10 = vpop.permute.xlu0 %17  }
  0x76   :  { %20 = vst.msk [vmem:[#allocation0] sm:$0xf] %vm19_vm2, %v18_v10   ;;  %22 = vst.msk [vmem:[#allocation0 + $0x4] sm:$0xf0] %vm19_vm2, %v18_v10  }
  0x77   :  { %v42_v11 = vpop.permute.xlu1 %41  }
  0x79   :  { %v30_v12 = vpop.permute.xlu0 %29  }
  0x7a   :  { %32 = vst.msk [vmem:[#allocation0] sm:$0xf] %vm31_vm3, %v30_v12   ;;  %34 = vst.msk [vmem:[#allocation0 + $0x4] sm:$0xf0] %vm31_vm3, %v30_v12  }
  0x7b   :  { %44 = vst.msk [vmem:[#allocation0] sm:$0xf] %vm43_vm4, %v42_v11   ;;  %46 = vst.msk [vmem:[#allocation0 + $0x4] sm:$0xf0] %vm43_vm4, %v42_v11  }
  0x82   :  { %v50_v13 = vld [vmem:[#allocation0] sm:$0xf]  ;;  %v54_v14 = vld [vmem:[#allocation0 + $0x8] sm:$0xf] }
  0x83   :  { %52 = vst [vmem:[%s109_s1] sm:$0xf] %v50_v13  ;;  %64 = vst [vmem:[%s109_s1 + $0x4] sm:$0xf] %v54_v14 }

// kernel: basic_block_1w1a_forward.5
= control target key start
LH: loop header
LB: loop body
LE: loop exit
PB: predicated region body
PF: predicated region fallthrough
CT: control target
= control target key end

     0   :  { %v22_v0 = vlaneseq  ;;  %s188_s0 = inlined_call_operand.vmem [shape: bf16[16,256], index: 0, kind: input, shape index: {}]   ;;  %s189_s2 = inlined_call_operand.vmem [shape: f32[4,256], index: 2, kind: input, shape index: {}]   ;;  %s190_s1 = inlined_call_operand.vmem [shape: bf16[16,256], index: 1, kind: input, shape index: {}]   ;;  %s191_s3 = inlined_call_operand.vmem [shape: bf16[16,256], index: 3, kind: output, shape index: {}]  }
   0x1   :  { %v14_v1 = vld [vmem:[%s188_s0] sm:$0xff]  ;;  %v15_v3 = vld [vmem:[%s188_s0 + $0x8] sm:$0xff] }
   0x2   :  { %v23_v2 = vshrl.u32 %v22_v0, 7  ;;  %v16_v4 = vunpack.c.l.bf16 %v14_v1  ;;  %v17_v5 = vunpack.c.h.bf16 %v14_v1  ;;  %v20_v6 = vld [vmem:[%s189_s2] ss:$4 sm:$0x3]  ;;  %v18_v11 = vunpack.c.l.bf16 %v15_v3  ;;  %v54_v13 = vld [vmem:[%s190_s1 + $0x8] sm:$0xff] }
   0x3   :  { %v131_v7 = vld [vmem:[%s189_s2 + $0x1] ss:$4 sm:$0x3]  ;;  %v19_v12 = vunpack.c.h.bf16 %v15_v3  ;;  %v57_v20 = vunpack.c.l.bf16 %v54_v13  ;;  %v58_v21 = vunpack.c.h.bf16 %v54_v13  ;;  %v132_v24 = vld [vmem:[%s189_s2 + $0x2] ss:$4 sm:$0x3] }
   0x4   :  { %v24_v8 = vsub.s32 0, %v23_v2  ;;  %v28_v9 = vsub.s32 1, %v23_v2  ;;  %v53_v10 = vld [vmem:[%s190_s1] sm:$0xff] }
   0x5   :  { %v55_v18 = vunpack.c.l.bf16 %v53_v10  ;;  %v56_v19 = vunpack.c.h.bf16 %v53_v10  ;;  %v133_v29 = vld [vmem:[%s189_s2 + $0x3] ss:$4 sm:$0x3] }
   0x6   :  { %v25_v14 = vrot.slane %v20_v6, %v24_v8  ;;  %v29_v15 = vrot.slane %v20_v6, %v28_v9  ;;  %v42_v16 = vrot.slane %v131_v7, %v24_v8  ;;  %v46_v17 = vrot.slane %v131_v7, %v28_v9 }
   0x7   :  { %v73_v32 = vrot.slane %v132_v24, %v24_v8  ;;  %v77_v33 = vrot.slane %v132_v24, %v28_v9  ;;  %v98_v38 = vrot.slane %v133_v29, %v24_v8  ;;  %v102_v39 = vrot.slane %v133_v29, %v28_v9 }
   0x8   :  { %v32_v22 = vmul.f32 %v25_v14, %v16_v4  ;;  %v33_v23 = vmul.f32 %v29_v15, %v17_v5  ;;  %v34_v25 = vmul.f32 %v25_v14, %v18_v11  ;;  %v35_v26 = vmul.f32 %v29_v15, %v19_v12 }
   0xa   :  { %v49_v27 = vadd.f32 %v42_v16, %v32_v22  ;;  %v50_v28 = vadd.f32 %v46_v17, %v33_v23  ;;  %v51_v30 = vadd.f32 %v42_v16, %v34_v25  ;;  %v52_v31 = vadd.f32 %v46_v17, %v35_v26 }
   0xc   :  { %v59_v34 = vadd.f32 %v55_v18, %v49_v27  ;;  %v60_v35 = vadd.f32 %v56_v19, %v50_v28  ;;  %v61_v36 = vadd.f32 %v57_v20, %v51_v30  ;;  %v62_v37 = vadd.f32 %v58_v21, %v52_v31 }
   0xe   :  { %v65_v40 = vmax.f32 %v59_v34, 0.0  ;;  %v66_v41 = vmax.f32 %v60_v35, 0.0  ;;  %v86_v42 = vsub.f32 0.0, %v59_v34  ;;  %v87_v43 = vsub.f32 0.0, %v60_v35 }
   0xf   :  { %v67_v44 = vmax.f32 %v61_v36, 0.0  ;;  %v68_v45 = vmax.f32 %v62_v37, 0.0  ;;  %v88_v46 = vsub.f32 0.0, %v61_v36  ;;  %v89_v47 = vsub.f32 0.0, %v62_v37 }
  0x10   :  { %v80_v48 = vmul.f32 %v73_v32, %v65_v40  ;;  %v81_v49 = vmul.f32 %v77_v33, %v66_v41  ;;  %v90_v50 = vmax.f32 %v86_v42, 0.0  ;;  %v91_v51 = vmax.f32 %v87_v43, 0.0 }
  0x11   :  { %v82_v52 = vmul.f32 %v73_v32, %v67_v44  ;;  %v83_v53 = vmul.f32 %v77_v33, %v68_v45  ;;  %v92_v54 = vmax.f32 %v88_v46, 0.0  ;;  %v93_v55 = vmax.f32 %v89_v47, 0.0 }
  0x12   :  { %v105_v56 = vmul.f32 %v98_v38, %v90_v50  ;;  %v106_v57 = vmul.f32 %v102_v39, %v91_v51 }
  0x13   :  { %v107_v58 = vmul.f32 %v98_v38, %v92_v54  ;;  %v108_v59 = vmul.f32 %v102_v39, %v93_v55 }
  0x14   :  { %v109_v60 = vsub.f32 %v80_v48, %v105_v56  ;;  %v110_v61 = vsub.f32 %v81_v49, %v106_v57 }
  0x15   :  { %v111_v62 = vsub.f32 %v82_v52, %v107_v58  ;;  %v112_v63 = vsub.f32 %v83_v53, %v108_v59 }
  0x16   :  { %v136_v0 = vpack.c.bf16 %v110_v61, %v109_v60 }
  0x17   :  { %v137_v1 = vpack.c.bf16 %v112_v63, %v111_v62 }
  0x18   :  { %125 = vst [vmem:[%s191_s3] sm:$0xff] %v136_v0 }
  0x19   :  { %126 = vst [vmem:[%s191_s3 + $0x8] sm:$0xff] %v137_v1 }

// kernel: basic_block_1w1a_forward.7
= control target key start
LH: loop header
LB: loop body
LE: loop exit
PB: predicated region body
PF: predicated region fallthrough
CT: control target
= control target key end

     0   :  { %v22_v0 = vlaneseq  ;;  %s180_s0 = inlined_call_operand.vmem [shape: bf16[16,256], index: 0, kind: input, shape index: {}]   ;;  %s181_s2 = inlined_call_operand.vmem [shape: f32[4,256], index: 2, kind: input, shape index: {}]   ;;  %s182_s1 = inlined_call_operand.vmem [shape: bf16[16,256], index: 1, kind: input, shape index: {}]   ;;  %s183_s3 = inlined_call_operand.vmem [shape: f32[16,256], index: 3, kind: output, shape index: {}]  }
   0x1   :  { %v14_v1 = vld [vmem:[%s180_s0] sm:$0xff]  ;;  %v15_v3 = vld [vmem:[%s180_s0 + $0x8] sm:$0xff] }
   0x2   :  { %v23_v2 = vshrl.u32 %v22_v0, 7  ;;  %v20_v4 = vld [vmem:[%s181_s2] ss:$4 sm:$0x3]  ;;  %v16_v6 = vunpack.c.l.bf16 %v14_v1  ;;  %v18_v9 = vunpack.c.l.bf16 %v15_v3  ;;  %v17_v11 = vunpack.c.h.bf16 %v14_v1  ;;  %v54_v12 = vld [vmem:[%s182_s1 + $0x8] sm:$0xff] }
   0x3   :  { %v121_v5 = vld [vmem:[%s181_s2 + $0x1] ss:$4 sm:$0x3]  ;;  %v19_v13 = vunpack.c.h.bf16 %v15_v3  ;;  %v57_v21 = vunpack.c.l.bf16 %v54_v12  ;;  %v122_v22 = vld [vmem:[%s181_s2 + $0x2] ss:$4 sm:$0x3]  ;;  %v58_v27 = vunpack.c.h.bf16 %v54_v12 }
   0x4   :  { %v24_v7 = vsub.s32 0, %v23_v2  ;;  %v28_v8 = vsub.s32 1, %v23_v2  ;;  %v53_v10 = vld [vmem:[%s182_s1] sm:$0xff] }
   0x5   :  { %v55_v19 = vunpack.c.l.bf16 %v53_v10  ;;  %v123_v23 = vld [vmem:[%s181_s2 + $0x3] ss:$4 sm:$0x3]  ;;  %v56_v25 = vunpack.c.h.bf16 %v53_v10 }
   0x6   :  { %v25_v14 = vrot.slane %v20_v4, %v24_v7  ;;  %v42_v15 = vrot.slane %v121_v5, %v24_v7  ;;  %v29_v16 = vrot.slane %v20_v4, %v28_v8  ;;  %v46_v17 = vrot.slane %v121_v5, %v28_v8 }
   0x7   :  { %v73_v33 = vrot.slane %v122_v22, %v24_v7  ;;  %v98_v34 = vrot.slane %v123_v23, %v24_v7  ;;  %v77_v37 = vrot.slane %v122_v22, %v28_v8  ;;  %v102_v38 = vrot.slane %v123_v23, %v28_v8 }
   0x8   :  { %v32_v18 = vmul.f32 %v25_v14, %v16_v6  ;;  %v34_v20 = vmul.f32 %v25_v14, %v18_v9  ;;  %v33_v24 = vmul.f32 %v29_v16, %v17_v11  ;;  %v35_v26 = vmul.f32 %v29_v16, %v19_v13 }
   0xa   :  { %v49_v28 = vadd.f32 %v42_v15, %v32_v18  ;;  %v51_v29 = vadd.f32 %v42_v15, %v34_v20  ;;  %v50_v30 = vadd.f32 %v46_v17, %v33_v24  ;;  %v52_v31 = vadd.f32 %v46_v17, %v35_v26 }
   0xc   :  { %v59_v32 = vadd.f32 %v55_v19, %v49_v28  ;;  %v61_v35 = vadd.f32 %v57_v21, %v51_v29  ;;  %v60_v36 = vadd.f32 %v56_v25, %v50_v30  ;;  %v62_v39 = vadd.f32 %v58_v27, %v52_v31 }
   0xe   :  { %v65_v40 = vmax.f32 %v59_v32, 0.0  ;;  %v86_v41 = vsub.f32 0.0, %v59_v32  ;;  %v67_v42 = vmax.f32 %v61_v35, 0.0  ;;  %v88_v43 = vsub.f32 0.0, %v61_v35 }
   0xf   :  { %v66_v44 = vmax.f32 %v60_v36, 0.0  ;;  %v87_v45 = vsub.f32 0.0, %v60_v36  ;;  %v68_v46 = vmax.f32 %v62_v39, 0.0  ;;  %v89_v47 = vsub.f32 0.0, %v62_v39 }
  0x10   :  { %v80_v48 = vmul.f32 %v73_v33, %v65_v40  ;;  %v90_v49 = vmax.f32 %v86_v41, 0.0  ;;  %v82_v50 = vmul.f32 %v73_v33, %v67_v42  ;;  %v92_v51 = vmax.f32 %v88_v43, 0.0 }
  0x11   :  { %v81_v52 = vmul.f32 %v77_v37, %v66_v44  ;;  %v91_v53 = vmax.f32 %v87_v45, 0.0  ;;  %v83_v54 = vmul.f32 %v77_v37, %v68_v46  ;;  %v93_v55 = vmax.f32 %v89_v47, 0.0 }
  0x12   :  { %v105_v56 = vmul.f32 %v98_v34, %v90_v49  ;;  %v107_v57 = vmul.f32 %v98_v34, %v92_v51 }
  0x13   :  { %v106_v58 = vmul.f32 %v102_v38, %v91_v53  ;;  %v108_v59 = vmul.f32 %v102_v38, %v93_v55 }
  0x14   :  { %v109_v60 = vsub.f32 %v80_v48, %v105_v56  ;;  %v111_v61 = vsub.f32 %v82_v50, %v107_v57 }
  0x15   :  { %v110_v62 = vsub.f32 %v81_v52, %v106_v58  ;;  %v112_v63 = vsub.f32 %v83_v54, %v108_v59 }
  0x16   :  { %113 = vst [vmem:[%s183_s3] sm:$0xff] %v109_v60  ;;  %115 = vst [vmem:[%s183_s3 + $0x10] sm:$0xff] %v111_v61 }
  0x17   :  { %114 = vst [vmem:[%s183_s3 + $0x8] sm:$0xff] %v110_v62  ;;  %116 = vst [vmem:[%s183_s3 + $0x18] sm:$0xff] %v112_v63 }

// kernel: basic_block_1w1a_forward.4
= control target key start
LH: loop header
LB: loop body
LE: loop exit
PB: predicated region body
PF: predicated region fallthrough
CT: control target
= control target key end

     0   :  { %13 = vsyncpa [#allocation7], 0  ;;  %s4758_s0 = inlined_call_operand.vmem [shape: bf16[2,8,8,16], index: 0, kind: input, shape index: {}]   ;;  %s4759_s1 = inlined_call_operand.vmem [shape: bf16[2,8,8,16], index: 1, kind: input, shape index: {}]   ;;  %s4760_s2 = inlined_call_operand.vmem [shape: bf16[2,8,8,16], index: 2, kind: input, shape index: {}]   ;;  %s4761_s3 = inlined_call_operand.vmem [shape: bf16[2,8,8,16], index: 3, kind: input, shape index: {}]   ;;  %s4762_s4 = inlined_call_operand.vmem [shape: bf16[9,16,32], index: 4, kind: input, shape index: {}]   ;;  %s4763_s5 = inlined_call_operand.vmem [shape: f32[3], index: 5, kind: input, shape index: {}]   ;;  %s4764_s6 = inlined_call_operand.vmem [shape: bf16[128,32], index: 6, kind: output, shape index: {0}]   ;;  %s4765_s7 = inlined_call_operand.vmem [shape: f32[1,2,32], index: 7, kind: output, shape index: {1}]  }
   0x1   :  { %s30_s26 = sshll.u32 %s4763_s5, 4  ;;  %s31_s26 = int_to_ptr.vmem [resolvable:$true] %s30_s26 }
   0x2   :  { %s3516_s27 = scalar_lea.vmem %s31_s26, 16  ;;  %p3521_p1 = scmp.lt.s32.totalorder %s31_s26, %s31_s26 }
   0x3   :  { %p3517_p0 = scmp.ne.s32.totalorder %s31_s26, %s3516_s27  ;;  %p3522_p2 = scmp.lt.s32.totalorder %s3516_s27, %s3516_s27 }
   0x5   :  { %p3523_p3 = por %p3522_p2, %p3521_p1 }
   0x7   :  { %p3524_p4 = pnand %p3523_p3, %p3517_p0 }
   0x9   :  { %3527 = shalt.err (!%p3524_p4)
}
   0xa   :  { %s3530_s28 = smov [#allocation6]  }
   0xb   :  { %33 = dma.vmem_to_smem %s31_s26, 16, %s3530_s28, [#allocation7]  }
   0xc   :  { %3528 = dma.done.wait [#allocation7], 16  }
   0xd   :  { %3529 = vsyncadd [#allocation7], 4294967280 }
   0xe   :  { %37 = sfence }
   0xf   :  { %v3506_v0 = vld [vmem:[%s4762_s4 + $0x8] sm:$0xff]   ;;  %vm42_vm0 = vcmask 130048   ;;  %v3507_v1 = vld [vmem:[%s4762_s4 + $0x20] sm:$0xff]   ;;  %s3581_s9 = sld [smem:[#allocation6]]  ;;  %s3583_s10 = sld [smem:[#allocation6 + $0x1]]  ;;  %v3531_v2 = vmov 0.0  }
  0x10   :  { %3212 = vmatprep.subr.bf16.mxu1 %v3506_v0  ;;  %182 = vst.msk [vmem:[#allocation3] sm:$0xff] %vm42_vm0, %v3531_v2  ;;  %v3589_v3 = vld [vmem:[%s4759_s1] sm:$0xff]   ;;  %43 = vst.msk [vmem:[#allocation2] sm:$0xff] %vm42_vm0, %v3531_v2  ;;  %3284 = vmatprep.subr.bf16.mxu0 %v3507_v1  ;;  %s3599_s15 = sld [smem:[#allocation6 + $0x2]]  ;;  %vm44_vm1 = vcmask 122880   ;;  %v3614_v10 = vld [vmem:[%s4762_s4 + $0x28] sm:$0xff]  }
  0x11   :  { %46 = vst.msk [vmem:[#allocation2 + $0x90] sm:$0xff] %vm42_vm0, %v3531_v2  ;;  %184 = vst.msk [vmem:[#allocation3 + $0x90] sm:$0xff] %vm42_vm0, %v3531_v2  ;;  %v3597_v4 = vld [vmem:[%s4762_s4] sm:$0xff]   ;;  %3213 = vmatpush3.bf16.msra.mxu1 %v3506_v0  ;;  %3285 = vmatpush3.bf16.msra.mxu0 %v3507_v1  ;;  %v3009_v6 = vunpack.c.l.bf16 %v3589_v3  ;;  %v3010_v7 = vunpack.c.h.bf16 %v3589_v3  ;;  %v3619_v11 = vld [vmem:[%s4759_s1 + $0x8] sm:$0xff]  }
  0x12   :  { %3230 = vmatprep.subr.bf16.mxu1 %v3597_v4  ;;  %v3605_v5 = vld [vmem:[%s4761_s3] sm:$0xff]   ;;  %v3624_v12 = vld [vmem:[%s4761_s3 + $0x8] sm:$0xff]   ;;  %48 = vst.msk [vmem:[#allocation2] sm:$0x1] %vm44_vm1, %v3531_v2  ;;  %49 = vst.msk [vmem:[#allocation2 + $0x10] sm:$0x1] %vm44_vm1, %v3531_v2  ;;  %v3013_v13 = vunpack.c.l.bf16 %v3619_v11  ;;  %v3014_v16 = vunpack.c.h.bf16 %v3619_v11  ;;  %3302 = vmatprep.subr.bf16.mxu0 %v3614_v10 }
  0x13   :  { %v3073_v8 = vunpack.c.l.bf16 %v3605_v5  ;;  %v3074_v9 = vunpack.c.h.bf16 %v3605_v5  ;;  %45 = vst.msk [vmem:[#allocation2 + $0x8] sm:$0x1] %vm44_vm1, %v3531_v2  ;;  %47 = vst.msk [vmem:[#allocation2 + $0x98] sm:$0x1] %vm44_vm1, %v3531_v2  ;;  %v3077_v14 = vunpack.c.l.bf16 %v3624_v12  ;;  %v3078_v15 = vunpack.c.h.bf16 %v3624_v12  ;;  %v3669_v17 = vld [vmem:[%s4759_s1 + $0x10] sm:$0xff]   ;;  %v3679_v19 = vld [vmem:[%s4759_s1 + $0x18] sm:$0xff]  }
  0x14   :  { %50 = vst.msk [vmem:[#allocation2 + $0x20] sm:$0x1] %vm44_vm1, %v3531_v2  ;;  %51 = vst.msk [vmem:[#allocation2 + $0x30] sm:$0x1] %vm44_vm1, %v3531_v2  ;;  %v3674_v18 = vld [vmem:[%s4761_s3 + $0x10] sm:$0xff]   ;;  %v3017_v20 = vunpack.c.l.bf16 %v3669_v17  ;;  %v3018_v23 = vunpack.c.h.bf16 %v3669_v17  ;;  %v3689_v24 = vld [vmem:[%s4761_s3 + $0x18] sm:$0xff]   ;;  %v3021_v27 = vunpack.c.l.bf16 %v3679_v19 }
  0x15   :  { %52 = vst.msk [vmem:[#allocation2 + $0x40] sm:$0x1] %vm44_vm1, %v3531_v2  ;;  %53 = vst.msk [vmem:[#allocation2 + $0x50] sm:$0x1] %vm44_vm1, %v3531_v2  ;;  %v3081_v21 = vunpack.c.l.bf16 %v3674_v18  ;;  %v3082_v22 = vunpack.c.h.bf16 %v3674_v18  ;;  %v3692_v25 = vstv %s3581_s9  ;;  %v3695_v26 = vstv %s3583_s10  ;;  %v3817_v61 = vld [vmem:[%s4759_s1 + $0x20] sm:$0xff]   ;;  %v3892_v30 = vld [vmem:[%s4759_s1 + $0x28] sm:$0xff]  }
  0x16   :  { %54 = vst.msk [vmem:[#allocation2 + $0x60] sm:$0x1] %vm44_vm1, %v3531_v2  ;;  %55 = vst.msk [vmem:[#allocation2 + $0x70] sm:$0x1] %vm44_vm1, %v3531_v2  ;;  %v3085_v28 = vunpack.c.l.bf16 %v3689_v24  ;;  %v3700_v29 = vstv %s3599_s15  ;;  %vm236_vm2 = vcmp.gt.f32.partialorder %v3009_v6, %v3692_v25  ;;  %vm252_vm3 = vcmp.lt.f32.partialorder %v3009_v6, %v3692_v25  ;;  %v3959_v54 = vld [vmem:[%s4759_s1 + $0x30] sm:$0xff]  }
  0x17   :  { %56 = vst.msk [vmem:[#allocation2 + $0x80] sm:$0x1] %vm44_vm1, %v3531_v2  ;;  %57 = vst.msk [vmem:[#allocation2 + $0x90] sm:$0x1] %vm44_vm1, %v3531_v2  ;;  %vm3707_vm4 = vcmp.lt.f32.partialorder %v3010_v7, %v3692_v25  ;;  %v268_v31 = vsel %vm252_vm3, %v3700_v29, %v3692_v25  ;;  %vm507_vm5 = vcmp.gt.f32.partialorder %v3073_v8, %v3692_v25  ;;  %v621_v44 = vld [vmem:[#allocation3] sm:$0xff]  ;;  %v3086_v1 = vunpack.c.h.bf16 %v3689_v24 }
  0x18   :  { %58 = vst.msk [vmem:[#allocation2 + $0xa0] sm:$0x1] %vm44_vm1, %v3531_v2  ;;  %59 = vst.msk [vmem:[#allocation2 + $0xb0] sm:$0x1] %vm44_vm1, %v3531_v2  ;;  %vm508_vm6 = vcmp.gt.f32.partialorder %v3074_v9, %v3692_v25  ;;  %vm523_vm7 = vcmp.lt.f32.partialorder %v3073_v8, %v3692_v25  ;;  %v284_v32 = vsel %vm236_vm2, %v3695_v26, %v268_v31  ;;  %v3025_v18 = vunpack.c.l.bf16 %v3817_v61 }
  0x19   :  { %60 = vst.msk [vmem:[#allocation2 + $0xc0] sm:$0x1] %vm44_vm1, %v3531_v2  ;;  %61 = vst.msk [vmem:[#allocation2 + $0xd0] sm:$0x1] %vm44_vm1, %v3531_v2  ;;  %vm524_vm8 = vcmp.lt.f32.partialorder %v3074_v9, %v3692_v25  ;;  %v539_v33 = vsel %vm523_vm7, %v3700_v29, %v3692_v25  ;;  %vm237_vm9 = vcmp.gt.f32.partialorder %v3010_v7, %v3692_v25 }
  0x1a   :  { %62 = vst.msk [vmem:[#allocation2 + $0xe0] sm:$0x1] %vm44_vm1, %v3531_v2  ;;  %63 = vst.msk [vmem:[#allocation2 + $0xf0] sm:$0x1] %vm44_vm1, %v3531_v2  ;;  %v540_v34 = vsel %vm524_vm8, %v3700_v29, %v3692_v25  ;;  %v555_v35 = vsel %vm507_vm5, %v3695_v26, %v539_v33  ;;  %vm238_vm10 = vcmp.gt.f32.partialorder %v3013_v13, %v3692_v25 }
  0x1b   :  { %64 = vst.msk [vmem:[#allocation2 + $0x100] sm:$0x1] %vm44_vm1, %v3531_v2  ;;  %65 = vst.msk [vmem:[#allocation2 + $0x110] sm:$0x1] %vm44_vm1, %v3531_v2  ;;  %vm254_vm11 = vcmp.lt.f32.partialorder %v3013_v13, %v3692_v25  ;;  %v556_v36 = vsel %vm508_vm6, %v3695_v26, %v540_v34  ;;  %v269_v37 = vsel %vm3707_vm4, %v3700_v29, %v3692_v25 }
  0x1c   :  { %322 = vst.msk [vmem:[#allocation4] sm:$0x1] %vm44_vm1, %v3531_v2  ;;  %323 = vst.msk [vmem:[#allocation4 + $0x10] sm:$0x1] %vm44_vm1, %v3531_v2  ;;  %v270_v38 = vsel %vm254_vm11, %v3700_v29, %v3692_v25  ;;  %vm509_vm12 = vcmp.gt.f32.partialorder %v3077_v14, %v3692_v25  ;;  %v285_v39 = vsel %vm237_vm9, %v3695_v26, %v269_v37 }
  0x1d   :  { %324 = vst.msk [vmem:[#allocation4 + $0x20] sm:$0x1] %vm44_vm1, %v3531_v2  ;;  %325 = vst.msk [vmem:[#allocation4 + $0x30] sm:$0x1] %vm44_vm1, %v3531_v2  ;;  %v286_v40 = vsel %vm238_vm10, %v3695_v26, %v270_v38  ;;  %vm510_vm13 = vcmp.gt.f32.partialorder %v3078_v15, %v3692_v25  ;;  %vm525_vm14 = vcmp.lt.f32.partialorder %v3077_v14, %v3692_v25  ;;  %v3863_v14 = vld [vmem:[%s4762_s4 + $0x10] sm:$0xff]  }
  0x1e   :  { %326 = vst.msk [vmem:[#allocation4 + $0x40] sm:$0x1] %vm44_vm1, %v3531_v2  ;;  %327 = vst.msk [vmem:[#allocation4 + $0x50] sm:$0x1] %vm44_vm1, %v3531_v2  ;;  %vm526_vm15 = vcmp.lt.f32.partialorder %v3078_v15, %v3692_v25  ;;  %v541_v41 = vsel %vm525_vm14, %v3700_v29, %v3692_v25  ;;  %vm240_vm2 = vcmp.gt.f32.partialorder %v3017_v20, %v3692_v25 }
  0x1f   :  { %328 = vst.msk [vmem:[#allocation4 + $0x60] sm:$0x1] %vm44_vm1, %v3531_v2  ;;  %329 = vst.msk [vmem:[#allocation4 + $0x70] sm:$0x1] %vm44_vm1, %v3531_v2  ;;  %v542_v42 = vsel %vm526_vm15, %v3700_v29, %v3692_v25  ;;  %v557_v43 = vsel %vm509_vm12, %v3695_v26, %v541_v41  ;;  %vm255_vm3 = vcmp.lt.f32.partialorder %v3014_v16, %v3692_v25  ;;  %v3029_v41 = vunpack.c.l.bf16 %v3892_v30 }
  0x20   :  { %331 = vst.msk [vmem:[#allocation4 + $0x90] sm:$0x1] %vm44_vm1, %v3531_v2  ;;  %332 = vst.msk [vmem:[#allocation4 + $0xa0] sm:$0x1] %vm44_vm1, %v3531_v2  ;;  %vm256_vm4 = vcmp.lt.f32.partialorder %v3017_v20, %v3692_v25  ;;  %v558_v45 = vsel %vm510_vm13, %v3695_v26, %v542_v42  ;;  %v271_v46 = vsel %vm255_vm3, %v3700_v29, %v3692_v25 }
  0x21   :  { %333 = vst.msk [vmem:[#allocation4 + $0xb0] sm:$0x1] %vm44_vm1, %v3531_v2  ;;  %334 = vst.msk [vmem:[#allocation4 + $0xc0] sm:$0x1] %vm44_vm1, %v3531_v2  ;;  %v272_v47 = vsel %vm256_vm4, %v3700_v29, %v3692_v25  ;;  %vm3770_vm5 = vcmp.gt.f32.partialorder %v3081_v21, %v3692_v25  ;;  %vm3778_vm6 = vcmp.gt.f32.partialorder %v3082_v22, %v3692_v25 }
  0x22   :  { %335 = vst.msk [vmem:[#allocation4 + $0xd0] sm:$0x1] %vm44_vm1, %v3531_v2  ;;  %336 = vst.msk [vmem:[#allocation4 + $0xe0] sm:$0x1] %vm44_vm1, %v3531_v2  ;;  %v288_v50 = vsel %vm240_vm2, %v3695_v26, %v272_v47  ;;  %vm527_vm7 = vcmp.lt.f32.partialorder %v3081_v21, %v3692_v25  ;;  %vm528_vm8 = vcmp.lt.f32.partialorder %v3082_v22, %v3692_v25 }
  0x23   :  { %337 = vst.msk [vmem:[#allocation4 + $0xf0] sm:$0x1] %vm44_vm1, %v3531_v2  ;;  %338 = vst.msk [vmem:[#allocation4 + $0x100] sm:$0x1] %vm44_vm1, %v3531_v2  ;;  %vm239_vm1 = vcmp.gt.f32.partialorder %v3014_v16, %v3692_v25  ;;  %v543_v53 = vsel %vm527_vm7, %v3700_v29, %v3692_v25  ;;  %vm3791_vm9 = vcmp.gt.f32.partialorder %v3018_v23, %v3692_v25  ;;  %v3040_v2 = vld [vmem:[%s4760_s2] sm:$0xff]  }
  0x24   :  { %301 = vst.msk [vmem:[#allocation3 + $0x10] sm:$0xff] %vm42_vm0, %v284_v32  ;;  %571 = vst.msk [vmem:[#allocation5] sm:$0xff] %vm42_vm0, %v555_v35  ;;  %v287_v49 = vsel %vm239_vm1, %v3695_v26, %v271_v46  ;;  %vm3798_vm10 = vcmp.gt.f32.partialorder %v3021_v27, %v3692_v25  ;;  %v544_v58 = vsel %vm528_vm8, %v3700_v29, %v3692_v25  ;;  %v3041_v20 = vunpack.c.l.bf16 %v3040_v2  ;;  %v3117_v35 = vld [vmem:[%s4760_s2 + $0x8] sm:$0xff]  }
  0x25   :  { %572 = vst.msk [vmem:[#allocation5 + $0x10] sm:$0xff] %vm42_vm0, %v556_v36  ;;  %302 = vst.msk [vmem:[#allocation3 + $0x20] sm:$0xff] %vm42_vm0, %v285_v39  ;;  %v559_v59 = vsel %vm3770_vm5, %v3695_v26, %v543_v53  ;;  %vm3810_vm11 = vcmp.lt.f32.partialorder %v3018_v23, %v3692_v25  ;;  %v560_v63 = vsel %vm3778_vm6, %v3695_v26, %v544_v58  ;;  %v3042_v24 = vunpack.c.h.bf16 %v3040_v2  ;;  %v3120_v53 = vld [vmem:[%s4760_s2 + $0x20] sm:$0xff]  }
  0x26   :  { %303 = vst.msk [vmem:[#allocation3 + $0x30] sm:$0xff] %vm42_vm0, %v286_v40  ;;  %573 = vst.msk [vmem:[#allocation5 + $0x20] sm:$0xff] %vm42_vm0, %v557_v43  ;;  %vm258_vm12 = vcmp.lt.f32.partialorder %v3021_v27, %v3692_v25  ;;  %v273_v0 = vsel %vm3810_vm11, %v3700_v29, %v3692_v25  ;;  %vm3844_vm13 = vcmp.gt.f32.partialorder %v3085_v28, %v3692_v25  ;;  %v3886_v27 = vld [vmem:[%s4762_s4 + $0x30] sm:$0xff]   ;;  %v3045_v46 = vunpack.c.l.bf16 %v3117_v35 }
  0x27   :  { %574 = vst.msk [vmem:[#allocation5 + $0x30] sm:$0xff] %vm42_vm0, %v558_v45  ;;  %304 = vst.msk [vmem:[#allocation3 + $0x40] sm:$0xff] %vm42_vm0, %v287_v49  ;;  %v274_v7 = vsel %vm258_vm12, %v3700_v29, %v3692_v25  ;;  %v289_v8 = vsel %vm3791_vm9, %v3695_v26, %v273_v0  ;;  %vm3853_vm14 = vcmp.gt.f32.partialorder %v3086_v1, %v3692_v25  ;;  %v629_v0 = vld [vmem:[#allocation3 + $0x90] sm:$0xff]  ;;  %v4196_v45 = vld [vmem:[%s4758_s0 + $0x18] sm:$0xff]  }
  0x28   :  { %305 = vst.msk [vmem:[#allocation3 + $0x50] sm:$0xff] %vm42_vm0, %v288_v50  ;;  %575 = vst.msk [vmem:[#allocation5 + $0x40] sm:$0xff] %vm42_vm0, %v559_v59  ;;  %v290_v12 = vsel %vm3798_vm10, %v3695_v26, %v274_v7  ;;  %vm529_vm15 = vcmp.lt.f32.partialorder %v3085_v28, %v3692_v25  ;;  %vm3868_vm1 = vcmp.lt.f32.partialorder %v3086_v1, %v3692_v25  ;;  %v3026_v28 = vunpack.c.h.bf16 %v3817_v61  ;;  %v3118_v59 = vld [vmem:[%s4760_s2 + $0x10] sm:$0xff]   ;;  %v3123_v50 = vld [vmem:[%s4760_s2 + $0x38] sm:$0xff]  }
  0x29   :  { %576 = vst.msk [vmem:[#allocation5 + $0x50] sm:$0xff] %vm42_vm0, %v560_v63  ;;  %306 = vst.msk [vmem:[#allocation3 + $0x60] sm:$0xff] %vm42_vm0, %v289_v8  ;;  %v545_v17 = vsel %vm529_vm15, %v3700_v29, %v3692_v25  ;;  %v546_v22 = vsel %vm3868_vm1, %v3700_v29, %v3692_v25  ;;  %vm244_vm2 = vcmp.gt.f32.partialorder %v3025_v18, %v3692_v25  ;;  %v3049_v9 = vunpack.c.l.bf16 %v3118_v59 }
  0x2a   :  { %307 = vst.msk [vmem:[#allocation3 + $0x70] sm:$0xff] %vm42_vm0, %v290_v12  ;;  %v561_v23 = vsel %vm3844_vm13, %v3695_v26, %v545_v17  ;;  %v562_v34 = vsel %vm3853_vm14, %v3695_v26, %v546_v22  ;;  %vm260_vm3 = vcmp.lt.f32.partialorder %v3025_v18, %v3692_v25  ;;  %vm3908_vm4 = vcmp.gt.f32.partialorder %v3041_v20, %v3692_v25  ;;  %v4011_v17 = vld [vmem:[%s4759_s1 + $0x38] sm:$0xff]  }
  0x2b   :  { %v622_v52 = vld [vmem:[#allocation3 + $0x10] sm:$0xff]  ;;  %v1426_v57 = vld [vmem:[#allocation5] sm:$0xff]  ;;  %577 = vst.msk [vmem:[#allocation5 + $0x60] sm:$0xff] %vm42_vm0, %v561_v23  ;;  %578 = vst.msk [vmem:[#allocation5 + $0x70] sm:$0xff] %vm42_vm0, %v562_v34  ;;  %vm3913_vm5 = vcmp.gt.f32.partialorder %v3042_v24, %v3692_v25  ;;  %vm388_vm6 = vcmp.lt.f32.partialorder %v3041_v20, %v3692_v25  ;;  %vm389_vm7 = vcmp.lt.f32.partialorder %v3042_v24, %v3692_v25  ;;  %v3050_v16 = vunpack.c.h.bf16 %v3118_v59 }
  0x2c   :  { %v2887_v56 = vpack.c.bf16 %v622_v52, %v621_v44  ;;  %v1427_v62 = vld [vmem:[#allocation5 + $0x10] sm:$0xff]  ;;  %v623_v5 = vld [vmem:[#allocation3 + $0x20] sm:$0xff]  ;;  %v404_v43 = vsel %vm388_vm6, %v3700_v29, %v3692_v25  ;;  %v405_v44 = vsel %vm389_vm7, %v3700_v29, %v3692_v25  ;;  %vm3931_vm8 = vcmp.gt.f32.partialorder %v3026_v28, %v3692_v25  ;;  %v3119_v18 = vld [vmem:[%s4760_s2 + $0x18] sm:$0xff]  }
  0x2d   :  { %v2919_v3 = vpack.c.bf16 %v1427_v62, %v1426_v57  ;;  %v624_v6 = vld [vmem:[#allocation3 + $0x30] sm:$0xff]  ;;  %v1428_v15 = vld [vmem:[#allocation5 + $0x20] sm:$0xff]  ;;  %v421_v49 = vsel %vm3913_vm5, %v3695_v26, %v405_v44  ;;  %vm3943_vm9 = vcmp.gt.f32.partialorder %v3029_v41, %v3692_v25  ;;  %vm261_vm10 = vcmp.lt.f32.partialorder %v3026_v28, %v3692_v25 }
  0x2e   :  { %3214 = vmatprep.mubr.msk.bf16.mxu1 %vm42_vm0, %v2887_v56  ;;  %v2888_v11 = vpack.c.bf16 %v624_v6, %v623_v5  ;;  %v1429_v21 = vld [vmem:[#allocation5 + $0x30] sm:$0xff]  ;;  %v625_v32 = vld [vmem:[#allocation3 + $0x40] sm:$0xff]  ;;  %437 = vst.msk [vmem:[#allocation4 + $0x11] sm:$0xff] %vm42_vm0, %v421_v49  ;;  %vm262_vm11 = vcmp.lt.f32.partialorder %v3029_v41, %v3692_v25  ;;  %v3046_v52 = vunpack.c.h.bf16 %v3117_v35  ;;  %vm3952_vm12 = vcmp.gt.f32.partialorder %v3045_v46, %v3692_v25 }
  0x2f   :  { %3286 = vmatprep.mubr.msk.bf16.mxu0 %vm42_vm0, %v2919_v3  ;;  %v2920_v31 = vpack.c.bf16 %v1429_v21, %v1428_v15  ;;  %v626_v33 = vld [vmem:[#allocation3 + $0x50] sm:$0xff]  ;;  %v1430_v39 = vld [vmem:[#allocation5 + $0x40] sm:$0xff]  ;;  %v277_v56 = vsel %vm261_vm10, %v3700_v29, %v3692_v25  ;;  %v278_v57 = vsel %vm262_vm11, %v3700_v29, %v3692_v25  ;;  %vm3967_vm13 = vcmp.lt.f32.partialorder %v3045_v46, %v3692_v25 }
  0x30   :  { %3215 = vmatmul.mubr.msk.bf16.vlgmr.msra.gmra.mrb[0].mxu1 %vm42_vm0, %v2888_v11  ;;  %v2889_v36 = vpack.c.bf16 %v626_v33, %v625_v32  ;;  %v1431_v42 = vld [vmem:[#allocation5 + $0x50] sm:$0xff]  ;;  %v627_v48 = vld [vmem:[#allocation3 + $0x60] sm:$0xff]  ;;  %v293_v61 = vsel %vm3931_vm8, %v3695_v26, %v277_v56  ;;  %v294_v62 = vsel %vm3943_vm9, %v3695_v26, %v278_v57  ;;  %vm375_vm14 = vcmp.gt.f32.partialorder %v3046_v52, %v3692_v25 }
  0x31   :  { %3231 = vmatpush3.bf16.msra.mxu1 %v3597_v4  ;;  %v276_v4 = vsel %vm260_vm3, %v3700_v29, %v3692_v25  ;;  %3287 = vmatmul.mubr.msk.bf16.vlgmr.msra.gmra.mrb[0].mxu0 %vm42_vm0, %v2920_v31  ;;  %v2921_v47 = vpack.c.bf16 %v1431_v42, %v1430_v39  ;;  %v628_v51 = vld [vmem:[#allocation3 + $0x70] sm:$0xff]  ;;  %vm391_vm15 = vcmp.lt.f32.partialorder %v3046_v52, %v3692_v25  ;;  %v3030_v3 = vunpack.c.h.bf16 %v3892_v30  ;;  %v2976_v24 = vld [vmem:[%s4758_s0] sm:$0xff]  }
  0x32   :  { %3248 = vmatprep.subr.bf16.mxu1 %v3863_v14  ;;  %v292_v40 = vsel %vm244_vm2, %v3695_v26, %v276_v4  ;;  %3303 = vmatpush3.bf16.msra.mxu0 %v3614_v10  ;;  %v420_v10 = vsel %vm3908_vm4, %v3695_v26, %v404_v43  ;;  %v2890_v55 = vpack.c.bf16 %v628_v51, %v627_v48  ;;  %v1432_v60 = vld [vmem:[#allocation5 + $0x60] sm:$0xff]  ;;  %v1433_v63 = vld [vmem:[#allocation5 + $0x70] sm:$0xff]  ;;  %v3033_v5 = vunpack.c.l.bf16 %v3959_v54 }
  0x33   :  { %3218 = vmatprep.mubr.msk.bf16.mxu1 %vm42_vm0, %v2889_v36  ;;  %309 = vst.msk [vmem:[#allocation3 + $0xa0] sm:$0xff] %vm42_vm0, %v292_v40  ;;  %3320 = vmatprep.subr.bf16.mxu0 %v3886_v27  ;;  %436 = vst.msk [vmem:[#allocation4 + $0x1] sm:$0xff] %vm42_vm0, %v420_v10  ;;  %v406_v1 = vsel %vm3967_vm13, %v3700_v29, %v3692_v25  ;;  %v407_v2 = vsel %vm391_vm15, %v3700_v29, %v3692_v25  ;;  %v3034_v33 = vunpack.c.h.bf16 %v3959_v54  ;;  %v4069_v10 = vld [vmem:[%s4762_s4 + $0x38] sm:$0xff]   ;;  %v4086_v54 = vld [vmem:[%s4758_s0 + $0x8] sm:$0xff]  }
  0x34   :  { %3290 = vmatprep.mubr.msk.bf16.mxu0 %vm42_vm0, %v2921_v47  ;;  %310 = vst.msk [vmem:[#allocation3 + $0xb0] sm:$0xff] %vm42_vm0, %v293_v61  ;;  %311 = vst.msk [vmem:[#allocation3 + $0xc0] sm:$0xff] %vm42_vm0, %v294_v62  ;;  %v2922_v6 = vpack.c.bf16 %v1433_v63, %v1432_v60  ;;  %v422_v7 = vsel %vm3952_vm12, %v3695_v26, %v406_v1  ;;  %v423_v8 = vsel %vm375_vm14, %v3695_v26, %v407_v2  ;;  %v3121_v61 = vld [vmem:[%s4760_s2 + $0x28] sm:$0xff]  }
  0x35   :  { %438 = vst.msk [vmem:[#allocation4 + $0x21] sm:$0xff] %vm42_vm0, %v422_v7  ;;  %439 = vst.msk [vmem:[#allocation4 + $0x31] sm:$0xff] %vm42_vm0, %v423_v8  ;;  %vm247_vm1 = vcmp.gt.f32.partialorder %v3030_v3, %v3692_v25  ;;  %vm248_vm2 = vcmp.gt.f32.partialorder %v3033_v5, %v3692_v25  ;;  %vm263_vm3 = vcmp.lt.f32.partialorder %v3030_v3, %v3692_v25  ;;  %v1645_v21 = vld [vmem:[#allocation4 + $0x11] sm:$0xff]  ;;  %v3037_v34 = vunpack.c.l.bf16 %v4011_v17 }
  0x36   :  { %vm264_vm4 = vcmp.lt.f32.partialorder %v3033_v5, %v3692_v25  ;;  %v279_v13 = vsel %vm263_vm3, %v3700_v29, %v3692_v25  ;;  %vm376_vm5 = vcmp.gt.f32.partialorder %v3049_v9, %v3692_v25  ;;  %vm392_vm6 = vcmp.lt.f32.partialorder %v3049_v9, %v3692_v25 }
  0x37   :  { %v280_v15 = vsel %vm264_vm4, %v3700_v29, %v3692_v25  ;;  %v295_v22 = vsel %vm247_vm1, %v3695_v26, %v279_v13  ;;  %vm377_vm7 = vcmp.gt.f32.partialorder %v3050_v16, %v3692_v25  ;;  %vm393_vm8 = vcmp.lt.f32.partialorder %v3050_v16, %v3692_v25 }
  0x38   :  { %3219 = vmatmul.mubr.msk.bf16.gmra.mrb[4].mxu1 %vm42_vm0, %v2890_v55  ;;  %v296_v23 = vsel %vm248_vm2, %v3695_v26, %v280_v15  ;;  %312 = vst.msk [vmem:[#allocation3 + $0xd0] sm:$0xff] %vm42_vm0, %v295_v22  ;;  %v408_v30 = vsel %vm392_vm6, %v3700_v29, %v3692_v25  ;;  %v409_v31 = vsel %vm393_vm8, %v3700_v29, %v3692_v25  ;;  %v3053_v37 = vunpack.c.l.bf16 %v3119_v18 }
  0x39   :  { %3291 = vmatmul.mubr.msk.bf16.gmra.mrb[4].mxu0 %vm42_vm0, %v2922_v6  ;;  %313 = vst.msk [vmem:[#allocation3 + $0xe0] sm:$0xff] %vm42_vm0, %v296_v23  ;;  %v424_v32 = vsel %vm376_vm5, %v3695_v26, %v408_v30  ;;  %v425_v4 = vsel %vm377_vm7, %v3695_v26, %v409_v31  ;;  %v3054_v38 = vunpack.c.h.bf16 %v3119_v18  ;;  %v2977_v39 = vunpack.c.l.bf16 %v2976_v24 }
  0x3a   :  { %v630_v11 = vld [vmem:[#allocation3 + $0xa0] sm:$0xff]  ;;  %440 = vst.msk [vmem:[#allocation4 + $0x41] sm:$0xff] %vm42_vm0, %v424_v32  ;;  %441 = vst.msk [vmem:[#allocation4 + $0x51] sm:$0xff] %vm42_vm0, %v425_v4  ;;  %vm249_vm9 = vcmp.gt.f32.partialorder %v3034_v33, %v3692_v25  ;;  %vm250_vm10 = vcmp.gt.f32.partialorder %v3037_v34, %v3692_v25  ;;  %vm265_vm11 = vcmp.lt.f32.partialorder %v3034_v33, %v3692_v25  ;;  %v2978_v52 = vunpack.c.h.bf16 %v2976_v24 }
  0x3b   :  { %v2891_v12 = vpack.c.bf16 %v630_v11, %v629_v0  ;;  %v1644_v20 = vld [vmem:[#allocation4 + $0x1] sm:$0xff]  ;;  %v4036_v35 = vld [vmem:[#allocation3 + $0xb0] sm:$0xff]  ;;  %vm266_vm12 = vcmp.lt.f32.partialorder %v3037_v34, %v3692_v25  ;;  %v281_v43 = vsel %vm265_vm11, %v3700_v29, %v3692_v25  ;;  %vm4052_vm13 = vcmp.gt.f32.partialorder %v3053_v37, %v3692_v25 }
  0x3c   :  { %v2927_v28 = vpack.c.bf16 %v1645_v21, %v1644_v20  ;;  %v4038_v36 = vld [vmem:[#allocation3 + $0xc0] sm:$0xff]  ;;  %v1647_v42 = vld [vmem:[#allocation4 + $0x31] sm:$0xff]  ;;  %vm4057_vm14 = vcmp.gt.f32.partialorder %v3054_v38, %v3692_v25  ;;  %v282_v47 = vsel %vm266_vm12, %v3700_v29, %v3692_v25  ;;  %v297_v48 = vsel %vm249_vm9, %v3695_v26, %v281_v43 }
  0x3d   :  { %3222 = vmatprep.mubr.msk.bf16.mxu1 %vm42_vm0, %v2891_v12  ;;  %v2892_v40 = vpack.c.bf16 %v4038_v36, %v4036_v35  ;;  %v1646_v41 = vld [vmem:[#allocation4 + $0x21] sm:$0xff]  ;;  %vm394_vm15 = vcmp.lt.f32.partialorder %v3053_v37, %v3692_v25  ;;  %v298_v49 = vsel %vm250_vm10, %v3695_v26, %v282_v47  ;;  %314 = vst.msk [vmem:[#allocation3 + $0xf0] sm:$0xff] %vm42_vm0, %v297_v48  ;;  %v3057_v2 = vunpack.c.l.bf16 %v3120_v53  ;;  %v4158_v21 = vld [vmem:[%s4758_s0 + $0x10] sm:$0xff]  }
  0x3e   :  { %3304 = vmatprep.mubr.msk.bf16.mxu0 %vm42_vm0, %v2927_v28  ;;  %v2928_v46 = vpack.c.bf16 %v1647_v42, %v1646_v41  ;;  %vm4074_vm1 = vcmp.lt.f32.partialorder %v3054_v38, %v3692_v25  ;;  %v410_v51 = vsel %vm394_vm15, %v3700_v29, %v3692_v25  ;;  %315 = vst.msk [vmem:[#allocation3 + $0x100] sm:$0xff] %vm42_vm0, %v298_v49  ;;  %v3058_v3 = vunpack.c.h.bf16 %v3120_v53  ;;  %v3122_v28 = vld [vmem:[%s4760_s2 + $0x30] sm:$0xff]   ;;  %v587_v34 = vld [vmem:[#allocation2] sm:$0xff] }
  0x3f   :  { %v4089_v55 = vld [vmem:[#allocation3 + $0xd0] sm:$0xff]  ;;  %v411_v57 = vsel %vm4074_vm1, %v3700_v29, %v3692_v25  ;;  %v426_v58 = vsel %vm4052_vm13, %v3695_v26, %v410_v51  ;;  %vm4102_vm2 = vcmp.gt.f32.partialorder %v2977_v39, %v3692_v25  ;;  %vm4107_vm3 = vcmp.lt.f32.partialorder %v2977_v39, %v3692_v25 }
  0x40   :  { %3223 = vmatmul.mubr.msk.bf16.gmra.mrb[8].mxu1 %vm42_vm0, %v2892_v40  ;;  %v4091_v56 = vld [vmem:[#allocation3 + $0xe0] sm:$0xff]  ;;  %v427_v63 = vsel %vm4057_vm14, %v3695_v26, %v411_v57  ;;  %442 = vst.msk [vmem:[#allocation4 + $0x61] sm:$0xff] %vm42_vm0, %v426_v58  ;;  %vm100_vm4 = vcmp.gt.f32.partialorder %v2978_v52, %v3692_v25  ;;  %vm116_vm5 = vcmp.lt.f32.partialorder %v2978_v52, %v3692_v25  ;;  %v2981_v7 = vunpack.c.l.bf16 %v4086_v54 }
  0x41   :  { %3305 = vmatmul.mubr.msk.bf16.vlgmr.msra.gmra.mrb[0].mxu0 %vm42_vm0, %v2928_v46  ;;  %v2893_v62 = vpack.c.bf16 %v4091_v56, %v4089_v55  ;;  %v1648_v0 = vld [vmem:[#allocation4 + $0x41] sm:$0xff]  ;;  %443 = vst.msk [vmem:[#allocation4 + $0x71] sm:$0xff] %vm42_vm0, %v427_v63  ;;  %v133_v1 = vsel %vm116_vm5, %v3700_v29, %v3692_v25  ;;  %v1649_v5 = vld [vmem:[#allocation4 + $0x51] sm:$0xff]  ;;  %v3061_v9 = vunpack.c.l.bf16 %v3121_v61  ;;  %vm380_vm6 = vcmp.gt.f32.partialorder %v3057_v2, %v3692_v25 }
  0x42   :  { %3321 = vmatpush3.bf16.msra.mxu0 %v3886_v27  ;;  %v132_v27 = vsel %vm4107_vm3, %v3700_v29, %v3692_v25  ;;  %v150_v8 = vsel %vm100_vm4, %v3695_v26, %v133_v1  ;;  %v2929_v11 = vpack.c.bf16 %v1649_v5, %v1648_v0  ;;  %vm381_vm7 = vcmp.gt.f32.partialorder %v3058_v3, %v3692_v25 }
  0x43   :  { %3338 = vmatprep.subr.bf16.mxu0 %v4069_v10  ;;  %3226 = vmatprep.mubr.msk.bf16.mxu1 %vm42_vm0, %v2893_v62  ;;  %v149_v6 = vsel %vm4102_vm2, %v3695_v26, %v132_v27  ;;  %vm396_vm8 = vcmp.lt.f32.partialorder %v3057_v2, %v3692_v25  ;;  %167 = vst.msk [vmem:[#allocation2 + $0x21] sm:$0xff] %vm42_vm0, %v150_v8  ;;  %v3062_v20 = vunpack.c.h.bf16 %v3121_v61  ;;  %v2982_v38 = vunpack.c.h.bf16 %v4086_v54  ;;  %v3106_v2 = vld [vmem:[%s4758_s0 + $0x20] sm:$0xff]   ;;  %v4254_v8 = vld [vmem:[%s4762_s4 + $0x18] sm:$0xff]  }
  0x44   :  { %166 = vst.msk [vmem:[#allocation2 + $0x11] sm:$0xff] %vm42_vm0, %v149_v6  ;;  %vm397_vm9 = vcmp.lt.f32.partialorder %v3058_v3, %v3692_v25  ;;  %v412_v12 = vsel %vm396_vm8, %v3700_v29, %v3692_v25  ;;  %vm101_vm10 = vcmp.gt.f32.partialorder %v2981_v7, %v3692_v25  ;;  %vm117_vm11 = vcmp.lt.f32.partialorder %v2981_v7, %v3692_v25  ;;  %v4148_v13 = vld [vmem:[#allocation3 + $0xf0] sm:$0xff] }
  0x45   :  { %3308 = vmatprep.mubr.msk.bf16.mxu0 %vm42_vm0, %v2929_v11  ;;  %v413_v15 = vsel %vm397_vm9, %v3700_v29, %v3692_v25  ;;  %v428_v16 = vsel %vm380_vm6, %v3695_v26, %v412_v12  ;;  %v134_v18 = vsel %vm117_vm11, %v3700_v29, %v3692_v25  ;;  %v4160_v22 = vld [vmem:[#allocation3 + $0x100] sm:$0xff]  ;;  %vm382_vm12 = vcmp.gt.f32.partialorder %v3061_v9, %v3692_v25 }
  0x46   :  { %v429_v23 = vsel %vm381_vm7, %v3695_v26, %v413_v15  ;;  %444 = vst.msk [vmem:[#allocation4 + $0x91] sm:$0xff] %vm42_vm0, %v428_v16  ;;  %v151_v24 = vsel %vm101_vm10, %v3695_v26, %v134_v18  ;;  %vm398_vm13 = vcmp.lt.f32.partialorder %v3061_v9, %v3692_v25  ;;  %v2894_v30 = vpack.c.bf16 %v4160_v22, %v4148_v13 }
  0x47   :  { %v1650_v31 = vld [vmem:[#allocation4 + $0x61] sm:$0xff]  ;;  %445 = vst.msk [vmem:[#allocation4 + $0xa1] sm:$0xff] %vm42_vm0, %v429_v23  ;;  %168 = vst.msk [vmem:[#allocation2 + $0x31] sm:$0xff] %vm42_vm0, %v151_v24  ;;  %vm383_vm14 = vcmp.gt.f32.partialorder %v3062_v20, %v3692_v25  ;;  %vm399_vm15 = vcmp.lt.f32.partialorder %v3062_v20, %v3692_v25  ;;  %v414_v32 = vsel %vm398_vm13, %v3700_v29, %v3692_v25  ;;  %v2985_v39 = vunpack.c.l.bf16 %v4158_v21 }
  0x48   :  { %v1651_v33 = vld [vmem:[#allocation4 + $0x71] sm:$0xff]  ;;  %v415_v4 = vsel %vm399_vm15, %v3700_v29, %v3692_v25  ;;  %v430_v37 = vsel %vm382_vm12, %v3695_v26, %v414_v32  ;;  %3227 = vmatmul.mubr.msk.bf16.gmra.mrb[12].mxu1 %vm42_vm0, %v2894_v30  ;;  %v3065_v42 = vunpack.c.l.bf16 %v3122_v28  ;;  %v3066_v43 = vunpack.c.h.bf16 %v3122_v28  ;;  %v3107_v30 = vld [vmem:[%s4758_s0 + $0x28] sm:$0xff]  }
  0x49   :  { %v2930_v40 = vpack.c.bf16 %v1651_v33, %v1650_v31  ;;  %v431_v41 = vsel %vm383_vm14, %v3695_v26, %v415_v4  ;;  %446 = vst.msk [vmem:[#allocation4 + $0xb1] sm:$0xff] %vm42_vm0, %v430_v37  ;;  %vm102_vm1 = vcmp.gt.f32.partialorder %v2982_v38, %v3692_v25  ;;  %vm103_vm2 = vcmp.gt.f32.partialorder %v2985_v39, %v3692_v25  ;;  %v3108_v31 = vld [vmem:[%s4758_s0 + $0x30] sm:$0xff]  }
  0x4a   :  { %447 = vst.msk [vmem:[#allocation4 + $0xc1] sm:$0xff] %vm42_vm0, %v431_v41  ;;  %vm118_vm3 = vcmp.lt.f32.partialorder %v2982_v38, %v3692_v25  ;;  %vm119_vm4 = vcmp.lt.f32.partialorder %v2985_v39, %v3692_v25  ;;  %vm4205_vm5 = vcmp.gt.f32.partialorder %v3065_v42, %v3692_v25  ;;  %v4212_v51 = vld [vmem:[#allocation2 + $0x20] sm:$0xff]  ;;  %vm4217_vm6 = vcmp.gt.f32.partialorder %v3066_v43, %v3692_v25  ;;  %v4317_v38 = vld [vmem:[%s4758_s0 + $0x38] sm:$0xff]  }
  0x4b   :  { %v4186_v44 = vld [vmem:[#allocation2 + $0x10] sm:$0xff]  ;;  %3309 = vmatmul.mubr.msk.bf16.gmra.mrb[4].mxu0 %vm42_vm0, %v2930_v40  ;;  %v135_v47 = vsel %vm118_vm3, %v3700_v29, %v3692_v25  ;;  %v136_v48 = vsel %vm119_vm4, %v3700_v29, %v3692_v25  ;;  %vm400_vm7 = vcmp.lt.f32.partialorder %v3065_v42, %v3692_v25  ;;  %vm401_vm8 = vcmp.lt.f32.partialorder %v3066_v43, %v3692_v25 }
  0x4c   :  { %v2895_v46 = vpack.c.bf16 %v4186_v44, %v587_v34  ;;  %v152_v52 = vsel %vm102_vm1, %v3695_v26, %v135_v47  ;;  %v153_v53 = vsel %vm103_vm2, %v3695_v26, %v136_v48  ;;  %v416_v58 = vsel %vm400_vm7, %v3700_v29, %v3692_v25 }
  0x4d   :  { %v1652_v57 = vld [vmem:[#allocation4 + $0x91] sm:$0xff]  ;;  %169 = vst.msk [vmem:[#allocation2 + $0x41] sm:$0xff] %vm42_vm0, %v152_v52  ;;  %170 = vst.msk [vmem:[#allocation2 + $0x51] sm:$0xff] %vm42_vm0, %v153_v53  ;;  %v2986_v59 = vunpack.c.h.bf16 %v4158_v21  ;;  %v2989_v60 = vunpack.c.l.bf16 %v4196_v45  ;;  %v417_v63 = vsel %vm401_vm8, %v3700_v29, %v3692_v25  ;;  %v432_v0 = vsel %vm4205_vm5, %v3695_v26, %v416_v58 }
  0x4e   :  { %3232 = vmatprep.mubr.msk.bf16.mxu1 %vm42_vm0, %v2895_v46  ;;  %v1653_v61 = vld [vmem:[#allocation4 + $0xa1] sm:$0xff]  ;;  %v4230_v62 = vld [vmem:[#allocation2 + $0x30] sm:$0xff]  ;;  %v3069_v27 = vunpack.c.l.bf16 %v3123_v50  ;;  %v3070_v1 = vunpack.c.h.bf16 %v3123_v50  ;;  %v433_v6 = vsel %vm4217_vm6, %v3695_v26, %v417_v63  ;;  %448 = vst.msk [vmem:[#allocation4 + $0xd1] sm:$0xff] %vm42_vm0, %v432_v0  ;;  %v2993_v20 = vunpack.c.l.bf16 %v3106_v2 }
  0x4f   :  { %v2931_v3 = vpack.c.bf16 %v1653_v61, %v1652_v57  ;;  %v2896_v5 = vpack.c.bf16 %v4230_v62, %v4212_v51  ;;  %vm4247_vm9 = vcmp.gt.f32.partialorder %v2986_v59, %v3692_v25  ;;  %449 = vst.msk [vmem:[#allocation4 + $0xe1] sm:$0xff] %vm42_vm0, %v433_v6  ;;  %vm105_vm10 = vcmp.gt.f32.partialorder %v2989_v60, %v3692_v25 }
  0x50   :  { %v1654_v9 = vld [vmem:[#allocation4 + $0xb1] sm:$0xff]  ;;  %vm120_vm11 = vcmp.lt.f32.partialorder %v2986_v59, %v3692_v25  ;;  %vm121_vm12 = vcmp.lt.f32.partialorder %v2989_v60, %v3692_v25  ;;  %vm4261_vm13 = vcmp.gt.f32.partialorder %v3069_v27, %v3692_v25  ;;  %vm4272_vm14 = vcmp.gt.f32.partialorder %v3070_v1, %v3692_v25  ;;  %v4473_v60 = vld [vmem:[#allocation2 + $0x21] sm:$0xff] }
  0x51   :  { %3312 = vmatprep.mubr.msk.bf16.mxu0 %vm42_vm0, %v2931_v3  ;;  %3233 = vmatmul.mubr.msk.bf16.vlgmr.msra.gmra.mrb[0].mxu1 %vm42_vm0, %v2896_v5  ;;  %v1655_v12 = vld [vmem:[#allocation4 + $0xc1] sm:$0xff]  ;;  %v137_v15 = vsel %vm120_vm11, %v3700_v29, %v3692_v25  ;;  %v138_v16 = vsel %vm121_vm12, %v3700_v29, %v3692_v25  ;;  %vm402_vm15 = vcmp.lt.f32.partialorder %v3069_v27, %v3692_v25  ;;  %v2994_v42 = vunpack.c.h.bf16 %v3106_v2 }
  0x52   :  { %3249 = vmatpush3.bf16.msra.mxu1 %v3863_v14  ;;  %v2932_v21 = vpack.c.bf16 %v1655_v12, %v1654_v9  ;;  %v154_v23 = vsel %vm4247_vm9, %v3695_v26, %v137_v15  ;;  %v155_v24 = vsel %vm105_vm10, %v3695_v26, %v138_v16  ;;  %vm4285_vm1 = vcmp.lt.f32.partialorder %v3070_v1, %v3692_v25  ;;  %v595_v1 = vld [vmem:[#allocation2 + $0x90] sm:$0xff] }
  0x53   :  { %171 = vst.msk [vmem:[#allocation2 + $0x61] sm:$0xff] %vm42_vm0, %v154_v23  ;;  %172 = vst.msk [vmem:[#allocation2 + $0x71] sm:$0xff] %vm42_vm0, %v155_v24  ;;  %v418_v14 = vsel %vm402_vm15, %v3700_v29, %v3692_v25  ;;  %vm107_vm2 = vcmp.gt.f32.partialorder %v2993_v20, %v3692_v25  ;;  %vm123_vm3 = vcmp.lt.f32.partialorder %v2993_v20, %v3692_v25  ;;  %3266 = vmatprep.subr.bf16.mxu1 %v4254_v8 }
  0x54   :  { %3313 = vmatmul.mubr.msk.bf16.gmra.mrb[8].mxu0 %vm42_vm0, %v2932_v21  ;;  %v4301_v32 = vld [vmem:[#allocation2 + $0x40] sm:$0xff]  ;;  %v4303_v33 = vld [vmem:[#allocation2 + $0x50] sm:$0xff]  ;;  %v419_v34 = vsel %vm4285_vm1, %v3700_v29, %v3692_v25  ;;  %v434_v4 = vsel %vm4261_vm13, %v3695_v26, %v418_v14  ;;  %v140_v37 = vsel %vm123_vm3, %v3700_v29, %v3692_v25  ;;  %v2997_v46 = vunpack.c.l.bf16 %v3107_v30 }
  0x55   :  { %v2897_v39 = vpack.c.bf16 %v4303_v33, %v4301_v32  ;;  %v435_v40 = vsel %vm4272_vm14, %v3695_v26, %v419_v34  ;;  %450 = vst.msk [vmem:[#allocation4 + $0xf1] sm:$0xff] %vm42_vm0, %v434_v4  ;;  %v157_v41 = vsel %vm107_vm2, %v3695_v26, %v140_v37  ;;  %v1656_v43 = vld [vmem:[#allocation4 + $0xd1] sm:$0xff]  ;;  %v2998_v47 = vunpack.c.h.bf16 %v3107_v30 }
  0x56   :  { %451 = vst.msk [vmem:[#allocation4 + $0x101] sm:$0xff] %vm42_vm0, %v435_v40  ;;  %174 = vst.msk [vmem:[#allocation2 + $0xa1] sm:$0xff] %vm42_vm0, %v157_v41  ;;  %v3001_v48 = vunpack.c.l.bf16 %v3108_v31  ;;  %v1657_v49 = vld [vmem:[#allocation4 + $0xe1] sm:$0xff]  ;;  %vm108_vm4 = vcmp.gt.f32.partialorder %v2994_v42, %v3692_v25  ;;  %vm124_vm5 = vcmp.lt.f32.partialorder %v2994_v42, %v3692_v25  ;;  %v3002_v50 = vunpack.c.h.bf16 %v3108_v31 }
  0x57   :  { %3236 = vmatprep.mubr.msk.bf16.mxu1 %vm42_vm0, %v2897_v39  ;;  %v3005_v52 = vunpack.c.l.bf16 %v4317_v38  ;;  %v2933_v53 = vpack.c.bf16 %v1657_v49, %v1656_v43  ;;  %vm109_vm6 = vcmp.gt.f32.partialorder %v2997_v46, %v3692_v25  ;;  %vm125_vm7 = vcmp.lt.f32.partialorder %v2997_v46, %v3692_v25 }
  0x58   :  { %v141_v54 = vsel %vm124_vm5, %v3700_v29, %v3692_v25  ;;  %v142_v57 = vsel %vm125_vm7, %v3700_v29, %v3692_v25  ;;  %vm4340_vm8 = vcmp.gt.f32.partialorder %v2998_v47, %v3692_v25  ;;  %vm4345_vm9 = vcmp.gt.f32.partialorder %v3001_v48, %v3692_v25 }
  0x59   :  { %v158_v58 = vsel %vm108_vm4, %v3695_v26, %v141_v54  ;;  %3316 = vmatprep.mubr.msk.bf16.mxu0 %vm42_vm0, %v2933_v53  ;;  %v159_v0 = vsel %vm109_vm6, %v3695_v26, %v142_v57  ;;  %vm126_vm10 = vcmp.lt.f32.partialorder %v2998_v47, %v3692_v25  ;;  %vm127_vm11 = vcmp.lt.f32.partialorder %v3001_v48, %v3692_v25  ;;  %v990_v47 = vld [vmem:[#allocation2 + $0x1] sm:$0xff]  ;;  %v4451_v48 = vld [vmem:[#allocation2 + $0x11] sm:$0xff] }
  0x5a   :  { %v4350_v61 = vld [vmem:[#allocation2 + $0x60] sm:$0xff]  ;;  %v4352_v63 = vld [vmem:[#allocation2 + $0x70] sm:$0xff]  ;;  %175 = vst.msk [vmem:[#allocation2 + $0xb1] sm:$0xff] %vm42_vm0, %v158_v58  ;;  %176 = vst.msk [vmem:[#allocation2 + $0xc1] sm:$0xff] %vm42_vm0, %v159_v0  ;;  %v143_v2 = vsel %vm126_vm10, %v3700_v29, %v3692_v25  ;;  %v144_v3 = vsel %vm127_vm11, %v3700_v29, %v3692_v25  ;;  %vm4366_vm12 = vcmp.gt.f32.partialorder %v3002_v50, %v3692_v25  ;;  %v2990_v18 = vunpack.c.h.bf16 %v4196_v45 }
  0x5b   :  { %v2898_v27 = vpack.c.bf16 %v4352_v63, %v4350_v61  ;;  %v160_v7 = vsel %vm4340_vm8, %v3695_v26, %v143_v2  ;;  %v161_v9 = vsel %vm4345_vm9, %v3695_v26, %v144_v3  ;;  %vm113_vm13 = vcmp.gt.f32.partialorder %v3005_v52, %v3692_v25  ;;  %v4485_v2 = vld [vmem:[#allocation2 + $0x51] sm:$0xff] }
  0x5c   :  { %v1658_v6 = vld [vmem:[#allocation4 + $0xf1] sm:$0xff]  ;;  %vm128_vm14 = vcmp.lt.f32.partialorder %v3002_v50, %v3692_v25  ;;  %v2935_v15 = vpack.c.bf16 %v4212_v51, %v4186_v44  ;;  %177 = vst.msk [vmem:[#allocation2 + $0xd1] sm:$0xff] %vm42_vm0, %v160_v7  ;;  %178 = vst.msk [vmem:[#allocation2 + $0xe1] sm:$0xff] %vm42_vm0, %v161_v9  ;;  %vm129_vm15 = vcmp.lt.f32.partialorder %v3005_v52, %v3692_v25  ;;  %v3006_v24 = vunpack.c.h.bf16 %v4317_v38 }
  0x5d   :  { %3237 = vmatmul.mubr.msk.bf16.gmra.mrb[4].mxu1 %vm42_vm0, %v2898_v27  ;;  %v1659_v11 = vld [vmem:[#allocation4 + $0x101] sm:$0xff]  ;;  %v145_v16 = vsel %vm128_vm14, %v3700_v29, %v3692_v25  ;;  %v146_v23 = vsel %vm129_vm15, %v3700_v29, %v3692_v25  ;;  %vm106_vm1 = vcmp.gt.f32.partialorder %v2990_v18, %v3692_v25  ;;  %vm122_vm2 = vcmp.lt.f32.partialorder %v2990_v18, %v3692_v25  ;;  %v3129_v9 = vld [vmem:[%s4761_s3 + $0x30] sm:$0xff]  }
  0x5e   :  { %v4379_v12 = vld [vmem:[#allocation2 + $0xa0] sm:$0xff]  ;;  %v2934_v20 = vpack.c.bf16 %v1659_v11, %v1658_v6  ;;  %v162_v44 = vsel %vm4366_vm12, %v3695_v26, %v145_v16  ;;  %v163_v51 = vsel %vm113_vm13, %v3695_v26, %v146_v23  ;;  %v139_v45 = vsel %vm122_vm2, %v3700_v29, %v3692_v25 }
  0x5f   :  { %v2899_v21 = vpack.c.bf16 %v4379_v12, %v595_v1  ;;  %179 = vst.msk [vmem:[#allocation2 + $0xf1] sm:$0xff] %vm42_vm0, %v162_v44  ;;  %180 = vst.msk [vmem:[#allocation2 + $0x101] sm:$0xff] %vm42_vm0, %v163_v51  ;;  %v156_v14 = vsel %vm106_vm1, %v3695_v26, %v139_v45  ;;  %vm114_vm3 = vcmp.gt.f32.partialorder %v3006_v24, %v3692_v25  ;;  %v3022_v4 = vunpack.c.h.bf16 %v3679_v19 }
  0x60   :  { %3317 = vmatmul.mubr.msk.bf16.gmra.mrb[12].mxu0 %vm42_vm0, %v2934_v20  ;;  %173 = vst.msk [vmem:[#allocation2 + $0x81] sm:$0xff] %vm42_vm0, %v156_v14  ;;  %vm130_vm4 = vcmp.lt.f32.partialorder %v3006_v24, %v3692_v25  ;;  %v2936_v37 = vpack.c.bf16 %v4301_v32, %v4230_v62  ;;  %v2937_v42 = vpack.c.bf16 %v4350_v61, %v4303_v33  ;;  %v4439_v62 = vld [vmem:[%s4762_s4 + $0x40] sm:$0xff]   ;;  %v3038_v52 = vunpack.c.h.bf16 %v4011_v17  ;;  %v3128_v17 = vld [vmem:[%s4761_s3 + $0x28] sm:$0xff]   ;;  %v4475_v61 = vld [vmem:[#allocation2 + $0x31] sm:$0xff] }
  0x61   :  { %3240 = vmatprep.mubr.msk.bf16.mxu1 %vm42_vm0, %v2899_v21  ;;  %3322 = vmatprep.mubr.msk.bf16.mxu0 %vm42_vm0, %v2935_v15  ;;  %v4406_v28 = vld [vmem:[#allocation2 + $0xb0] sm:$0xff]  ;;  %v4409_v30 = vld [vmem:[#allocation2 + $0xc0] sm:$0xff]  ;;  %v147_v34 = vsel %vm130_vm4, %v3700_v29, %v3692_v25  ;;  %vm243_vm5 = vcmp.gt.f32.partialorder %v3022_v4, %v3692_v25  ;;  %vm259_vm6 = vcmp.lt.f32.partialorder %v3022_v4, %v3692_v25  ;;  %v3093_v5 = vunpack.c.l.bf16 %v3128_v17  ;;  %v3130_v15 = vld [vmem:[%s4761_s3 + $0x38] sm:$0xff]  }
  0x62   :  { %v2900_v31 = vpack.c.bf16 %v4409_v30, %v4406_v28  ;;  %v164_v40 = vsel %vm114_vm3, %v3695_v26, %v147_v34  ;;  %v275_v32 = vsel %vm259_vm6, %v3700_v29, %v3692_v25  ;;  %v2948_v43 = vpack.c.bf16 %v4089_v55, %v4038_v36  ;;  %v3127_v33 = vld [vmem:[%s4761_s3 + $0x20] sm:$0xff]   ;;  %v1215_v34 = vld [vmem:[#allocation4 + $0x70] sm:$0xff] }
  0x63   :  { %v4421_v38 = vld [vmem:[#allocation2 + $0xd0] sm:$0xff]  ;;  %v4423_v39 = vld [vmem:[#allocation2 + $0xe0] sm:$0xff]  ;;  %181 = vst.msk [vmem:[#allocation2 + $0x111] sm:$0xff] %vm42_vm0, %v164_v40  ;;  %v291_v49 = vsel %vm243_vm5, %v3695_v26, %v275_v32  ;;  %v2949_v50 = vpack.c.bf16 %v4148_v13, %v4091_v56  ;;  %v3089_v57 = vunpack.c.l.bf16 %v3127_v33  ;;  %v2903_v58 = vpack.c.bf16 %v4451_v48, %v990_v47 }
  0x64   :  { %v2901_v41 = vpack.c.bf16 %v4423_v39, %v4421_v38  ;;  %308 = vst.msk [vmem:[#allocation3 + $0x80] sm:$0xff] %vm42_vm0, %v291_v49  ;;  %vm251_vm7 = vcmp.gt.f32.partialorder %v3038_v52, %v3692_v25  ;;  %vm267_vm8 = vcmp.lt.f32.partialorder %v3038_v52, %v3692_v25  ;;  %v3090_v27 = vunpack.c.h.bf16 %v3127_v33  ;;  %v3515_v32 = vld [vmem:[%s4762_s4 + $0x20] sm:$0xff]   ;;  %v1218_v36 = vld [vmem:[#allocation4 + $0xb0] sm:$0xff] }
  0x65   :  { %3241 = vmatmul.mubr.msk.bf16.gmra.mrb[8].mxu1 %vm42_vm0, %v2900_v31  ;;  %v283_v59 = vsel %vm267_vm8, %v3700_v29, %v3692_v25  ;;  %vm515_vm9 = vcmp.gt.f32.partialorder %v3089_v57, %v3692_v25  ;;  %vm531_vm10 = vcmp.lt.f32.partialorder %v3089_v57, %v3692_v25  ;;  %v2939_v1 = vpack.c.bf16 %v4406_v28, %v4379_v12  ;;  %v1219_v55 = vld [vmem:[#allocation4 + $0xc0] sm:$0xff] }
  0x66   :  { %v4434_v19 = vld [vmem:[#allocation2 + $0xf0] sm:$0xff]  ;;  %3244 = vmatprep.mubr.msk.bf16.mxu1 %vm42_vm0, %v2901_v41  ;;  %v4449_v46 = vld [vmem:[#allocation2 + $0x100] sm:$0xff]  ;;  %v299_v0 = vsel %vm251_vm7, %v3695_v26, %v283_v59  ;;  %v547_v3 = vsel %vm531_vm10, %v3700_v29, %v3692_v25  ;;  %vm516_vm11 = vcmp.gt.f32.partialorder %v3090_v27, %v3692_v25  ;;  %vm532_vm12 = vcmp.lt.f32.partialorder %v3090_v27, %v3692_v25 }
  0x67   :  { %v2902_v53 = vpack.c.bf16 %v4449_v46, %v4434_v19  ;;  %v1869_v54 = vld [vmem:[#allocation2 + $0x80] sm:$0xff]  ;;  %316 = vst.msk [vmem:[#allocation3 + $0x110] sm:$0xff] %vm42_vm0, %v299_v0  ;;  %v563_v6 = vsel %vm515_vm9, %v3695_v26, %v547_v3  ;;  %v3094_v7 = vunpack.c.h.bf16 %v3128_v17  ;;  %v2904_v11 = vpack.c.bf16 %v4475_v61, %v4473_v60  ;;  %v2082_v0 = vld [vmem:[#allocation3 + $0x30] sm:$0xff] }
  0x68   :  { %3323 = vmatmul.mubr.msk.bf16.vlgmr.msra.gmra.mrb[0].mxu0 %vm42_vm0, %v2936_v37  ;;  %v548_v12 = vsel %vm532_vm12, %v3700_v29, %v3692_v25  ;;  %579 = vst.msk [vmem:[#allocation5 + $0x90] sm:$0xff] %vm42_vm0, %v563_v6  ;;  %vm517_vm13 = vcmp.gt.f32.partialorder %v3093_v5, %v3692_v25  ;;  %vm533_vm14 = vcmp.lt.f32.partialorder %v3093_v5, %v3692_v25  ;;  %v3097_v23 = vunpack.c.l.bf16 %v3129_v9  ;;  %v4550_v41 = vld [vmem:[#allocation2 + $0x61] sm:$0xff]  ;;  %v2084_v3 = vld [vmem:[#allocation3 + $0x50] sm:$0xff] }
  0x69   :  { %3339 = vmatpush3.bf16.msra.mxu0 %v4069_v10  ;;  %3326 = vmatprep.mubr.msk.bf16.mxu0 %vm42_vm0, %v2937_v42  ;;  %v2938_v10 = vpack.c.bf16 %v1869_v54, %v4352_v63  ;;  %v4483_v63 = vld [vmem:[#allocation2 + $0x41] sm:$0xff]  ;;  %v564_v18 = vsel %vm516_vm11, %v3695_v26, %v548_v12  ;;  %vm518_vm15 = vcmp.gt.f32.partialorder %v3094_v7, %v3692_v25  ;;  %v3098_v44 = vunpack.c.h.bf16 %v3129_v9  ;;  %v4552_v42 = vld [vmem:[#allocation2 + $0x71] sm:$0xff] }
  0x6a   :  { %3356 = vmatprep.subr.bf16.mxu0 %v4439_v62  ;;  %v2905_v16 = vpack.c.bf16 %v4485_v2, %v4483_v63  ;;  %vm534_vm1 = vcmp.lt.f32.partialorder %v3094_v7, %v3692_v25  ;;  %580 = vst.msk [vmem:[#allocation5 + $0xa0] sm:$0xff] %vm42_vm0, %v564_v18  ;;  %v549_v20 = vsel %vm533_vm14, %v3700_v29, %v3692_v25  ;;  %v3101_v28 = vunpack.c.l.bf16 %v3130_v15  ;;  %v2081_v54 = vld [vmem:[#allocation3 + $0x20] sm:$0xff]  ;;  %v4599_v9 = vld [vmem:[#allocation2 + $0xf1] sm:$0xff] }
  0x6b   :  { %v550_v21 = vsel %vm534_vm1, %v3700_v29, %v3692_v25  ;;  %v2940_v51 = vpack.c.bf16 %v4421_v38, %v4409_v30  ;;  %v565_v45 = vsel %vm517_vm13, %v3695_v26, %v549_v20  ;;  %vm519_vm2 = vcmp.gt.f32.partialorder %v3097_v23, %v3692_v25  ;;  %v4585_v17 = vld [vmem:[#allocation2 + $0xc1] sm:$0xff]  ;;  %v2086_v18 = vld [vmem:[#allocation3 + $0x70] sm:$0xff] }
  0x6c   :  { %v566_v24 = vsel %vm518_vm15, %v3695_v26, %v550_v21  ;;  %581 = vst.msk [vmem:[#allocation5 + $0xb0] sm:$0xff] %vm42_vm0, %v565_v45  ;;  %vm520_vm3 = vcmp.gt.f32.partialorder %v3098_v44, %v3692_v25  ;;  %vm535_vm4 = vcmp.lt.f32.partialorder %v3097_v23, %v3692_v25  ;;  %vm536_vm5 = vcmp.lt.f32.partialorder %v3098_v44, %v3692_v25  ;;  %v4589_v59 = vld [vmem:[#allocation2 + $0xe1] sm:$0xff] }
  0x6d   :  { %3245 = vmatmul.mubr.msk.bf16.gmra.mrb[12].mxu1 %vm42_vm0, %v2902_v53  ;;  %582 = vst.msk [vmem:[#allocation5 + $0xc0] sm:$0xff] %vm42_vm0, %v566_v24  ;;  %v551_v14 = vsel %vm535_vm4, %v3700_v29, %v3692_v25  ;;  %v552_v30 = vsel %vm536_vm5, %v3700_v29, %v3692_v25  ;;  %v3102_v31 = vunpack.c.h.bf16 %v3130_v15  ;;  %vm4534_vm6 = vcmp.gt.f32.partialorder %v3101_v28, %v3692_v25  ;;  %v1877_v53 = vld [vmem:[#allocation2 + $0x110] sm:$0xff]  ;;  %v2083_v27 = vld [vmem:[#allocation3 + $0x40] sm:$0xff] }
  0x6e   :  { %3250 = vmatprep.mubr.msk.bf16.mxu1 %vm42_vm0, %v2903_v58  ;;  %v2941_v4 = vpack.c.bf16 %v4434_v19, %v4423_v39  ;;  %v567_v37 = vsel %vm519_vm2, %v3695_v26, %v551_v14  ;;  %v568_v38 = vsel %vm520_vm3, %v3695_v26, %v552_v30  ;;  %vm4544_vm7 = vcmp.lt.f32.partialorder %v3101_v28, %v3692_v25  ;;  %v4562_v19 = vld [vmem:[#allocation2 + $0xa1] sm:$0xff]  ;;  %v1209_v15 = vld [vmem:[#allocation4 + $0x10] sm:$0xff] }
  0x6f   :  { %583 = vst.msk [vmem:[#allocation5 + $0xd0] sm:$0xff] %vm42_vm0, %v567_v37  ;;  %584 = vst.msk [vmem:[#allocation5 + $0xe0] sm:$0xff] %vm42_vm0, %v568_v38  ;;  %vm522_vm8 = vcmp.gt.f32.partialorder %v3102_v31, %v3692_v25  ;;  %vm538_vm9 = vcmp.lt.f32.partialorder %v3102_v31, %v3692_v25  ;;  %v553_v39 = vsel %vm4544_vm7, %v3700_v29, %v3692_v25  ;;  %v2085_v5 = vld [vmem:[#allocation3 + $0x60] sm:$0xff]  ;;  %v1211_v24 = vld [vmem:[#allocation4 + $0x30] sm:$0xff]  ;;  %vm2580_vm10 = vcmask 257024  }
  0x70   :  { %3327 = vmatmul.mubr.msk.bf16.gmra.mrb[4].mxu0 %vm42_vm0, %v2938_v10  ;;  %v554_v33 = vsel %vm538_vm9, %v3700_v29, %v3692_v25  ;;  %v569_v47 = vsel %vm4534_vm6, %v3695_v26, %v553_v39  ;;  %v2906_v52 = vpack.c.bf16 %v4552_v42, %v4550_v41  ;;  %v2080_v29 = vld [vmem:[#allocation3 + $0x10] sm:$0xff]  ;;  %v2942_v57 = vpack.c.bf16 %v1877_v53, %v4449_v46  ;;  %v1208_v12 = vld [vmem:[#allocation4] sm:$0xff] }
  0x71   :  { %3330 = vmatprep.mubr.msk.bf16.mxu0 %vm42_vm0, %v2939_v1  ;;  %v570_v49 = vsel %vm522_vm8, %v3695_v26, %v554_v33  ;;  %585 = vst.msk [vmem:[#allocation5 + $0xf0] sm:$0xff] %vm42_vm0, %v569_v47  ;;  %v2943_v58 = vpack.c.bf16 %v2081_v54, %v2080_v29  ;;  %v4583_v26 = vld [vmem:[#allocation2 + $0xb1] sm:$0xff]  ;;  %v2944_v6 = vpack.c.bf16 %v2083_v27, %v2082_v0  ;;  %v2087_v20 = vld [vmem:[#allocation3 + $0x80] sm:$0xff]  ;;  %vm2597_vm11 = vcmask 261120  }
  0x72   :  { %586 = vst.msk [vmem:[#allocation5 + $0x100] sm:$0xff] %vm42_vm0, %v570_v49  ;;  %v4587_v10 = vld [vmem:[#allocation2 + $0xd1] sm:$0xff]  ;;  %v2908_v46 = vpack.c.bf16 %v4585_v17, %v4583_v26  ;;  %v2945_v7 = vpack.c.bf16 %v2085_v5, %v2084_v3  ;;  %v2911_v21 = vpack.c.bf16 %v1209_v15, %v1208_v12  ;;  %v2088_v23 = vld [vmem:[#allocation3 + $0xa0] sm:$0xff]  ;;  %v2946_v44 = vpack.c.bf16 %v2087_v20, %v2086_v18 }
  0x73   :  { %v2909_v1 = vpack.c.bf16 %v4589_v59, %v4587_v10  ;;  %v1210_v45 = vld [vmem:[#allocation4 + $0x20] sm:$0xff]  ;;  %v2095_v38 = vld [vmem:[#allocation3 + $0x110] sm:$0xff]  ;;  %v2916_v56 = vpack.c.bf16 %v1219_v55, %v1218_v36 }
  0x74   :  { %v1212_v28 = vld [vmem:[#allocation4 + $0x40] sm:$0xff]  ;;  %v2912_v14 = vpack.c.bf16 %v1211_v24, %v1210_v45  ;;  %v2950_v39 = vpack.c.bf16 %v2095_v38, %v4160_v22  ;;  %v2952_v22 = vpack.c.bf16 %v4483_v63, %v4475_v61  ;;  %v1434_v33 = vld [vmem:[#allocation5 + $0x90] sm:$0xff]  ;;  %v2955_v63 = vpack.c.bf16 %v4583_v26, %v4562_v19 }
  0x75   :  { %3251 = vmatmul.mubr.msk.bf16.vlgmr.msra.gmra.mrb[0].mxu1 %vm42_vm0, %v2904_v11  ;;  %v4601_v11 = vld [vmem:[#allocation2 + $0x101] sm:$0xff]  ;;  %v2313_v0 = vld [vmem:[#allocation2 + $0x111] sm:$0xff] }
  0x76   :  { %3267 = vmatpush3.bf16.msra.mxu1 %v4254_v8  ;;  %3254 = vmatprep.mubr.msk.bf16.mxu1 %vm42_vm0, %v2905_v16  ;;  %v998_v8 = vld [vmem:[#allocation2 + $0x91] sm:$0xff]  ;;  %v2910_v16 = vpack.c.bf16 %v4601_v11, %v4599_v9  ;;  %v1214_v31 = vld [vmem:[#allocation4 + $0x60] sm:$0xff]  ;;  %v2958_v27 = vpack.c.bf16 %v2313_v0, %v4601_v11 }
  0x77   :  { %3374 = vmatprep.subr.bf16.mxu1 %v3515_v32  ;;  %v2907_v25 = vpack.c.bf16 %v4562_v19, %v998_v8  ;;  %v2914_v37 = vpack.c.bf16 %v1215_v34, %v1214_v31  ;;  %v2951_v8 = vpack.c.bf16 %v4473_v60, %v4451_v48  ;;  %v2953_v48 = vpack.c.bf16 %v4550_v41, %v4485_v2  ;;  %v1223_v60 = vld [vmem:[#allocation4 + $0x100] sm:$0xff]  ;;  %v1436_v2 = vld [vmem:[#allocation5 + $0xb0] sm:$0xff] }
  0x78   :  { %3331 = vmatmul.mubr.msk.bf16.gmra.mrb[8].mxu0 %vm42_vm0, %v2940_v51  ;;  %v2947_v51 = vpack.c.bf16 %v4036_v35, %v2088_v23  ;;  %v1216_v35 = vld [vmem:[#allocation4 + $0x90] sm:$0xff]  ;;  %v1435_v47 = vld [vmem:[#allocation5 + $0xa0] sm:$0xff]  ;;  %v2957_v19 = vpack.c.bf16 %v4599_v9, %v4589_v59 }
  0x79   :  { %3334 = vmatprep.mubr.msk.bf16.mxu0 %vm42_vm0, %v2941_v4  ;;  %v1217_v4 = vld [vmem:[#allocation4 + $0xa0] sm:$0xff]  ;;  %v2923_v53 = vpack.c.bf16 %v1435_v47, %v1434_v33 }
  0x7a   :  { %v2915_v40 = vpack.c.bf16 %v1217_v4, %v1216_v35  ;;  %v1437_v41 = vld [vmem:[#allocation5 + $0xc0] sm:$0xff] }
  0x7b   :  { %v1439_v29 = vld [vmem:[#allocation5 + $0xe0] sm:$0xff]  ;;  %v2924_v54 = vpack.c.bf16 %v1437_v41, %v1436_v2 }
  0x7c   :  { %v1441_v26 = vld [vmem:[#allocation5 + $0x100] sm:$0xff] }
  0x7d   :  { %3255 = vmatmul.mubr.msk.bf16.gmra.mrb[4].mxu1 %vm42_vm0, %v2906_v52  ;;  %v2305_v52 = vld [vmem:[#allocation2 + $0x81] sm:$0xff] }
  0x7e   :  { %3258 = vmatprep.mubr.msk.bf16.mxu1 %vm42_vm0, %v2907_v25  ;;  %v2954_v61 = vpack.c.bf16 %v2305_v52, %v4552_v42  ;;  %v1438_v25 = vld [vmem:[#allocation5 + $0xd0] sm:$0xff]  ;;  %v2956_v42 = vpack.c.bf16 %v4587_v10, %v4585_v17 }
  0x80   :  { %3335 = vmatmul.mubr.msk.bf16.gmra.mrb[12].mxu0 %vm42_vm0, %v2942_v57  ;;  %v2925_v57 = vpack.c.bf16 %v1439_v29, %v1438_v25 }
  0x81   :  { %3340 = vmatprep.mubr.msk.bf16.mxu0 %vm42_vm0, %v2943_v58  ;;  %v1440_v58 = vld [vmem:[#allocation5 + $0xf0] sm:$0xff] }
  0x85   :  { %3259 = vmatmul.mubr.msk.bf16.gmra.mrb[8].mxu1 %vm42_vm0, %v2908_v46  ;;  %v2926_v46 = vpack.c.bf16 %v1441_v26, %v1440_v58 }
  0x86   :  { %3262 = vmatprep.mubr.msk.bf16.mxu1 %vm42_vm0, %v2909_v1 }
  0x88   :  { %3341 = vmatmul.mubr.msk.bf16.vlgmr.msra.gmra.mrb[0].mxu0 %vm42_vm0, %v2944_v6 }
  0x89   :  { %3357 = vmatpush3.bf16.msra.mxu0 %v4439_v62  ;;  %3344 = vmatprep.mubr.msk.bf16.mxu0 %vm42_vm0, %v2945_v7  ;;  %v1213_v62 = vld [vmem:[#allocation4 + $0x50] sm:$0xff] }
  0x8a   :  { %v2913_v30 = vpack.c.bf16 %v1213_v62, %v1212_v28 }
  0x8d   :  { %3263 = vmatmul.mubr.msk.bf16.gmra.mrb[12].mxu1 %vm42_vm0, %v2910_v16 }
  0x8e   :  { %3268 = vmatprep.mubr.msk.bf16.mxu1 %vm42_vm0, %v2911_v21 }
  0x90   :  { %3345 = vmatmul.mubr.msk.bf16.gmra.mrb[4].mxu0 %vm42_vm0, %v2946_v44 }
  0x91   :  { %3348 = vmatprep.mubr.msk.bf16.mxu0 %vm42_vm0, %v2947_v51 }
  0x95   :  { %3269 = vmatmul.mubr.msk.bf16.vlgmr.msra.gmra.mrb[0].mxu1 %vm42_vm0, %v2912_v14 }
  0x96   :  { %3375 = vmatpush3.bf16.msra.mxu1 %v3515_v32  ;;  %3272 = vmatprep.mubr.msk.bf16.mxu1 %vm42_vm0, %v2913_v30  ;;  %v1221_v32 = vld [vmem:[#allocation4 + $0xe0] sm:$0xff] }
  0x98   :  { %3349 = vmatmul.mubr.msk.bf16.gmra.mrb[8].mxu0 %vm42_vm0, %v2948_v43  ;;  %v1220_v43 = vld [vmem:[#allocation4 + $0xd0] sm:$0xff] }
  0x99   :  { %3352 = vmatprep.mubr.msk.bf16.mxu0 %vm42_vm0, %v2949_v50  ;;  %v2917_v13 = vpack.c.bf16 %v1221_v32, %v1220_v43  ;;  %v1222_v50 = vld [vmem:[#allocation4 + $0xf0] sm:$0xff] }
  0x9a   :  { %v2918_v49 = vpack.c.bf16 %v1223_v60, %v1222_v50 }
  0x9d   :  { %3273 = vmatmul.mubr.msk.bf16.gmra.mrb[4].mxu1 %vm42_vm0, %v2914_v37 }
  0x9e   :  { %3276 = vmatprep.mubr.msk.bf16.mxu1 %vm42_vm0, %v2915_v40 }
  0xa0   :  { %3353 = vmatmul.mubr.msk.bf16.gmra.mrb[12].mxu0 %vm42_vm0, %v2950_v39 }
  0xa1   :  { %3358 = vmatprep.mubr.msk.bf16.mxu0 %vm42_vm0, %v2951_v8 }
  0xa5   :  { %3277 = vmatmul.mubr.msk.bf16.gmra.mrb[8].mxu1 %vm42_vm0, %v2916_v56 }
  0xa6   :  { %3280 = vmatprep.mubr.msk.bf16.mxu1 %vm42_vm0, %v2917_v13 }
  0xa8   :  { %3359 = vmatmul.mubr.msk.bf16.vlgmr.msra.gmra.mrb[0].mxu0 %vm42_vm0, %v2952_v22 }
  0xa9   :  { %3362 = vmatprep.mubr.msk.bf16.mxu0 %vm42_vm0, %v2953_v48 }
  0xad   :  { %3281 = vmatmul.mubr.msk.bf16.gmra.mrb[12].mxu1 %vm42_vm0, %v2918_v49 }
  0xae   :  { %3294 = vmatprep.mubr.msk.bf16.mxu1 %vm42_vm0, %v2923_v53 }
  0xb0   :  { %3363 = vmatmul.mubr.msk.bf16.gmra.mrb[4].mxu0 %vm42_vm0, %v2954_v61 }
  0xb1   :  { %3366 = vmatprep.mubr.msk.bf16.mxu0 %vm42_vm0, %v2955_v63 }
  0xb5   :  { %3295 = vmatmul.mubr.msk.bf16.vlgmr.msra.gmra.mrb[8].mxu1 %vm42_vm0, %v2924_v54 }
  0xb6   :  { %3298 = vmatprep.mubr.msk.bf16.mxu1 %vm42_vm0, %v2925_v57 }
  0xb8   :  { %3367 = vmatmul.mubr.msk.bf16.gmra.mrb[8].mxu0 %vm42_vm0, %v2956_v42 }
  0xb9   :  { %3370 = vmatprep.mubr.msk.bf16.mxu0 %vm42_vm0, %v2957_v19 }
  0xbd   :  { %3299 = vmatmul.mubr.msk.bf16.gmra.mrb[12].mxu1 %vm42_vm0, %v2926_v46 }
  0xc0   :  { %3371 = vmatmul.mubr.msk.bf16.gmra.mrb[12].mxu0 %vm42_vm0, %v2958_v27  ;;  %vm2635_vm0 = vcmask 253952  }
 0x168   :  { %v3270_v17 = vpop.f32.mrb[0].mxu1 }
 0x169   :  { %v1347_v10 = vpop.f32.mrb[1].mxu1 }
 0x16a   :  { %v3271_v1 = vpop.f32.mrb[2].mxu1 }
 0x16b   :  { %v1350_v59 = vpop.f32.mrb[3].mxu1 }
 0x170   :  { %v3274_v3 = vpop.f32.mrb[4].mxu1 }
 0x171   :  { %v1363_v5 = vpop.f32.mrb[5].mxu1 }
 0x172   :  { %v3275_v6 = vpop.f32.mrb[6].mxu1 }
 0x173   :  { %v1366_v7 = vpop.f32.mrb[7].mxu1 }
 0x17b   :  { %v3360_v9 = vpop.f32.mrb[0].mxu0 }
 0x17c   :  { %v3376_v12 = vadd.f32 %v3360_v9, %v3270_v17  ;;  %v2437_v15 = vpop.f32.mrb[1].mxu0 }
 0x17d   :  { %v3377_v16 = vadd.f32 %v2437_v15, %v1347_v10  ;;  %v3361_v18 = vpop.f32.mrb[2].mxu0 }
 0x17e   :  { %v2961_v20 = vpack.c.bf16 %v3376_v12, %v3376_v12  ;;  %v3378_v11 = vadd.f32 %v3361_v18, %v3271_v1  ;;  %v2440_v21 = vpop.f32.mrb[3].mxu0  ;;  %v2639_v45 = vmul.f32 %v3376_v12, %v3376_v12  ;;  %v2601_v35 = vsel %vm2597_vm11, %v3376_v12, 0.0 }
 0x17f   :  { %v2959_v23 = vpack.c.bf16 %v3377_v16, %v3377_v16  ;;  %v2637_v44 = vmul.f32 %v3377_v16, %v3377_v16  ;;  %v3379_v51 = vadd.f32 %v2440_v21, %v1350_v59  ;;  %v2598_v28 = vsel %vm2597_vm11, %v3377_v16, 0.0 }
 0x180   :  { %2583 = vst.msk [vmem:[%s4764_s6 + $0x8] sm:$0xf] %vm2580_vm10, %v2961_v20  ;;  %v2962_v24 = vpack.c.bf16 %v3378_v11, %v3378_v11  ;;  %v2640_v31 = vmul.f32 %v3378_v11, %v3378_v11  ;;  %v2656_v55 = vsel %vm2597_vm11, %v2639_v45, 0.0  ;;  %v2603_v56 = vsel %vm2597_vm11, %v3378_v11, 0.0 }
 0x181   :  { %2581 = vst.msk [vmem:[%s4764_s6] sm:$0xf] %vm2580_vm10, %v2959_v23  ;;  %v2960_v62 = vpack.c.bf16 %v3379_v51, %v3379_v51  ;;  %v2599_v14 = vsel %vm2597_vm11, %v3379_v51, 0.0  ;;  %v2638_v30 = vmul.f32 %v3379_v51, %v3379_v51  ;;  %v2653_v4 = vsel %vm2597_vm11, %v2637_v44, 0.0 }
 0x182   :  { %2584 = vst.msk [vmem:[%s4764_s6 + $0xc] sm:$0xf] %vm2580_vm10, %v2962_v24  ;;  %v2600_v34 = vadd.f32 %v2599_v14, %v2598_v28  ;;  %v2658_v13 = vsel %vm2597_vm11, %v2640_v31, 0.0 }
 0x183   :  { %2582 = vst.msk [vmem:[%s4764_s6 + $0x4] sm:$0xf] %vm2580_vm10, %v2960_v62  ;;  %v2654_v37 = vsel %vm2597_vm11, %v2638_v30, 0.0  ;;  %v3364_v38 = vpop.f32.mrb[4].mxu0 }
 0x184   :  { %v2602_v40 = vadd.f32 %v2601_v35, %v2600_v34  ;;  %v2655_v39 = vadd.f32 %v2654_v37, %v2653_v4  ;;  %v3380_v8 = vadd.f32 %v3364_v38, %v3274_v3  ;;  %v2453_v36 = vpop.f32.mrb[5].mxu0 }
 0x185   :  { %v3381_v43 = vadd.f32 %v2453_v36, %v1363_v5  ;;  %v3365_v32 = vpop.f32.mrb[6].mxu0 }
 0x186   :  { %v2657_v22 = vadd.f32 %v2656_v55, %v2655_v39  ;;  %v2965_v48 = vpack.c.bf16 %v3380_v8, %v3380_v8  ;;  %v2456_v50 = vpop.f32.mrb[7].mxu0  ;;  %v2604_v33 = vadd.f32 %v2603_v56, %v2602_v40  ;;  %v3382_v53 = vadd.f32 %v3365_v32, %v3275_v6 }
 0x187   :  { %v2963_v60 = vpack.c.bf16 %v3381_v43, %v3381_v43  ;;  %v2605_v47 = vsel %vm2597_vm11, %v3381_v43, 0.0  ;;  %v2641_v49 = vmul.f32 %v3381_v43, %v3381_v43  ;;  %v3383_v61 = vadd.f32 %v2456_v50, %v1366_v7 }
 0x188   :  { %2587 = vst.msk [vmem:[%s4764_s6 + $0x18] sm:$0xf] %vm2580_vm10, %v2965_v48  ;;  %v2659_v52 = vadd.f32 %v2658_v13, %v2657_v22  ;;  %v3296_v63 = vpop.f32.mrb[8].mxu1  ;;  %v2606_v2 = vadd.f32 %v2605_v47, %v2604_v33  ;;  %v2643_v29 = vmul.f32 %v3380_v8, %v3380_v8  ;;  %v2966_v57 = vpack.c.bf16 %v3382_v53, %v3382_v53 }
 0x189   :  { %2585 = vst.msk [vmem:[%s4764_s6 + $0x10] sm:$0xf] %vm2580_vm10, %v2963_v60  ;;  %v2660_v41 = vsel %vm2597_vm11, %v2641_v49, 0.0  ;;  %v1597_v25 = vpop.f32.mrb[9].mxu1  ;;  %v2964_v19 = vpack.c.bf16 %v3383_v61, %v3383_v61  ;;  %v2607_v58 = vsel %vm2597_vm11, %v3383_v61, 0.0  ;;  %v2642_v26 = vmul.f32 %v3383_v61, %v3383_v61 }
 0x18a   :  { %v2661_v54 = vadd.f32 %v2660_v41, %v2659_v52  ;;  %v3297_v42 = vpop.f32.mrb[10].mxu1  ;;  %2588 = vst.msk [vmem:[%s4764_s6 + $0x1c] sm:$0xf] %vm2580_vm10, %v2966_v57  ;;  %v2608_v27 = vadd.f32 %v2607_v58, %v2606_v2  ;;  %v2609_v1 = vsel %vm2597_vm11, %v3380_v8, 0.0  ;;  %v2644_v59 = vmul.f32 %v3382_v53, %v3382_v53 }
 0x18b   :  { %v3368_v46 = vpop.f32.mrb[8].mxu0  ;;  %v1600_v0 = vpop.f32.mrb[11].mxu1  ;;  %2586 = vst.msk [vmem:[%s4764_s6 + $0x14] sm:$0xf] %vm2580_vm10, %v2964_v19  ;;  %v2662_v3 = vsel %vm2597_vm11, %v2642_v26, 0.0  ;;  %v2664_v7 = vsel %vm2597_vm11, %v2643_v29, 0.0 }
 0x18c   :  { %v3384_v17 = vadd.f32 %v3368_v46, %v3296_v63  ;;  %v2469_v10 = vpop.f32.mrb[9].mxu0  ;;  %v2610_v9 = vadd.f32 %v2609_v1, %v2608_v27  ;;  %v2663_v12 = vadd.f32 %v2662_v3, %v2661_v54  ;;  %v2611_v18 = vsel %vm2597_vm11, %v3382_v53, 0.0 }
 0x18d   :  { %v3385_v5 = vadd.f32 %v2469_v10, %v1597_v25  ;;  %v3369_v6 = vpop.f32.mrb[10].mxu0  ;;  %v2666_v28 = vsel %vm2597_vm11, %v2644_v59, 0.0 }
 0x18e   :  { %v2969_v15 = vpack.c.bf16 %v3384_v17, %v3384_v17  ;;  %v2472_v16 = vpop.f32.mrb[11].mxu0  ;;  %v2665_v23 = vadd.f32 %v2664_v7, %v2663_v12  ;;  %v2612_v44 = vadd.f32 %v2611_v18, %v2610_v9  ;;  %v3386_v51 = vadd.f32 %v3369_v6, %v3297_v42 }
 0x18f   :  { %v2967_v20 = vpack.c.bf16 %v3385_v5, %v3385_v5  ;;  %v2613_v11 = vsel %vm2597_vm11, %v3385_v5, 0.0  ;;  %v2645_v21 = vmul.f32 %v3385_v5, %v3385_v5  ;;  %v3387_v45 = vadd.f32 %v2472_v16, %v1600_v0 }
 0x190   :  { %2591 = vst.msk [vmem:[%s4764_s6 + $0x28] sm:$0xf] %vm2580_vm10, %v2969_v15  ;;  %v3300_v24 = vpop.f32.mrb[12].mxu1  ;;  %v2647_v30 = vmul.f32 %v3384_v17, %v3384_v17  ;;  %v2614_v31 = vadd.f32 %v2613_v11, %v2612_v44  ;;  %v2667_v34 = vadd.f32 %v2666_v28, %v2665_v23  ;;  %v2970_v35 = vpack.c.bf16 %v3386_v51, %v3386_v51 }
 0x191   :  { %2589 = vst.msk [vmem:[%s4764_s6 + $0x20] sm:$0xf] %vm2580_vm10, %v2967_v20  ;;  %v2668_v62 = vsel %vm2597_vm11, %v2645_v21, 0.0  ;;  %v1613_v14 = vpop.f32.mrb[13].mxu1  ;;  %v2968_v37 = vpack.c.bf16 %v3387_v45, %v3387_v45  ;;  %v2615_v38 = vsel %vm2597_vm11, %v3387_v45, 0.0  ;;  %v2646_v40 = vmul.f32 %v3387_v45, %v3387_v45 }
 0x192   :  { %v3301_v4 = vpop.f32.mrb[14].mxu1  ;;  %v2669_v36 = vadd.f32 %v2668_v62, %v2667_v34  ;;  %2592 = vst.msk [vmem:[%s4764_s6 + $0x2c] sm:$0xf] %vm2580_vm10, %v2970_v35  ;;  %v2616_v55 = vadd.f32 %v2615_v38, %v2614_v31  ;;  %v2617_v56 = vsel %vm2597_vm11, %v3384_v17, 0.0  ;;  %v2648_v13 = vmul.f32 %v3386_v51, %v3386_v51 }
 0x193   :  { %v3372_v39 = vpop.f32.mrb[12].mxu0  ;;  %v1616_v8 = vpop.f32.mrb[15].mxu1  ;;  %2590 = vst.msk [vmem:[%s4764_s6 + $0x24] sm:$0xf] %vm2580_vm10, %v2968_v37  ;;  %v2670_v22 = vsel %vm2597_vm11, %v2646_v40, 0.0  ;;  %v2672_v60 = vsel %vm2597_vm11, %v2647_v30, 0.0 }
 0x194   :  { %v3388_v43 = vadd.f32 %v3372_v39, %v3300_v24  ;;  %v2485_v32 = vpop.f32.mrb[13].mxu0  ;;  %v2618_v33 = vadd.f32 %v2617_v56, %v2616_v55  ;;  %v2671_v47 = vadd.f32 %v2670_v22, %v2669_v36  ;;  %v2619_v53 = vsel %vm2597_vm11, %v3386_v51, 0.0 }
 0x195   :  { %v3389_v48 = vadd.f32 %v2485_v32, %v1613_v14  ;;  %v3373_v50 = vpop.f32.mrb[14].mxu0  ;;  %v2674_v57 = vsel %vm2597_vm11, %v2648_v13, 0.0 }
 0x196   :  { %v2973_v49 = vpack.c.bf16 %v3388_v43, %v3388_v43  ;;  %v2488_v52 = vpop.f32.mrb[15].mxu0  ;;  %v2673_v41 = vadd.f32 %v2672_v60, %v2671_v47  ;;  %v2620_v25 = vadd.f32 %v2619_v53, %v2618_v33  ;;  %v3390_v29 = vadd.f32 %v3373_v50, %v3301_v4 }
 0x197   :  { %v2971_v61 = vpack.c.bf16 %v3389_v48, %v3389_v48  ;;  %v2621_v63 = vsel %vm2597_vm11, %v3389_v48, 0.0  ;;  %v2649_v2 = vmul.f32 %v3389_v48, %v3389_v48  ;;  %v3391_v54 = vadd.f32 %v2488_v52, %v1616_v8 }
 0x198   :  { %2595 = vst.msk [vmem:[%s4764_s6 + $0x38] sm:$0xf] %vm2580_vm10, %v2973_v49  ;;  %v2622_v19 = vadd.f32 %v2621_v63, %v2620_v25  ;;  %v2675_v58 = vadd.f32 %v2674_v57, %v2673_v41  ;;  %v2974_v26 = vpack.c.bf16 %v3390_v29, %v3390_v29  ;;  %v2651_v46 = vmul.f32 %v3388_v43, %v3388_v43 }
 0x199   :  { %2593 = vst.msk [vmem:[%s4764_s6 + $0x30] sm:$0xf] %vm2580_vm10, %v2971_v61  ;;  %v2676_v42 = vsel %vm2597_vm11, %v2649_v2, 0.0  ;;  %v2972_v0 = vpack.c.bf16 %v3391_v54, %v3391_v54  ;;  %v2623_v27 = vsel %vm2597_vm11, %v3391_v54, 0.0  ;;  %v2650_v17 = vmul.f32 %v3391_v54, %v3391_v54 }
 0x19a   :  { %v2677_v10 = vadd.f32 %v2676_v42, %v2675_v58  ;;  %2596 = vst.msk [vmem:[%s4764_s6 + $0x3c] sm:$0xf] %vm2580_vm10, %v2974_v26  ;;  %v2624_v1 = vadd.f32 %v2623_v27, %v2622_v19  ;;  %v2625_v59 = vsel %vm2597_vm11, %v3388_v43, 0.0  ;;  %v2652_v3 = vmul.f32 %v3390_v29, %v3390_v29 }
 0x19b   :  { %2594 = vst.msk [vmem:[%s4764_s6 + $0x34] sm:$0xf] %vm2580_vm10, %v2972_v0  ;;  %v2678_v5 = vsel %vm2597_vm11, %v2650_v17, 0.0  ;;  %v2680_v9 = vsel %vm2597_vm11, %v2651_v46, 0.0  ;;  %v2627_v12 = vsel %vm2597_vm11, %v3390_v29, 0.0 }
 0x19c   :  { %v2626_v6 = vadd.f32 %v2625_v59, %v2624_v1  ;;  %v2679_v7 = vadd.f32 %v2678_v5, %v2677_v10  ;;  %v2682_v18 = vsel %vm2597_vm11, %v2652_v3, 0.0 }
 0x19e   :  { %v2628_v15 = vadd.f32 %v2627_v12, %v2626_v6  ;;  %v2681_v16 = vadd.f32 %v2680_v9, %v2679_v7 }
 0x1a0   :  { %v2629_v20 = vrot.slane %v2628_v15, 4  ;;  %v2683_v11 = vadd.f32 %v2682_v18, %v2681_v16 }
 0x1a2   :  { %v2630_v21 = vadd.f32 %v2629_v20, %v2628_v15  ;;  %v2684_v23 = vrot.slane %v2683_v11, 4 }
 0x1a4   :  { %v2631_v44 = vrot.slane %v2630_v21, 2  ;;  %v2685_v51 = vadd.f32 %v2684_v23, %v2683_v11 }
 0x1a6   :  { %v2632_v45 = vadd.f32 %v2631_v44, %v2630_v21  ;;  %v2686_v24 = vrot.slane %v2685_v51, 2 }
 0x1a8   :  { %v2633_v28 = vrot.slane %v2632_v45, 1  ;;  %v2687_v62 = vadd.f32 %v2686_v24, %v2685_v51 }
 0x1aa   :  { %v2634_v14 = vadd.f32 %v2633_v28, %v2632_v45  ;;  %v2688_v30 = vrot.slane %v2687_v62, 1 }
 0x1ac   :  { %2636 = vst.msk [vmem:[%s4765_s7] sm:$0x1] %vm2635_vm0, %v2634_v14  ;;  %v2689_v31 = vadd.f32 %v2688_v30, %v2687_v62 }
 0x1ae   :  { %2690 = vst.msk [vmem:[%s4765_s7 + $0x1] sm:$0x1] %vm2635_vm0, %v2689_v31 }
 0x1af   :  { %2699 = vsyncpa [#allocation7], 1 }

// kernel: basic_block_1w1a_forward.6
= control target key start
LH: loop header
LB: loop body
LE: loop exit
PB: predicated region body
PF: predicated region fallthrough
CT: control target
= control target key end

     0   :  { %10 = vsyncpa [#allocation4], 0  ;;  %s3853_s0 = inlined_call_operand.vmem [shape: bf16[2,8,8,32], index: 0, kind: input, shape index: {}]   ;;  %s3854_s1 = inlined_call_operand.vmem [shape: bf16[9,32,32], index: 1, kind: input, shape index: {}]   ;;  %s3855_s2 = inlined_call_operand.vmem [shape: f32[3], index: 2, kind: input, shape index: {}]   ;;  %s3856_s3 = inlined_call_operand.vmem [shape: bf16[128,32], index: 3, kind: output, shape index: {0}]   ;;  %s3857_s4 = inlined_call_operand.vmem [shape: f32[1,2,32], index: 4, kind: output, shape index: {1}]  }
   0x1   :  { %s21_s17 = sshll.u32 %s3855_s2, 4  ;;  %s22_s17 = int_to_ptr.vmem [resolvable:$true] %s21_s17 }
   0x2   :  { %s3146_s18 = scalar_lea.vmem %s22_s17, 16  ;;  %p3151_p1 = scmp.lt.s32.totalorder %s22_s17, %s22_s17 }
   0x3   :  { %p3147_p0 = scmp.ne.s32.totalorder %s22_s17, %s3146_s18  ;;  %p3152_p2 = scmp.lt.s32.totalorder %s3146_s18, %s3146_s18 }
   0x5   :  { %p3153_p3 = por %p3152_p2, %p3151_p1 }
   0x7   :  { %p3154_p4 = pnand %p3153_p3, %p3147_p0 }
   0x9   :  { %3157 = shalt.err (!%p3154_p4)
}
   0xa   :  { %s3160_s19 = smov [#allocation3]  }
   0xb   :  { %24 = dma.vmem_to_smem %s22_s17, 16, %s3160_s19, [#allocation4]  }
   0xc   :  { %3158 = dma.done.wait [#allocation4], 16  }
   0xd   :  { %3159 = vsyncadd [#allocation4], 4294967280 }
   0xe   :  { %28 = sfence }
   0xf   :  { %v3128_v0 = vld [vmem:[%s3854_s1 + $0x10] sm:$0xff]   ;;  %vm33_vm0 = vcmask 261120   ;;  %v3196_v1 = vld [vmem:[%s3854_s1 + $0x40] sm:$0xff]   ;;  %v3201_v2 = vld [vmem:[%s3854_s1 + $0x18] sm:$0xff]   ;;  %v3161_v3 = vmov 0.0   ;;  %vm35_vm1 = vcmask 254976  }
  0x10   :  { %2814 = vmatprep.subr.bf16.mxu1 %v3128_v0  ;;  %34 = vst.msk [vmem:[#allocation2] sm:$0xff] %vm33_vm0, %v3161_v3  ;;  %37 = vst.msk [vmem:[#allocation2 + $0xa0] sm:$0xff] %vm33_vm0, %v3161_v3  ;;  %2894 = vmatprep.subr.bf16.mxu0 %v3196_v1  ;;  %v3211_v4 = vld [vmem:[%s3854_s1 + $0x48] sm:$0xff]   ;;  %vm44_vm2 = vcmask 253952   ;;  %s3215_s27 = sld [smem:[#allocation3]]  ;;  %s3217_s28 = sld [smem:[#allocation3 + $0x1]] }
  0x11   :  { %40 = vst.msk [vmem:[#allocation2 + $0x90] sm:$0xff] %vm33_vm0, %v3161_v3  ;;  %42 = vst.msk [vmem:[#allocation2 + $0x130] sm:$0xff] %vm33_vm0, %v3161_v3  ;;  %2815 = vmatpush3.bf16.msra.mxu1 %v3128_v0  ;;  %2895 = vmatpush3.bf16.msra.mxu0 %v3196_v1  ;;  %v3224_v5 = vld [vmem:[%s3853_s0] sm:$0xff]   ;;  %s2386_s7 = sld [smem:[#allocation3 + $0x2]]  ;;  %v3273_v7 = vld [vmem:[%s3854_s1 + $0x50] sm:$0xff]  }
  0x12   :  { %36 = vst.msk [vmem:[#allocation2 + $0x8] sm:$0x3] %vm35_vm1, %v3161_v3  ;;  %38 = vst.msk [vmem:[#allocation2 + $0xa8] sm:$0x3] %vm35_vm1, %v3161_v3  ;;  %2816 = vmatprep.subr.bf16.mxu1 %v3201_v2  ;;  %v3261_v6 = vld [vmem:[%s3854_s1] sm:$0xff]   ;;  %2896 = vmatprep.subr.bf16.mxu0 %v3211_v4  ;;  %v2687_v8 = vunpack.c.l.bf16 %v3224_v5  ;;  %v2688_v9 = vunpack.c.h.bf16 %v3224_v5  ;;  %v2717_v10 = vld [vmem:[%s3853_s0 + $0x8] sm:$0xff]  }
  0x13   :  { %41 = vst.msk [vmem:[#allocation2 + $0x98] sm:$0x3] %vm35_vm1, %v3161_v3  ;;  %43 = vst.msk [vmem:[#allocation2 + $0x138] sm:$0x3] %vm35_vm1, %v3161_v3  ;;  %v2718_v11 = vld [vmem:[%s3853_s0 + $0x10] sm:$0xff]   ;;  %v2691_v12 = vunpack.c.l.bf16 %v2717_v10  ;;  %v2692_v13 = vunpack.c.h.bf16 %v2717_v10  ;;  %v2719_v14 = vld [vmem:[%s3853_s0 + $0x18] sm:$0xff]  }
  0x14   :  { %45 = vst.msk [vmem:[#allocation2] sm:$0x1] %vm44_vm2, %v3161_v3  ;;  %65 = vst.msk [vmem:[#allocation2 + $0x9] sm:$0x1] %vm44_vm2, %v3161_v3  ;;  %v2695_v15 = vunpack.c.l.bf16 %v2718_v11  ;;  %v2696_v16 = vunpack.c.h.bf16 %v2718_v11  ;;  %v2699_v17 = vunpack.c.l.bf16 %v2719_v14  ;;  %v2700_v18 = vunpack.c.h.bf16 %v2719_v14  ;;  %v2720_v19 = vld [vmem:[%s3853_s0 + $0x20] sm:$0xff]   ;;  %v2721_v35 = vld [vmem:[%s3853_s0 + $0x28] sm:$0xff]  }
  0x15   :  { %46 = vst.msk [vmem:[#allocation2 + $0x10] sm:$0x1] %vm44_vm2, %v3161_v3  ;;  %47 = vst.msk [vmem:[#allocation2 + $0x20] sm:$0x1] %vm44_vm2, %v3161_v3  ;;  %2817 = vmatpush3.bf16.msra.mxu1 %v3201_v2  ;;  %2897 = vmatpush3.bf16.msra.mxu0 %v3211_v4  ;;  %v2703_v22 = vunpack.c.l.bf16 %v2720_v19  ;;  %v2704_v23 = vunpack.c.h.bf16 %v2720_v19  ;;  %v2707_v43 = vunpack.c.l.bf16 %v2721_v35  ;;  %v2722_v44 = vld [vmem:[%s3853_s0 + $0x30] sm:$0xff]   ;;  %v2708_v49 = vunpack.c.h.bf16 %v2721_v35  ;;  %v3135_v58 = vld [vmem:[%s3854_s1 + $0x8] sm:$0xff]  }
  0x16   :  { %48 = vst.msk [vmem:[#allocation2 + $0x30] sm:$0x1] %vm44_vm2, %v3161_v3  ;;  %49 = vst.msk [vmem:[#allocation2 + $0x40] sm:$0x1] %vm44_vm2, %v3161_v3  ;;  %2834 = vmatprep.subr.bf16.mxu1 %v3261_v6  ;;  %2914 = vmatprep.subr.bf16.mxu0 %v3273_v7  ;;  %v3294_v20 = vstv %s3215_s27  ;;  %v3297_v21 = vstv %s3217_s28  ;;  %v2711_v55 = vunpack.c.l.bf16 %v2722_v44  ;;  %v2723_v2 = vld [vmem:[%s3853_s0 + $0x38] sm:$0xff]   ;;  %v2712_v11 = vunpack.c.h.bf16 %v2722_v44  ;;  %v3430_v19 = vld [vmem:[%s3854_s1 + $0x20] sm:$0xff]  }
  0x17   :  { %50 = vst.msk [vmem:[#allocation2 + $0x50] sm:$0x1] %vm44_vm2, %v3161_v3  ;;  %51 = vst.msk [vmem:[#allocation2 + $0x60] sm:$0x1] %vm44_vm2, %v3161_v3  ;;  %vm118_vm3 = vcmp.gt.f32.partialorder %v2687_v8, %v3294_v20  ;;  %vm134_vm4 = vcmp.lt.f32.partialorder %v2687_v8, %v3294_v20  ;;  %v3301_v24 = vstv %s2386_s7  ;;  %vm119_vm5 = vcmp.gt.f32.partialorder %v2688_v9, %v3294_v20  ;;  %v3140_v63 = vld [vmem:[%s3854_s1 + $0x70] sm:$0xff]  }
  0x18   :  { %52 = vst.msk [vmem:[#allocation2 + $0x70] sm:$0x1] %vm44_vm2, %v3161_v3  ;;  %53 = vst.msk [vmem:[#allocation2 + $0x80] sm:$0x1] %vm44_vm2, %v3161_v3  ;;  %v151_v25 = vsel %vm134_vm4, %v3301_v24, %v3294_v20  ;;  %vm135_vm6 = vcmp.lt.f32.partialorder %v2688_v9, %v3294_v20  ;;  %vm120_vm7 = vcmp.gt.f32.partialorder %v2691_v12, %v3294_v20  ;;  %v3134_v9 = vld [vmem:[%s3854_s1 + $0x58] sm:$0xff]  }
  0x19   :  { %56 = vst.msk [vmem:[#allocation2 + $0xb0] sm:$0x1] %vm44_vm2, %v3161_v3  ;;  %57 = vst.msk [vmem:[#allocation2 + $0xc0] sm:$0x1] %vm44_vm2, %v3161_v3  ;;  %vm136_vm8 = vcmp.lt.f32.partialorder %v2691_v12, %v3294_v20  ;;  %v168_v26 = vsel %vm118_vm3, %v3297_v21, %v151_v25  ;;  %v152_v27 = vsel %vm135_vm6, %v3301_v24, %v3294_v20  ;;  %v237_v38 = vld [vmem:[#allocation2 + $0x1] sm:$0xff] }
  0x1a   :  { %58 = vst.msk [vmem:[#allocation2 + $0xd0] sm:$0x1] %vm44_vm2, %v3161_v3  ;;  %59 = vst.msk [vmem:[#allocation2 + $0xe0] sm:$0x1] %vm44_vm2, %v3161_v3  ;;  %v153_v28 = vsel %vm136_vm8, %v3301_v24, %v3294_v20  ;;  %vm121_vm9 = vcmp.gt.f32.partialorder %v2692_v13, %v3294_v20  ;;  %v169_v29 = vsel %vm119_vm5, %v3297_v21, %v152_v27 }
  0x1b   :  { %60 = vst.msk [vmem:[#allocation2 + $0xf0] sm:$0x1] %vm44_vm2, %v3161_v3  ;;  %61 = vst.msk [vmem:[#allocation2 + $0x100] sm:$0x1] %vm44_vm2, %v3161_v3  ;;  %v170_v30 = vsel %vm120_vm7, %v3297_v21, %v153_v28  ;;  %vm137_vm10 = vcmp.lt.f32.partialorder %v2692_v13, %v3294_v20  ;;  %vm122_vm11 = vcmp.gt.f32.partialorder %v2695_v15, %v3294_v20 }
  0x1c   :  { %62 = vst.msk [vmem:[#allocation2 + $0x110] sm:$0x1] %vm44_vm2, %v3161_v3  ;;  %63 = vst.msk [vmem:[#allocation2 + $0x120] sm:$0x1] %vm44_vm2, %v3161_v3  ;;  %v154_v31 = vsel %vm137_vm10, %v3301_v24, %v3294_v20  ;;  %vm138_vm12 = vcmp.lt.f32.partialorder %v2695_v15, %v3294_v20  ;;  %vm123_vm13 = vcmp.gt.f32.partialorder %v2696_v16, %v3294_v20 }
  0x1d   :  { %66 = vst.msk [vmem:[#allocation2 + $0x19] sm:$0x1] %vm44_vm2, %v3161_v3  ;;  %67 = vst.msk [vmem:[#allocation2 + $0x29] sm:$0x1] %vm44_vm2, %v3161_v3  ;;  %vm139_vm14 = vcmp.lt.f32.partialorder %v2696_v16, %v3294_v20  ;;  %v171_v32 = vsel %vm121_vm9, %v3297_v21, %v154_v31  ;;  %v155_v33 = vsel %vm138_vm12, %v3301_v24, %v3294_v20 }
  0x1e   :  { %68 = vst.msk [vmem:[#allocation2 + $0x39] sm:$0x1] %vm44_vm2, %v3161_v3  ;;  %69 = vst.msk [vmem:[#allocation2 + $0x49] sm:$0x1] %vm44_vm2, %v3161_v3  ;;  %v156_v34 = vsel %vm139_vm14, %v3301_v24, %v3294_v20  ;;  %vm124_vm15 = vcmp.gt.f32.partialorder %v2699_v17, %v3294_v20  ;;  %v172_v36 = vsel %vm122_vm11, %v3297_v21, %v155_v33 }
  0x1f   :  { %70 = vst.msk [vmem:[#allocation2 + $0x59] sm:$0x1] %vm44_vm2, %v3161_v3  ;;  %71 = vst.msk [vmem:[#allocation2 + $0x69] sm:$0x1] %vm44_vm2, %v3161_v3  ;;  %v173_v37 = vsel %vm123_vm13, %v3297_v21, %v156_v34  ;;  %vm140_vm1 = vcmp.lt.f32.partialorder %v2699_v17, %v3294_v20  ;;  %vm125_vm3 = vcmp.gt.f32.partialorder %v2700_v18, %v3294_v20  ;;  %v245_v17 = vld [vmem:[#allocation2 + $0xa1] sm:$0xff] }
  0x20   :  { %72 = vst.msk [vmem:[#allocation2 + $0x79] sm:$0x1] %vm44_vm2, %v3161_v3  ;;  %73 = vst.msk [vmem:[#allocation2 + $0x89] sm:$0x1] %vm44_vm2, %v3161_v3  ;;  %v157_v39 = vsel %vm140_vm1, %v3301_v24, %v3294_v20  ;;  %vm141_vm4 = vcmp.lt.f32.partialorder %v2700_v18, %v3294_v20  ;;  %vm126_vm5 = vcmp.gt.f32.partialorder %v2703_v22, %v3294_v20  ;;  %v2715_v18 = vunpack.c.l.bf16 %v2723_v2 }
  0x21   :  { %76 = vst.msk [vmem:[#allocation2 + $0xb9] sm:$0x1] %vm44_vm2, %v3161_v3  ;;  %77 = vst.msk [vmem:[#allocation2 + $0xc9] sm:$0x1] %vm44_vm2, %v3161_v3  ;;  %vm142_vm6 = vcmp.lt.f32.partialorder %v2703_v22, %v3294_v20  ;;  %v174_v40 = vsel %vm124_vm15, %v3297_v21, %v157_v39  ;;  %v158_v41 = vsel %vm141_vm4, %v3301_v24, %v3294_v20 }
  0x22   :  { %78 = vst.msk [vmem:[#allocation2 + $0xd9] sm:$0x1] %vm44_vm2, %v3161_v3  ;;  %79 = vst.msk [vmem:[#allocation2 + $0xe9] sm:$0x1] %vm44_vm2, %v3161_v3  ;;  %v159_v42 = vsel %vm142_vm6, %v3301_v24, %v3294_v20  ;;  %v175_v45 = vsel %vm125_vm3, %v3297_v21, %v158_v41  ;;  %vm127_vm7 = vcmp.gt.f32.partialorder %v2704_v23, %v3294_v20 }
  0x23   :  { %80 = vst.msk [vmem:[#allocation2 + $0xf9] sm:$0x1] %vm44_vm2, %v3161_v3  ;;  %81 = vst.msk [vmem:[#allocation2 + $0x109] sm:$0x1] %vm44_vm2, %v3161_v3  ;;  %v176_v46 = vsel %vm126_vm5, %v3297_v21, %v159_v42  ;;  %vm143_vm8 = vcmp.lt.f32.partialorder %v2704_v23, %v3294_v20  ;;  %vm128_vm9 = vcmp.gt.f32.partialorder %v2707_v43, %v3294_v20 }
  0x24   :  { %82 = vst.msk [vmem:[#allocation2 + $0x119] sm:$0x1] %vm44_vm2, %v3161_v3  ;;  %83 = vst.msk [vmem:[#allocation2 + $0x129] sm:$0x1] %vm44_vm2, %v3161_v3  ;;  %vm144_vm10 = vcmp.lt.f32.partialorder %v2707_v43, %v3294_v20  ;;  %v160_v48 = vsel %vm143_vm8, %v3301_v24, %v3294_v20  ;;  %vm3380_vm11 = vcmp.gt.f32.partialorder %v2708_v49, %v3294_v20 }
  0x25   :  { %54 = vst.msk [vmem:[#allocation2 + $0x90] sm:$0x1] %vm44_vm2, %v3161_v3  ;;  %55 = vst.msk [vmem:[#allocation2 + $0xa0] sm:$0x1] %vm44_vm2, %v3161_v3  ;;  %v161_v53 = vsel %vm144_vm10, %v3301_v24, %v3294_v20  ;;  %v177_v54 = vsel %vm127_vm7, %v3297_v21, %v160_v48  ;;  %vm3385_vm12 = vcmp.gt.f32.partialorder %v2711_v55, %v3294_v20  ;;  %vm2267_vm7 = vcmask 257024  }
  0x26   :  { %64 = vst.msk [vmem:[#allocation2 + $0x130] sm:$0x1] %vm44_vm2, %v3161_v3  ;;  %74 = vst.msk [vmem:[#allocation2 + $0x99] sm:$0x1] %vm44_vm2, %v3161_v3  ;;  %v178_v59 = vsel %vm128_vm9, %v3297_v21, %v161_v53  ;;  %vm3390_vm13 = vcmp.lt.f32.partialorder %v2708_v49, %v3294_v20  ;;  %vm3395_vm14 = vcmp.lt.f32.partialorder %v2711_v55, %v3294_v20  ;;  %v3138_v53 = vld [vmem:[%s3854_s1 + $0x68] sm:$0xff]   ;;  %v201_v55 = vld [vmem:[#allocation2] sm:$0xff] }
  0x27   :  { %75 = vst.msk [vmem:[#allocation2 + $0xa9] sm:$0x1] %vm44_vm2, %v3161_v3  ;;  %84 = vst.msk [vmem:[#allocation2 + $0x139] sm:$0x1] %vm44_vm2, %v3161_v3  ;;  %v162_v10 = vsel %vm3390_vm13, %v3301_v24, %v3294_v20  ;;  %v163_v14 = vsel %vm3395_vm14, %v3301_v24, %v3294_v20  ;;  %vm3441_vm15 = vcmp.gt.f32.partialorder %v2712_v11, %v3294_v20 }
  0x28   :  { %185 = vst.msk [vmem:[#allocation2 + $0x11] sm:$0xff] %vm33_vm0, %v168_v26  ;;  %186 = vst.msk [vmem:[#allocation2 + $0x21] sm:$0xff] %vm33_vm0, %v169_v29  ;;  %v179_v15 = vsel %vm3380_vm11, %v3297_v21, %v162_v10  ;;  %vm3446_vm1 = vcmp.lt.f32.partialorder %v2712_v11, %v3294_v20  ;;  %vm132_vm3 = vcmp.gt.f32.partialorder %v2715_v18, %v3294_v20 }
  0x29   :  { %187 = vst.msk [vmem:[#allocation2 + $0x31] sm:$0xff] %vm33_vm0, %v170_v30  ;;  %188 = vst.msk [vmem:[#allocation2 + $0x41] sm:$0xff] %vm33_vm0, %v171_v32  ;;  %v3136_v30 = vld [vmem:[%s3854_s1 + $0x60] sm:$0xff]   ;;  %vm148_vm4 = vcmp.lt.f32.partialorder %v2715_v18, %v3294_v20  ;;  %v164_v32 = vsel %vm3446_vm1, %v3301_v24, %v3294_v20  ;;  %v3139_v18 = vld [vmem:[%s3854_s1 + $0x28] sm:$0xff]  }
  0x2a   :  { %189 = vst.msk [vmem:[#allocation2 + $0x51] sm:$0xff] %vm33_vm0, %v172_v36  ;;  %190 = vst.msk [vmem:[#allocation2 + $0x61] sm:$0xff] %vm33_vm0, %v173_v37  ;;  %v165_v34 = vsel %vm148_vm4, %v3301_v24, %v3294_v20  ;;  %v181_v35 = vsel %vm3441_vm15, %v3297_v21, %v164_v32  ;;  %v3141_v32 = vld [vmem:[%s3854_s1 + $0x30] sm:$0xff]  }
  0x2b   :  { %191 = vst.msk [vmem:[#allocation2 + $0x71] sm:$0xff] %vm33_vm0, %v174_v40  ;;  %192 = vst.msk [vmem:[#allocation2 + $0x81] sm:$0xff] %vm33_vm0, %v175_v45  ;;  %v182_v37 = vsel %vm132_vm3, %v3297_v21, %v165_v34 }
  0x2c   :  { %193 = vst.msk [vmem:[#allocation2 + $0xb1] sm:$0xff] %vm33_vm0, %v176_v46  ;;  %194 = vst.msk [vmem:[#allocation2 + $0xc1] sm:$0xff] %vm33_vm0, %v177_v54 }
  0x2d   :  { %195 = vst.msk [vmem:[#allocation2 + $0xd1] sm:$0xff] %vm33_vm0, %v178_v59  ;;  %196 = vst.msk [vmem:[#allocation2 + $0xe1] sm:$0xff] %vm33_vm0, %v179_v15 }
  0x2e   :  { %198 = vst.msk [vmem:[#allocation2 + $0x101] sm:$0xff] %vm33_vm0, %v181_v35  ;;  %199 = vst.msk [vmem:[#allocation2 + $0x111] sm:$0xff] %vm33_vm0, %v182_v37 }
  0x2f   :  { %v238_v47 = vld [vmem:[#allocation2 + $0x11] sm:$0xff]  ;;  %v1073_v51 = vld [vmem:[#allocation2 + $0x21] sm:$0xff] }
  0x30   :  { %v2597_v50 = vpack.c.bf16 %v238_v47, %v237_v38  ;;  %v240_v52 = vld [vmem:[#allocation2 + $0x31] sm:$0xff]  ;;  %v2629_v56 = vpack.c.bf16 %v1073_v51, %v238_v47  ;;  %v1075_v60 = vld [vmem:[#allocation2 + $0x41] sm:$0xff] }
  0x31   :  { %v3370_v57 = vpack.c.bf16 %v240_v52, %v1073_v51  ;;  %v2630_v3 = vpack.c.bf16 %v1075_v60, %v240_v52  ;;  %v242_v5 = vld [vmem:[#allocation2 + $0x51] sm:$0xff]  ;;  %v1077_v8 = vld [vmem:[#allocation2 + $0x61] sm:$0xff] }
  0x32   :  { %2818 = vmatprep.mubr.msk.bf16.mxu1 %vm33_vm0, %v2597_v50  ;;  %2898 = vmatprep.mubr.msk.bf16.mxu0 %vm33_vm0, %v2629_v56  ;;  %v3413_v12 = vpack.c.bf16 %v242_v5, %v1075_v60  ;;  %v2631_v13 = vpack.c.bf16 %v1077_v8, %v242_v5  ;;  %v244_v16 = vld [vmem:[#allocation2 + $0x71] sm:$0xff]  ;;  %v3435_v22 = vld [vmem:[#allocation2 + $0x81] sm:$0xff] }
  0x33   :  { %2819 = vmatmul.mubr.msk.bf16.vlgmr.msra.gmra.mrb[0].mxu1 %vm33_vm0, %v3370_v57  ;;  %2899 = vmatmul.mubr.msk.bf16.vlgmr.msra.gmra.mrb[0].mxu0 %vm33_vm0, %v2630_v3  ;;  %v3437_v23 = vld [vmem:[#allocation2 + $0xb1] sm:$0xff]  ;;  %v3451_v27 = vpack.c.bf16 %v244_v16, %v1077_v8  ;;  %v3455_v29 = vld [vmem:[#allocation2 + $0x22] sm:$0xff]  ;;  %v2632_v33 = vpack.c.bf16 %v3435_v22, %v244_v16 }
  0x34   :  { %2835 = vmatpush3.bf16.msra.mxu1 %v3261_v6  ;;  %v180_v6 = vsel %vm3385_vm12, %v3297_v21, %v163_v14  ;;  %2915 = vmatpush3.bf16.msra.mxu0 %v3273_v7  ;;  %v2716_v7 = vunpack.c.h.bf16 %v2723_v2  ;;  %v3453_v28 = vld [vmem:[#allocation2 + $0x12] sm:$0xff]  ;;  %v2601_v31 = vpack.c.bf16 %v3437_v23, %v245_v17  ;;  %v3484_v38 = vld [vmem:[#allocation2 + $0xc1] sm:$0xff] }
  0x35   :  { %2836 = vmatprep.subr.bf16.mxu1 %v3135_v58  ;;  %2822 = vmatprep.mubr.msk.bf16.mxu1 %vm33_vm0, %v3413_v12  ;;  %197 = vst.msk [vmem:[#allocation2 + $0xf1] sm:$0xff] %vm33_vm0, %v180_v6  ;;  %v2637_v36 = vpack.c.bf16 %v3455_v29, %v3453_v28  ;;  %v3486_v39 = vld [vmem:[#allocation2 + $0xd1] sm:$0xff]  ;;  %v3493_v42 = vld [vmem:[#allocation2 + $0xe1] sm:$0xff]  ;;  %v2633_v49 = vpack.c.bf16 %v3484_v38, %v3437_v23 }
  0x36   :  { %2902 = vmatprep.mubr.msk.bf16.mxu0 %vm33_vm0, %v2631_v13  ;;  %2916 = vmatprep.subr.bf16.mxu0 %v3134_v9  ;;  %vm133_vm5 = vcmp.gt.f32.partialorder %v2716_v7, %v3294_v20  ;;  %vm149_vm6 = vcmp.lt.f32.partialorder %v2716_v7, %v3294_v20  ;;  %v3491_v41 = vld [vmem:[#allocation2 + $0x32] sm:$0xff]  ;;  %v3499_v45 = vld [vmem:[#allocation2 + $0x42] sm:$0xff]  ;;  %v3504_v46 = vpack.c.bf16 %v3486_v39, %v3484_v38 }
  0x37   :  { %v166_v40 = vsel %vm149_vm6, %v3301_v24, %v3294_v20  ;;  %v3506_v20 = vld [vmem:[#allocation2 + $0x52] sm:$0xff]  ;;  %v3508_v24 = vld [vmem:[#allocation2 + $0x62] sm:$0xff]  ;;  %v2634_v50 = vpack.c.bf16 %v3493_v42, %v3486_v39 }
  0x38   :  { %2837 = vmatpush3.bf16.msra.mxu1 %v3135_v58  ;;  %2917 = vmatpush3.bf16.msra.mxu0 %v3134_v9  ;;  %v183_v44 = vsel %vm133_vm5, %v3297_v21, %v166_v40  ;;  %v2638_v21 = vpack.c.bf16 %v3499_v45, %v3491_v41  ;;  %v3516_v48 = vld [vmem:[#allocation2 + $0x101] sm:$0xff]  ;;  %v2639_v51 = vpack.c.bf16 %v3508_v24, %v3506_v20  ;;  %v3533_v54 = vld [vmem:[#allocation2 + $0x111] sm:$0xff] }
  0x39   :  { %2854 = vmatprep.subr.bf16.mxu1 %v3430_v19  ;;  %2934 = vmatprep.subr.bf16.mxu0 %v3136_v30  ;;  %200 = vst.msk [vmem:[#allocation2 + $0x121] sm:$0xff] %vm33_vm0, %v183_v44  ;;  %v3536_v56 = vld [vmem:[#allocation2 + $0x10] sm:$0xff]  ;;  %v3541_v59 = vld [vmem:[#allocation2 + $0x82] sm:$0xff]  ;;  %v3545_v60 = vpack.c.bf16 %v3533_v54, %v3516_v48 }
  0x3a   :  { %v3539_v58 = vld [vmem:[#allocation2 + $0x72] sm:$0xff]  ;;  %v3549_v62 = vld [vmem:[#allocation2 + $0xc2] sm:$0xff]  ;;  %v2605_v0 = vpack.c.bf16 %v3536_v56, %v201_v55 }
  0x3b   :  { %2823 = vmatmul.mubr.msk.bf16.gmra.mrb[4].mxu1 %vm33_vm0, %v3451_v27  ;;  %2903 = vmatmul.mubr.msk.bf16.gmra.mrb[4].mxu0 %vm33_vm0, %v2632_v33  ;;  %v3547_v61 = vld [vmem:[#allocation2 + $0xb2] sm:$0xff]  ;;  %v2640_v2 = vpack.c.bf16 %v3541_v59, %v3539_v58  ;;  %v3562_v5 = vld [vmem:[#allocation2 + $0x20] sm:$0xff] }
  0x3c   :  { %2826 = vmatprep.mubr.msk.bf16.mxu1 %vm33_vm0, %v2601_v31  ;;  %v3495_v43 = vld [vmem:[#allocation2 + $0xf1] sm:$0xff]  ;;  %2918 = vmatprep.mubr.msk.bf16.mxu0 %vm33_vm0, %v2637_v36  ;;  %v2641_v3 = vpack.c.bf16 %v3549_v62, %v3547_v61  ;;  %v3567_v9 = vld [vmem:[#allocation2 + $0x40] sm:$0xff] }
  0x3d   :  { %v3512_v47 = vpack.c.bf16 %v3495_v43, %v3493_v42  ;;  %v2635_v52 = vpack.c.bf16 %v3516_v48, %v3495_v43  ;;  %v3564_v8 = vld [vmem:[#allocation2 + $0x30] sm:$0xff]  ;;  %v3574_v13 = vld [vmem:[#allocation2 + $0xe2] sm:$0xff]  ;;  %v3142_v55 = vld [vmem:[%s3854_s1 + $0x78] sm:$0xff]  }
  0x3e   :  { %v3569_v10 = vld [vmem:[#allocation2 + $0x50] sm:$0xff]  ;;  %v2606_v14 = vpack.c.bf16 %v3564_v8, %v3562_v5  ;;  %v3580_v16 = vld [vmem:[#allocation2 + $0x102] sm:$0xff] }
  0x3f   :  { %v3572_v11 = vld [vmem:[#allocation2 + $0xd2] sm:$0xff]  ;;  %v2607_v17 = vpack.c.bf16 %v3569_v10, %v3567_v9  ;;  %v3594_v26 = vld [vmem:[#allocation2 + $0x60] sm:$0xff] }
  0x40   :  { %v3578_v15 = vld [vmem:[#allocation2 + $0xf2] sm:$0xff]  ;;  %v2642_v6 = vpack.c.bf16 %v3574_v13, %v3572_v11  ;;  %v3616_v37 = vld [vmem:[#allocation2 + $0xc0] sm:$0xff] }
  0x41   :  { %v2643_v25 = vpack.c.bf16 %v3580_v16, %v3578_v15  ;;  %v3596_v7 = vld [vmem:[#allocation2 + $0x70] sm:$0xff]  ;;  %v3621_v44 = vld [vmem:[#allocation2 + $0xe0] sm:$0xff] }
  0x42   :  { %v3599_v31 = vld [vmem:[#allocation2 + $0xb0] sm:$0xff]  ;;  %v2608_v34 = vpack.c.bf16 %v3596_v7, %v3594_v26 }
  0x43   :  { %2827 = vmatmul.mubr.msk.bf16.gmra.mrb[8].mxu1 %vm33_vm0, %v3504_v46  ;;  %2919 = vmatmul.mubr.msk.bf16.vlgmr.msra.gmra.mrb[0].mxu0 %vm33_vm0, %v2638_v21  ;;  %v3605_v33 = vld [vmem:[#allocation2 + $0x112] sm:$0xff] }
  0x44   :  { %2830 = vmatprep.mubr.msk.bf16.mxu1 %vm33_vm0, %v3512_v47  ;;  %2935 = vmatpush3.bf16.msra.mxu0 %v3136_v30  ;;  %v209_v30 = vld [vmem:[#allocation2 + $0xa0] sm:$0xff]  ;;  %v3618_v40 = vld [vmem:[#allocation2 + $0xd0] sm:$0xff] }
  0x45   :  { %2922 = vmatprep.mubr.msk.bf16.mxu0 %vm33_vm0, %v2639_v51  ;;  %2936 = vmatprep.subr.bf16.mxu0 %v3138_v53  ;;  %v2609_v35 = vpack.c.bf16 %v3599_v31, %v209_v30  ;;  %v3623_v21 = vld [vmem:[#allocation2 + $0xf0] sm:$0xff]  ;;  %v2610_v51 = vpack.c.bf16 %v3618_v40, %v3616_v37 }
  0x46   :  { %v1992_v23 = vld [vmem:[#allocation2 + $0x132] sm:$0xff] }
  0x48   :  { %2937 = vmatpush3.bf16.msra.mxu0 %v3138_v53  ;;  %v2611_v53 = vpack.c.bf16 %v3623_v21, %v3621_v44 }
  0x49   :  { %2954 = vmatprep.subr.bf16.mxu0 %v3140_v63 }
  0x4b   :  { %2831 = vmatmul.mubr.msk.bf16.gmra.mrb[12].mxu1 %vm33_vm0, %v3545_v60  ;;  %2923 = vmatmul.mubr.msk.bf16.gmra.mrb[4].mxu0 %vm33_vm0, %v2640_v2  ;;  %v3637_v2 = vld [vmem:[#allocation2 + $0x110] sm:$0xff] }
  0x4c   :  { %2838 = vmatprep.mubr.msk.bf16.mxu1 %vm33_vm0, %v2605_v0  ;;  %2926 = vmatprep.mubr.msk.bf16.mxu0 %vm33_vm0, %v2641_v3  ;;  %v3635_v0 = vld [vmem:[#allocation2 + $0x100] sm:$0xff] }
  0x4d   :  { %v620_v3 = vld [vmem:[#allocation2 + $0x2] sm:$0xff] }
  0x4e   :  { %v2613_v30 = vpack.c.bf16 %v3453_v28, %v620_v3  ;;  %v3143_v28 = vld [vmem:[%s3854_s1 + $0x38] sm:$0xff]  }
  0x53   :  { %2839 = vmatmul.mubr.msk.bf16.vlgmr.msra.gmra.mrb[0].mxu1 %vm33_vm0, %v2606_v14  ;;  %2927 = vmatmul.mubr.msk.bf16.gmra.mrb[8].mxu0 %vm33_vm0, %v2642_v6  ;;  %v1532_v6 = vld [vmem:[#allocation2 + $0x90] sm:$0xff] }
  0x54   :  { %2855 = vmatpush3.bf16.msra.mxu1 %v3430_v19  ;;  %2842 = vmatprep.mubr.msk.bf16.mxu1 %vm33_vm0, %v2607_v17  ;;  %v3607_v19 = vld [vmem:[#allocation2 + $0x122] sm:$0xff] }
  0x55   :  { %2856 = vmatprep.subr.bf16.mxu1 %v3139_v18  ;;  %2930 = vmatprep.mubr.msk.bf16.mxu0 %vm33_vm0, %v2643_v25  ;;  %v2644_v36 = vpack.c.bf16 %v3607_v19, %v3605_v33  ;;  %v3144_v25 = vld [vmem:[%s3854_s1 + $0x80] sm:$0xff]  }
  0x58   :  { %2857 = vmatpush3.bf16.msra.mxu1 %v3139_v18  ;;  %v2612_v18 = vpack.c.bf16 %v3637_v2, %v3635_v0 }
  0x59   :  { %2874 = vmatprep.subr.bf16.mxu1 %v3141_v32 }
  0x5b   :  { %2843 = vmatmul.mubr.msk.bf16.gmra.mrb[4].mxu1 %vm33_vm0, %v2608_v34  ;;  %2931 = vmatmul.mubr.msk.bf16.gmra.mrb[12].mxu0 %vm33_vm0, %v2644_v36  ;;  %v1539_v36 = vld [vmem:[#allocation2 + $0x120] sm:$0xff] }
  0x5c   :  { %2846 = vmatprep.mubr.msk.bf16.mxu1 %vm33_vm0, %v2609_v35  ;;  %2938 = vmatprep.mubr.msk.bf16.mxu0 %vm33_vm0, %v2606_v14  ;;  %v3641_v14 = vld [vmem:[#allocation2 + $0x80] sm:$0xff] }
  0x5d   :  { %v2648_v35 = vpack.c.bf16 %v1532_v6, %v3641_v14 }
  0x63   :  { %2847 = vmatmul.mubr.msk.bf16.gmra.mrb[8].mxu1 %vm33_vm0, %v2610_v51  ;;  %2939 = vmatmul.mubr.msk.bf16.vlgmr.msra.gmra.mrb[0].mxu0 %vm33_vm0, %v2607_v17  ;;  %v2615_v17 = vpack.c.bf16 %v3506_v20, %v3499_v45 }
  0x64   :  { %2850 = vmatprep.mubr.msk.bf16.mxu1 %vm33_vm0, %v2611_v53  ;;  %2955 = vmatpush3.bf16.msra.mxu0 %v3140_v63  ;;  %v2614_v63 = vpack.c.bf16 %v3491_v41, %v3455_v29  ;;  %v1540_v29 = vld [vmem:[#allocation2 + $0x130] sm:$0xff]  ;;  %v2616_v41 = vpack.c.bf16 %v3539_v58, %v3508_v24  ;;  %v2619_v24 = vpack.c.bf16 %v3578_v15, %v3574_v13  ;;  %v3145_v58 = vld [vmem:[%s3854_s1 + $0x88] sm:$0xff]  }
  0x65   :  { %2942 = vmatprep.mubr.msk.bf16.mxu0 %vm33_vm0, %v2608_v34  ;;  %2956 = vmatprep.subr.bf16.mxu0 %v3142_v55  ;;  %v628_v34 = vld [vmem:[#allocation2 + $0xa2] sm:$0xff]  ;;  %v2652_v20 = vpack.c.bf16 %v1540_v29, %v1539_v36 }
  0x66   :  { %v2617_v45 = vpack.c.bf16 %v3547_v61, %v628_v34  ;;  %v2620_v61 = vpack.c.bf16 %v3605_v33, %v3580_v16 }
  0x68   :  { %2957 = vmatpush3.bf16.msra.mxu0 %v3142_v55 }
  0x69   :  { %2974 = vmatprep.subr.bf16.mxu0 %v3144_v25 }
  0x6b   :  { %2851 = vmatmul.mubr.msk.bf16.gmra.mrb[12].mxu1 %vm33_vm0, %v2612_v18  ;;  %2943 = vmatmul.mubr.msk.bf16.gmra.mrb[4].mxu0 %vm33_vm0, %v2648_v35 }
  0x6c   :  { %2858 = vmatprep.mubr.msk.bf16.mxu1 %vm33_vm0, %v2613_v30  ;;  %2946 = vmatprep.mubr.msk.bf16.mxu0 %vm33_vm0, %v2610_v51 }
  0x73   :  { %2859 = vmatmul.mubr.msk.bf16.vlgmr.msra.gmra.mrb[0].mxu1 %vm33_vm0, %v2614_v63  ;;  %2947 = vmatmul.mubr.msk.bf16.gmra.mrb[8].mxu0 %vm33_vm0, %v2611_v53 }
  0x74   :  { %2875 = vmatpush3.bf16.msra.mxu1 %v3141_v32  ;;  %2862 = vmatprep.mubr.msk.bf16.mxu1 %vm33_vm0, %v2615_v17  ;;  %v2618_v32 = vpack.c.bf16 %v3572_v11, %v3549_v62  ;;  %v2621_v62 = vpack.c.bf16 %v3562_v5, %v3536_v56  ;;  %v2624_v56 = vpack.c.bf16 %v3641_v14, %v3596_v7 }
  0x75   :  { %2876 = vmatprep.subr.bf16.mxu1 %v3143_v28  ;;  %2950 = vmatprep.mubr.msk.bf16.mxu0 %vm33_vm0, %v2612_v18  ;;  %v2625_v5 = vpack.c.bf16 %v3616_v37, %v3599_v31 }
  0x78   :  { %2877 = vmatpush3.bf16.msra.mxu1 %v3143_v28 }
  0x79   :  { %2994 = vmatprep.subr.bf16.mxu1 %v3196_v1 }
  0x7b   :  { %2863 = vmatmul.mubr.msk.bf16.gmra.mrb[4].mxu1 %vm33_vm0, %v2616_v41  ;;  %2951 = vmatmul.mubr.msk.bf16.gmra.mrb[12].mxu0 %vm33_vm0, %v2652_v20 }
  0x7c   :  { %2866 = vmatprep.mubr.msk.bf16.mxu1 %vm33_vm0, %v2617_v45  ;;  %2958 = vmatprep.mubr.msk.bf16.mxu0 %vm33_vm0, %v3370_v57  ;;  %v1758_v57 = vld [vmem:[#allocation2 + $0x91] sm:$0xff] }
  0x7d   :  { %v2656_v11 = vpack.c.bf16 %v1758_v57, %v3435_v22  ;;  %v1765_v22 = vld [vmem:[#allocation2 + $0x121] sm:$0xff] }
  0x7e   :  { %v2636_v38 = vpack.c.bf16 %v1765_v22, %v3533_v54 }
  0x83   :  { %2867 = vmatmul.mubr.msk.bf16.gmra.mrb[8].mxu1 %vm33_vm0, %v2618_v32  ;;  %2959 = vmatmul.mubr.msk.bf16.vlgmr.msra.gmra.mrb[0].mxu0 %vm33_vm0, %v3413_v12  ;;  %v2622_v12 = vpack.c.bf16 %v3567_v9, %v3564_v8  ;;  %v2628_v8 = vpack.c.bf16 %v1539_v36, %v3637_v2 }
  0x84   :  { %2870 = vmatprep.mubr.msk.bf16.mxu1 %vm33_vm0, %v2619_v24  ;;  %2975 = vmatpush3.bf16.msra.mxu0 %v3144_v25 }
  0x85   :  { %2962 = vmatprep.mubr.msk.bf16.mxu0 %vm33_vm0, %v3451_v27  ;;  %2976 = vmatprep.subr.bf16.mxu0 %v3145_v58  ;;  %v2623_v27 = vpack.c.bf16 %v3594_v26, %v3569_v10 }
  0x88   :  { %2977 = vmatpush3.bf16.msra.mxu0 %v3145_v58 }
  0x8b   :  { %2871 = vmatmul.mubr.msk.bf16.gmra.mrb[12].mxu1 %vm33_vm0, %v2620_v61  ;;  %2963 = vmatmul.mubr.msk.bf16.gmra.mrb[4].mxu0 %vm33_vm0, %v2656_v11 }
  0x8c   :  { %2878 = vmatprep.mubr.msk.bf16.mxu1 %vm33_vm0, %v2621_v62  ;;  %2966 = vmatprep.mubr.msk.bf16.mxu0 %vm33_vm0, %v3504_v46  ;;  %v1766_v46 = vld [vmem:[#allocation2 + $0x131] sm:$0xff] }
  0x93   :  { %2879 = vmatmul.mubr.msk.bf16.vlgmr.msra.gmra.mrb[0].mxu1 %vm33_vm0, %v2622_v12  ;;  %2967 = vmatmul.mubr.msk.bf16.gmra.mrb[8].mxu0 %vm33_vm0, %v3512_v47  ;;  %v2626_v47 = vpack.c.bf16 %v3621_v44, %v3618_v40 }
  0x94   :  { %2996 = vmatpush3.bf16.msra.mxu1 %v3196_v1  ;;  %2882 = vmatprep.mubr.msk.bf16.mxu1 %vm33_vm0, %v2623_v27  ;;  %v2660_v1 = vpack.c.bf16 %v1766_v46, %v1765_v22 }
  0x95   :  { %2995 = vmatprep.subr.bf16.mxu1 %v3211_v4  ;;  %2970 = vmatprep.mubr.msk.bf16.mxu0 %vm33_vm0, %v3545_v60  ;;  %v2627_v60 = vpack.c.bf16 %v3635_v0, %v3623_v21 }
  0x98   :  { %2997 = vmatpush3.bf16.msra.mxu1 %v3211_v4  ;;  %v1984_v4 = vld [vmem:[#allocation2 + $0x92] sm:$0xff] }
  0x99   :  { %v2664_v9 = vpack.c.bf16 %v1984_v4, %v3541_v59 }
  0x9b   :  { %2883 = vmatmul.mubr.msk.bf16.gmra.mrb[4].mxu1 %vm33_vm0, %v2624_v56  ;;  %2971 = vmatmul.mubr.msk.bf16.gmra.mrb[12].mxu0 %vm33_vm0, %v2660_v1 }
  0x9c   :  { %2886 = vmatprep.mubr.msk.bf16.mxu1 %vm33_vm0, %v2625_v5  ;;  %2978 = vmatprep.mubr.msk.bf16.mxu0 %vm33_vm0, %v2614_v63 }
  0xa3   :  { %2887 = vmatmul.mubr.msk.bf16.gmra.mrb[8].mxu1 %vm33_vm0, %v2626_v47  ;;  %2979 = vmatmul.mubr.msk.bf16.vlgmr.msra.gmra.mrb[0].mxu0 %vm33_vm0, %v2615_v17 }
  0xa4   :  { %2890 = vmatprep.mubr.msk.bf16.mxu1 %vm33_vm0, %v2627_v60  ;;  %2982 = vmatprep.mubr.msk.bf16.mxu0 %vm33_vm0, %v2616_v41 }
  0xab   :  { %2891 = vmatmul.mubr.msk.bf16.gmra.mrb[12].mxu1 %vm33_vm0, %v2628_v8  ;;  %2983 = vmatmul.mubr.msk.bf16.gmra.mrb[4].mxu0 %vm33_vm0, %v2664_v9 }
  0xac   :  { %2906 = vmatprep.mubr.msk.bf16.mxu1 %vm33_vm0, %v2633_v49  ;;  %2986 = vmatprep.mubr.msk.bf16.mxu0 %vm33_vm0, %v2618_v32  ;;  %v2668_v49 = vpack.c.bf16 %v1992_v23, %v3607_v19 }
  0xb3   :  { %2907 = vmatmul.mubr.msk.bf16.vlgmr.msra.gmra.mrb[8].mxu1 %vm33_vm0, %v2634_v50  ;;  %2987 = vmatmul.mubr.msk.bf16.gmra.mrb[8].mxu0 %vm33_vm0, %v2619_v24 }
  0xb4   :  { %2910 = vmatprep.mubr.msk.bf16.mxu1 %vm33_vm0, %v2635_v52  ;;  %2990 = vmatprep.mubr.msk.bf16.mxu0 %vm33_vm0, %v2620_v61 }
  0xbb   :  { %2911 = vmatmul.mubr.msk.bf16.gmra.mrb[12].mxu1 %vm33_vm0, %v2636_v38  ;;  %2991 = vmatmul.mubr.msk.bf16.gmra.mrb[12].mxu0 %vm33_vm0, %v2668_v49 }
 0x166   :  { %v2880_v39 = vpop.f32.mrb[0].mxu1 }
 0x167   :  { %v993_v42 = vpop.f32.mrb[1].mxu1 }
 0x168   :  { %v2881_v50 = vpop.f32.mrb[2].mxu1 }
 0x169   :  { %v996_v59 = vpop.f32.mrb[3].mxu1 }
 0x16e   :  { %v2884_v43 = vpop.f32.mrb[4].mxu1 }
 0x16f   :  { %v1009_v48 = vpop.f32.mrb[5].mxu1 }
 0x170   :  { %v2885_v52 = vpop.f32.mrb[6].mxu1 }
 0x171   :  { %v1012_v10 = vpop.f32.mrb[7].mxu1 }
 0x176   :  { %v2980_v13 = vpop.f32.mrb[0].mxu0 }
 0x177   :  { %v2998_v15 = vadd.f32 %v2980_v13, %v2880_v39  ;;  %v2124_v16 = vpop.f32.mrb[1].mxu0 }
 0x178   :  { %v2999_v26 = vadd.f32 %v2124_v16, %v993_v42  ;;  %v2981_v54 = vpop.f32.mrb[2].mxu0 }
 0x179   :  { %v2671_v7 = vpack.c.bf16 %v2998_v15, %v2998_v15  ;;  %v3000_v31 = vadd.f32 %v2981_v54, %v2881_v50  ;;  %v2127_v33 = vpop.f32.mrb[3].mxu0  ;;  %v2324_v44 = vmul.f32 %v2998_v15, %v2998_v15  ;;  %v2287_v14 = vsel %vm33_vm0, %v2998_v15, 0.0 }
 0x17a   :  { %v2669_v19 = vpack.c.bf16 %v2999_v26, %v2999_v26  ;;  %v2322_v37 = vmul.f32 %v2999_v26, %v2999_v26  ;;  %v3001_v40 = vadd.f32 %v2127_v33, %v996_v59  ;;  %v2284_v51 = vsel %vm33_vm0, %v2999_v26, 0.0 }
 0x17b   :  { %2270 = vst.msk [vmem:[%s3856_s3 + $0x8] sm:$0xf] %vm2267_vm7, %v2671_v7  ;;  %v2672_v21 = vpack.c.bf16 %v3000_v31, %v3000_v31  ;;  %v2325_v2 = vmul.f32 %v3000_v31, %v3000_v31  ;;  %v2341_v28 = vsel %vm33_vm0, %v2324_v44, 0.0  ;;  %v2289_v29 = vsel %vm33_vm0, %v3000_v31, 0.0 }
 0x17c   :  { %2268 = vst.msk [vmem:[%s3856_s3] sm:$0xf] %vm2267_vm7, %v2669_v19  ;;  %v2670_v53 = vpack.c.bf16 %v3001_v40, %v3001_v40  ;;  %v2285_v55 = vsel %vm33_vm0, %v3001_v40, 0.0  ;;  %v2323_v0 = vmul.f32 %v3001_v40, %v3001_v40  ;;  %v2338_v6 = vsel %vm33_vm0, %v2322_v37, 0.0 }
 0x17d   :  { %2271 = vst.msk [vmem:[%s3856_s3 + $0xc] sm:$0xf] %vm2267_vm7, %v2672_v21  ;;  %v2286_v3 = vadd.f32 %v2285_v55, %v2284_v51  ;;  %v2343_v41 = vsel %vm33_vm0, %v2325_v2, 0.0 }
 0x17e   :  { %2269 = vst.msk [vmem:[%s3856_s3 + $0x4] sm:$0xf] %vm2267_vm7, %v2670_v53  ;;  %v2339_v18 = vsel %vm33_vm0, %v2323_v0, 0.0  ;;  %v2984_v25 = vpop.f32.mrb[4].mxu0 }
 0x17f   :  { %v2288_v30 = vadd.f32 %v2287_v14, %v2286_v3  ;;  %v2340_v35 = vadd.f32 %v2339_v18, %v2338_v6  ;;  %v3002_v63 = vadd.f32 %v2984_v25, %v2884_v43  ;;  %v2140_v17 = vpop.f32.mrb[5].mxu0 }
 0x180   :  { %v3003_v34 = vadd.f32 %v2140_v17, %v1009_v48  ;;  %v2985_v36 = vpop.f32.mrb[6].mxu0 }
 0x181   :  { %v2342_v45 = vadd.f32 %v2341_v28, %v2340_v35  ;;  %v2675_v20 = vpack.c.bf16 %v3002_v63, %v3002_v63  ;;  %v2143_v32 = vpop.f32.mrb[7].mxu0  ;;  %v2290_v58 = vadd.f32 %v2289_v29, %v2288_v30  ;;  %v3004_v11 = vadd.f32 %v2985_v36, %v2885_v52 }
 0x182   :  { %v2673_v24 = vpack.c.bf16 %v3003_v34, %v3003_v34  ;;  %v2291_v57 = vsel %vm33_vm0, %v3003_v34, 0.0  ;;  %v2326_v61 = vmul.f32 %v3003_v34, %v3003_v34  ;;  %v3005_v12 = vadd.f32 %v2143_v32, %v1012_v10 }
 0x183   :  { %2274 = vst.msk [vmem:[%s3856_s3 + $0x18] sm:$0xf] %vm2267_vm7, %v2675_v20  ;;  %v2344_v62 = vadd.f32 %v2343_v41, %v2342_v45  ;;  %v2292_v27 = vadd.f32 %v2291_v57, %v2290_v58  ;;  %v2328_v56 = vmul.f32 %v3002_v63, %v3002_v63  ;;  %v2676_v1 = vpack.c.bf16 %v3004_v11, %v3004_v11 }
 0x184   :  { %2272 = vst.msk [vmem:[%s3856_s3 + $0x10] sm:$0xf] %vm2267_vm7, %v2673_v24  ;;  %v2345_v22 = vsel %vm33_vm0, %v2326_v61, 0.0  ;;  %v2674_v60 = vpack.c.bf16 %v3005_v12, %v3005_v12  ;;  %v2293_v4 = vsel %vm33_vm0, %v3005_v12, 0.0  ;;  %v2327_v8 = vmul.f32 %v3005_v12, %v3005_v12 }
 0x185   :  { %v2346_v5 = vadd.f32 %v2345_v22, %v2344_v62  ;;  %2275 = vst.msk [vmem:[%s3856_s3 + $0x1c] sm:$0xf] %vm2267_vm7, %v2676_v1  ;;  %v2294_v38 = vadd.f32 %v2293_v4, %v2292_v27  ;;  %v2295_v50 = vsel %vm33_vm0, %v3002_v63, 0.0  ;;  %v2329_v59 = vmul.f32 %v3004_v11, %v3004_v11 }
 0x186   :  { %v2908_v46 = vpop.f32.mrb[8].mxu1  ;;  %v2988_v9 = vpop.f32.mrb[8].mxu0  ;;  %2273 = vst.msk [vmem:[%s3856_s3 + $0x14] sm:$0xf] %vm2267_vm7, %v2674_v60  ;;  %v2347_v43 = vsel %vm33_vm0, %v2327_v8, 0.0  ;;  %v2349_v10 = vsel %vm33_vm0, %v2328_v56, 0.0 }
 0x187   :  { %v1251_v47 = vpop.f32.mrb[9].mxu1  ;;  %v3006_v49 = vadd.f32 %v2988_v9, %v2908_v46  ;;  %v2156_v39 = vpop.f32.mrb[9].mxu0  ;;  %v2296_v13 = vadd.f32 %v2295_v50, %v2294_v38  ;;  %v2348_v15 = vadd.f32 %v2347_v43, %v2346_v5  ;;  %v2297_v54 = vsel %vm33_vm0, %v3004_v11, 0.0 }
 0x188   :  { %v2909_v23 = vpop.f32.mrb[10].mxu1  ;;  %v3007_v48 = vadd.f32 %v2156_v39, %v1251_v47  ;;  %v2989_v52 = vpop.f32.mrb[10].mxu0  ;;  %v2351_v21 = vsel %vm33_vm0, %v2329_v59, 0.0 }
 0x189   :  { %v1254_v42 = vpop.f32.mrb[11].mxu1  ;;  %v2679_v16 = vpack.c.bf16 %v3006_v49, %v3006_v49  ;;  %v2159_v26 = vpop.f32.mrb[11].mxu0  ;;  %v2350_v19 = vadd.f32 %v2349_v10, %v2348_v15  ;;  %v2298_v37 = vadd.f32 %v2297_v54, %v2296_v13  ;;  %v3008_v40 = vadd.f32 %v2989_v52, %v2909_v23 }
 0x18a   :  { %v2677_v7 = vpack.c.bf16 %v3007_v48, %v3007_v48  ;;  %v2299_v31 = vsel %vm33_vm0, %v3007_v48, 0.0  ;;  %v2330_v33 = vmul.f32 %v3007_v48, %v3007_v48  ;;  %v3009_v44 = vadd.f32 %v2159_v26, %v1254_v42 }
 0x18b   :  { %2278 = vst.msk [vmem:[%s3856_s3 + $0x28] sm:$0xf] %vm2267_vm7, %v2679_v16  ;;  %v2332_v55 = vmul.f32 %v3006_v49, %v3006_v49  ;;  %v2300_v0 = vadd.f32 %v2299_v31, %v2298_v37  ;;  %v2352_v2 = vadd.f32 %v2351_v21, %v2350_v19  ;;  %v2680_v3 = vpack.c.bf16 %v3008_v40, %v3008_v40 }
 0x18c   :  { %2276 = vst.msk [vmem:[%s3856_s3 + $0x20] sm:$0xf] %vm2267_vm7, %v2677_v7  ;;  %v2353_v51 = vsel %vm33_vm0, %v2330_v33, 0.0  ;;  %v2678_v6 = vpack.c.bf16 %v3009_v44, %v3009_v44  ;;  %v2301_v18 = vsel %vm33_vm0, %v3009_v44, 0.0  ;;  %v2331_v25 = vmul.f32 %v3009_v44, %v3009_v44 }
 0x18d   :  { %v2354_v63 = vadd.f32 %v2353_v51, %v2352_v2  ;;  %2279 = vst.msk [vmem:[%s3856_s3 + $0x2c] sm:$0xf] %vm2267_vm7, %v2680_v3  ;;  %v2302_v17 = vadd.f32 %v2301_v18, %v2300_v0  ;;  %v2303_v29 = vsel %vm33_vm0, %v3006_v49, 0.0  ;;  %v2333_v41 = vmul.f32 %v3008_v40, %v3008_v40 }
 0x18e   :  { %v2912_v53 = vpop.f32.mrb[12].mxu1  ;;  %v2992_v30 = vpop.f32.mrb[12].mxu0  ;;  %2277 = vst.msk [vmem:[%s3856_s3 + $0x24] sm:$0xf] %vm2267_vm7, %v2678_v6  ;;  %v2355_v45 = vsel %vm33_vm0, %v2331_v25, 0.0  ;;  %v2357_v24 = vsel %vm33_vm0, %v2332_v55, 0.0 }
 0x18f   :  { %v1267_v14 = vpop.f32.mrb[13].mxu1  ;;  %v3010_v28 = vadd.f32 %v2992_v30, %v2912_v53  ;;  %v2172_v34 = vpop.f32.mrb[13].mxu0  ;;  %v2304_v58 = vadd.f32 %v2303_v29, %v2302_v17  ;;  %v2356_v57 = vadd.f32 %v2355_v45, %v2354_v63  ;;  %v2305_v11 = vsel %vm33_vm0, %v3008_v40, 0.0 }
 0x190   :  { %v2913_v35 = vpop.f32.mrb[14].mxu1  ;;  %v3011_v20 = vadd.f32 %v2172_v34, %v1267_v14  ;;  %v2993_v32 = vpop.f32.mrb[14].mxu0  ;;  %v2359_v47 = vsel %vm33_vm0, %v2333_v41, 0.0 }
 0x191   :  { %v1270_v36 = vpop.f32.mrb[15].mxu1  ;;  %v2683_v61 = vpack.c.bf16 %v3010_v28, %v3010_v28  ;;  %v2175_v62 = vpop.f32.mrb[15].mxu0  ;;  %v2358_v46 = vadd.f32 %v2357_v24, %v2356_v57  ;;  %v2306_v56 = vadd.f32 %v2305_v11, %v2304_v58  ;;  %v3012_v5 = vadd.f32 %v2993_v32, %v2913_v35 }
 0x192   :  { %v2681_v12 = vpack.c.bf16 %v3011_v20, %v3011_v20  ;;  %v2307_v27 = vsel %vm33_vm0, %v3011_v20, 0.0  ;;  %v2334_v22 = vmul.f32 %v3011_v20, %v3011_v20  ;;  %v3013_v1 = vadd.f32 %v2175_v62, %v1270_v36 }
 0x193   :  { %2282 = vst.msk [vmem:[%s3856_s3 + $0x38] sm:$0xf] %vm2267_vm7, %v2683_v61  ;;  %v2308_v4 = vadd.f32 %v2307_v27, %v2306_v56  ;;  %v2360_v8 = vadd.f32 %v2359_v47, %v2358_v46  ;;  %v2684_v9 = vpack.c.bf16 %v3012_v5, %v3012_v5  ;;  %v2336_v23 = vmul.f32 %v3010_v28, %v3010_v28 }
 0x194   :  { %2280 = vst.msk [vmem:[%s3856_s3 + $0x30] sm:$0xf] %vm2267_vm7, %v2681_v12  ;;  %v2361_v60 = vsel %vm33_vm0, %v2334_v22, 0.0  ;;  %v2682_v38 = vpack.c.bf16 %v3013_v1, %v3013_v1  ;;  %v2309_v49 = vsel %vm33_vm0, %v3013_v1, 0.0  ;;  %v2335_v39 = vmul.f32 %v3013_v1, %v3013_v1 }
 0x195   :  { %v2362_v42 = vadd.f32 %v2361_v60, %v2360_v8  ;;  %2283 = vst.msk [vmem:[%s3856_s3 + $0x3c] sm:$0xf] %vm2267_vm7, %v2684_v9  ;;  %v2310_v50 = vadd.f32 %v2309_v49, %v2308_v4  ;;  %v2311_v59 = vsel %vm33_vm0, %v3010_v28, 0.0  ;;  %v2337_v43 = vmul.f32 %v3012_v5, %v3012_v5 }
 0x196   :  { %2281 = vst.msk [vmem:[%s3856_s3 + $0x34] sm:$0xf] %vm2267_vm7, %v2682_v38  ;;  %v2363_v48 = vsel %vm33_vm0, %v2335_v39, 0.0  ;;  %v2365_v13 = vsel %vm33_vm0, %v2336_v23, 0.0  ;;  %v2313_v15 = vsel %vm33_vm0, %v3012_v5, 0.0 }
 0x197   :  { %v2312_v52 = vadd.f32 %v2311_v59, %v2310_v50  ;;  %v2364_v10 = vadd.f32 %v2363_v48, %v2362_v42  ;;  %v2367_v54 = vsel %vm33_vm0, %v2337_v43, 0.0 }
 0x199   :  { %v2314_v16 = vadd.f32 %v2313_v15, %v2312_v52  ;;  %v2366_v26 = vadd.f32 %v2365_v13, %v2364_v10 }
 0x19b   :  { %v2315_v7 = vrot.slane %v2314_v16, 4  ;;  %v2368_v31 = vadd.f32 %v2367_v54, %v2366_v26 }
 0x19d   :  { %v2316_v33 = vadd.f32 %v2315_v7, %v2314_v16  ;;  %v2369_v19 = vrot.slane %v2368_v31, 4 }
 0x19f   :  { %v2317_v37 = vrot.slane %v2316_v33, 2  ;;  %v2370_v40 = vadd.f32 %v2369_v19, %v2368_v31 }
 0x1a1   :  { %v2318_v44 = vadd.f32 %v2317_v37, %v2316_v33  ;;  %v2371_v21 = vrot.slane %v2370_v40, 2 }
 0x1a3   :  { %v2319_v51 = vrot.slane %v2318_v44, 1  ;;  %v2372_v53 = vadd.f32 %v2371_v21, %v2370_v40 }
 0x1a5   :  { %v2320_v55 = vadd.f32 %v2319_v51, %v2318_v44  ;;  %v2373_v0 = vrot.slane %v2372_v53, 1 }
 0x1a7   :  { %2321 = vst.msk [vmem:[%s3857_s4] sm:$0x1] %vm44_vm2, %v2320_v55  ;;  %v2374_v2 = vadd.f32 %v2373_v0, %v2372_v53 }
 0x1a9   :  { %2375 = vst.msk [vmem:[%s3857_s4 + $0x1] sm:$0x1] %vm44_vm2, %v2374_v2 }
 0x1aa   :  { %2384 = vsyncpa [#allocation4], 1 }

</bundles_post_ra>
